<compile_context>
chip_gen: v5e
topology: v5e:2x2
jax: 0.10.0
libtpu: 0.0.40
codegen_flags: <defaults>
</compile_context>

<pallas_src>
import jax
import jax.numpy as jnp
from jax import lax
from jax.experimental import pallas as pl
from jax.experimental.pallas import tpu as pltpu

# ----------------------- scaled-down BERT config -----------------------------
B = 2            # batch
S = 8            # sequence length
H = 128          # hidden size            (bert-base: 768)
NUM_HEADS = 4    # attention heads        (bert-base: 12)
HEAD_DIM = H // NUM_HEADS
FFN = 256        # intermediate size      (bert-base: 3072)
NUM_LAYERS = 2   # encoder layers         (bert-base: 12)
VOCAB = 512      # vocab size             (bert-base: 30522)
TYPE_VOCAB = 2
MAX_POS = 64
NUM_CLASSES = 2  # nn.Linear(hidden, 2)
CLS_PAD = 128    # classifier lane padding (keeps the final store lane-dense)
LN_EPS = 1e-12
ATTN_SCALE = 1.0 / (HEAD_DIM ** 0.5)
SQRT_HALF = 0.7071067811865476


# ------------------------------ Pallas kernel --------------------------------
def _layer_norm_f32(y, g, b):
    """LayerNorm over the last axis, fp32 in / fp32 out."""
    mean = jnp.mean(y, axis=-1, keepdims=True)
    var = jnp.mean(jnp.square(y - mean), axis=-1, keepdims=True)
    return (y - mean) * lax.rsqrt(var + LN_EPS) * g + b


def _bert_forward_kernel(
        emb_ref, emb_g_ref, emb_b_ref, mask_ref,
        wq_ref, bq_ref, wk_ref, bk_ref, wv_ref, bv_ref,
        wo_ref, bo_ref, ln1_g_ref, ln1_b_ref,
        wi_ref, bi_ref, wf_ref, bf_ref, ln2_g_ref, ln2_b_ref,
        pool_w_ref, pool_b_ref, out_w_ref, out_b_ref,
        o_ref):
    """Whole post-embedding BERT forward for the full (B*S, H) activation.

    emb_ref:  (B*S, H) f32 summed embeddings
    mask_ref: (B, S) f32 additive attention bias
    wq/wk/wv: (L, NH, H, dh) bf16 (wq pre-scaled by 1/sqrt(dh))
    wo:       (L, NH, dh, H) bf16
    wi/wf:    (L, H, FFN) / (L, FFN, H) bf16
    o_ref:    (B, CLS_PAD) f32 padded logits
    """
    # ---- embedding LayerNorm (fp32 statistics) ----
    x = _layer_norm_f32(emb_ref[...].astype(jnp.float32),
                        emb_g_ref[...].astype(jnp.float32),
                        emb_b_ref[...].astype(jnp.float32))      # (B*S, H) f32

    # additive mask bias rows, hoisted out of the layer/head loops
    bias_rows = [mask_ref[b:b + 1, :].astype(jnp.float32) for b in range(B)]

    for l in range(NUM_LAYERS):                                  # static unroll
        x_bf = x.astype(jnp.bfloat16)

        # ---- multi-head self-attention; per-head weights on leading dims ----
        attn = jnp.zeros((B * S, H), jnp.float32)
        for h in range(NUM_HEADS):                               # static unroll
            qh = (jnp.dot(x_bf, wq_ref[l, h],
                          preferred_element_type=jnp.float32)
                  + bq_ref[l, h].astype(jnp.float32))            # (B*S, dh)
            kh = (jnp.dot(x_bf, wk_ref[l, h],
                          preferred_element_type=jnp.float32)
                  + bk_ref[l, h].astype(jnp.float32))
            vh = (jnp.dot(x_bf, wv_ref[l, h],
                          preferred_element_type=jnp.float32)
                  + bv_ref[l, h].astype(jnp.float32))
            qh = qh.astype(jnp.bfloat16)
            kh = kh.astype(jnp.bfloat16)
            vh = vh.astype(jnp.bfloat16)

            ctx_rows = []
            for b in range(B):                                   # static unroll
                rows = slice(b * S, (b + 1) * S)                 # sublane-aligned
                # scores = q @ k^T (scale already folded into wq/bq)
                s = lax.dot_general(qh[rows], kh[rows],
                                    (((1,), (1,)), ((), ())),
                                    preferred_element_type=jnp.float32)
                s = s + bias_rows[b]                             # (S,S) + (1,S)
                s = s - jnp.max(s, axis=-1, keepdims=True)
                p = jnp.exp(s)
                p = p * pl.reciprocal(jnp.sum(p, axis=-1, keepdims=True),
                                      approx=True)
                ctx_rows.append(
                    jnp.dot(p.astype(jnp.bfloat16), vh[rows],
                            preferred_element_type=jnp.float32))  # (S, dh)
            ctx = jnp.concatenate(ctx_rows, axis=0)              # (B*S, dh)
            # fused per-head output projection, accumulated in fp32
            attn = attn + jnp.dot(ctx.astype(jnp.bfloat16), wo_ref[l, h],
                                  preferred_element_type=jnp.float32)

        y = attn + bo_ref[l].astype(jnp.float32) + x             # residual
        x = _layer_norm_f32(y, ln1_g_ref[l].astype(jnp.float32),
                            ln1_b_ref[l].astype(jnp.float32))

        # ---- FFN: up-proj + exact (erf) GELU + down-proj + residual + LN ----
        x_bf = x.astype(jnp.bfloat16)
        hmid = (jnp.dot(x_bf, wi_ref[l], preferred_element_type=jnp.float32)
                + bi_ref[l].astype(jnp.float32))                 # (B*S, FFN)
        hmid = 0.5 * hmid * (1.0 + lax.erf(hmid * SQRT_HALF))
        y = (jnp.dot(hmid.astype(jnp.bfloat16), wf_ref[l],
                     preferred_element_type=jnp.float32)
             + bf_ref[l].astype(jnp.float32) + x)
        x = _layer_norm_f32(y, ln2_g_ref[l].astype(jnp.float32),
                            ln2_b_ref[l].astype(jnp.float32))

    # ---- pooler(tanh on [CLS]) + Dropout(0.3)=identity + Linear(H, 2) ----
    cls = jnp.concatenate([x[b * S:b * S + 1, :] for b in range(B)], axis=0)
    pooled = jnp.tanh(
        jnp.dot(cls.astype(jnp.bfloat16), pool_w_ref[...],
                preferred_element_type=jnp.float32)
        + pool_b_ref[...].astype(jnp.float32))                   # (B, H) f32
    logits = (jnp.dot(pooled.astype(jnp.bfloat16), out_w_ref[...],
                      preferred_element_type=jnp.float32)
              + out_b_ref[...].astype(jnp.float32))              # (B, CLS_PAD)
    o_ref[...] = logits.astype(o_ref.dtype)


# ------------------------------ kernel wrapper --------------------------------
def _full_spec(shape):
    """Whole-array block for a grid=(1,) call (all dims equal full extents)."""
    zeros = (0,) * len(shape)
    return pl.BlockSpec(shape, lambda i, _z=zeros: _z)


def pallas_bert_forward(emb_flat, mask_bias, kp):
    """emb_flat: (B*S, H) f32; mask_bias: (B, S) f32; kp: kernel-layout params."""
    args = (
        emb_flat, kp["emb_ln_g"], kp["emb_ln_b"], mask_bias,
        kp["wq"], kp["bq"], kp["wk"], kp["bk"], kp["wv"], kp["bv"],
        kp["wo"], kp["bo"], kp["ln1_g"], kp["ln1_b"],
        kp["wi"], kp["bi"], kp["wf"], kp["bf"], kp["ln2_g"], kp["ln2_b"],
        kp["pool_w"], kp["pool_b"], kp["out_w_pad"], kp["out_b_pad"],
    )
    return pl.pallas_call(
        _bert_forward_kernel,
        out_shape=jax.ShapeDtypeStruct((B, CLS_PAD), jnp.float32),
        grid=(1,),
        in_specs=[_full_spec(a.shape) for a in args],
        out_specs=_full_spec((B, CLS_PAD)),
        compiler_params=pltpu.CompilerParams(
            dimension_semantics=("arbitrary",)),
    )(*args)


# ------------------------------- model glue -----------------------------------
@jax.jit
def bert_model_forward(params, ids, mask, token_type_ids):
    # Embedding gathers stay in XLA (no clean tiny-shape Pallas equivalent).
    # TODO(synk): a DMA-gather Pallas kernel could fuse these at larger scale.
    emb = (params["word_emb"][ids]
           + params["pos_emb"][:S][None, :, :]
           + params["type_emb"][token_type_ids])                 # (B, S, H) f32
    mask_bias = (1.0 - mask.astype(jnp.float32)) * -10000.0      # (B, S)
    logits_pad = pallas_bert_forward(emb.reshape(B * S, H), mask_bias,
                                     params["kernel"])           # (B, 128) f32
    return logits_pad[:, :NUM_CLASSES]


# ------------------------------ parameter init --------------------------------
def init_params(key):
    keys = iter(jax.random.split(key, 64))

    def nrmf(shape):
        return 0.02 * jax.random.normal(next(keys), shape, jnp.float32)

    L, NH, DH = NUM_LAYERS, NUM_HEADS, HEAD_DIM

    # classifier weight padded to 128 lanes (final (B, 2) sliced outside)
    out_w = nrmf((H, NUM_CLASSES))
    out_w_pad = jnp.zeros((H, CLS_PAD), jnp.float32).at[:, :NUM_CLASSES].set(out_w)

    kernel = dict(
        emb_ln_g=jnp.ones((1, H), jnp.float32),
        emb_ln_b=jnp.zeros((1, H), jnp.float32),
        # ATTN_SCALE folded into the query projection (zero runtime cost)
        wq=(nrmf((L, NH, H, DH)) * ATTN_SCALE).astype(jnp.bfloat16),
        bq=jnp.zeros((L, NH, 1, DH), jnp.float32),   # (bias * scale) == 0 here
        wk=nrmf((L, NH, H, DH)).astype(jnp.bfloat16),
        bk=jnp.zeros((L, NH, 1, DH), jnp.float32),
        wv=nrmf((L, NH, H, DH)).astype(jnp.bfloat16),
        bv=jnp.zeros((L, NH, 1, DH), jnp.float32),
        wo=nrmf((L, NH, DH, H)).astype(jnp.bfloat16),
        bo=jnp.zeros((L, 1, H), jnp.float32),
        ln1_g=jnp.ones((L, 1, H), jnp.float32),
        ln1_b=jnp.zeros((L, 1, H), jnp.float32),
        wi=nrmf((L, H, FFN)).astype(jnp.bfloat16),
        bi=jnp.zeros((L, 1, FFN), jnp.float32),
        wf=nrmf((L, FFN, H)).astype(jnp.bfloat16),
        bf=jnp.zeros((L, 1, H), jnp.float32),
        ln2_g=jnp.ones((L, 1, H), jnp.float32),
        ln2_b=jnp.zeros((L, 1, H), jnp.float32),
        pool_w=nrmf((H, H)).astype(jnp.bfloat16),
        pool_b=jnp.zeros((1, H), jnp.float32),
        out_w_pad=out_w_pad.astype(jnp.bfloat16),
        out_b_pad=jnp.zeros((1, CLS_PAD), jnp.float32),
    )
    return dict(
        word_emb=nrmf((VOCAB, H)),
        pos_emb=nrmf((MAX_POS, H)),
        type_emb=nrmf((TYPE_VOCAB, H)),
        kernel=kernel,
    )


if __name__ == "__main__":
    key = jax.random.PRNGKey(0)
    k_params, k_ids = jax.random.split(key)
    params = init_params(k_params)

    ids = jax.random.randint(k_ids, (B, S), 0, VOCAB, dtype=jnp.int32)
    mask = jnp.ones((B, S), dtype=jnp.int32)
    token_type_ids = jnp.zeros((B, S), dtype=jnp.int32)

    logits = bert_model_forward(params, ids, mask, token_type_ids)
    jax.block_until_ready(logits)
    assert logits.shape == (B, NUM_CLASSES)
    assert bool(jnp.all(jnp.isfinite(logits)))
    print("KERNEL_OK")
</pallas_src>

<mosaic_0001>
module attributes {stable_mosaic.version = 11 : i64} {
  func.func @_bert_forward_kernel(%arg0: i32, %arg1: memref<16x128xf32, #tpu.memory_space<vmem>>, %arg2: memref<1x128xf32, #tpu.memory_space<vmem>>, %arg3: memref<1x128xf32, #tpu.memory_space<vmem>>, %arg4: memref<2x8xf32, #tpu.memory_space<vmem>>, %arg5: memref<2x4x128x32xbf16, #tpu.memory_space<vmem>>, %arg6: memref<2x4x1x32xf32, #tpu.memory_space<vmem>>, %arg7: memref<2x4x128x32xbf16, #tpu.memory_space<vmem>>, %arg8: memref<2x4x1x32xf32, #tpu.memory_space<vmem>>, %arg9: memref<2x4x128x32xbf16, #tpu.memory_space<vmem>>, %arg10: memref<2x4x1x32xf32, #tpu.memory_space<vmem>>, %arg11: memref<2x4x32x128xbf16, #tpu.memory_space<vmem>>, %arg12: memref<2x1x128xf32, #tpu.memory_space<vmem>>, %arg13: memref<2x1x128xf32, #tpu.memory_space<vmem>>, %arg14: memref<2x1x128xf32, #tpu.memory_space<vmem>>, %arg15: memref<2x128x256xbf16, #tpu.memory_space<vmem>>, %arg16: memref<2x1x256xf32, #tpu.memory_space<vmem>>, %arg17: memref<2x256x128xbf16, #tpu.memory_space<vmem>>, %arg18: memref<2x1x128xf32, #tpu.memory_space<vmem>>, %arg19: memref<2x1x128xf32, #tpu.memory_space<vmem>>, %arg20: memref<2x1x128xf32, #tpu.memory_space<vmem>>, %arg21: memref<128x128xbf16, #tpu.memory_space<vmem>>, %arg22: memref<1x128xf32, #tpu.memory_space<vmem>>, %arg23: memref<128x128xbf16, #tpu.memory_space<vmem>>, %arg24: memref<1x128xf32, #tpu.memory_space<vmem>>, %arg25: memref<2x128xf32, #tpu.memory_space<vmem>>) attributes {dimension_semantics = [#tpu.dimension_semantics<arbitrary>], iteration_bounds = array<i64: 1>, scalar_prefetch = 0 : i64, scratch_operands = 0 : i64, tpu.core_type = #tpu.core_type<tc>, window_params = [{pipeline_mode = #tpu.pipeline_mode<synchronous>, transform_indices = @transform_0, window_bounds = array<i64: 16, 128>}, {pipeline_mode = #tpu.pipeline_mode<synchronous>, transform_indices = @transform_1, window_bounds = array<i64: 1, 128>}, {pipeline_mode = #tpu.pipeline_mode<synchronous>, transform_indices = @transform_2, window_bounds = array<i64: 1, 128>}, {pipeline_mode = #tpu.pipeline_mode<synchronous>, transform_indices = @transform_3, window_bounds = array<i64: 2, 8>}, {pipeline_mode = #tpu.pipeline_mode<synchronous>, transform_indices = @transform_4, window_bounds = array<i64: 2, 4, 128, 32>}, {pipeline_mode = #tpu.pipeline_mode<synchronous>, transform_indices = @transform_5, window_bounds = array<i64: 2, 4, 1, 32>}, {pipeline_mode = #tpu.pipeline_mode<synchronous>, transform_indices = @transform_6, window_bounds = array<i64: 2, 4, 128, 32>}, {pipeline_mode = #tpu.pipeline_mode<synchronous>, transform_indices = @transform_7, window_bounds = array<i64: 2, 4, 1, 32>}, {pipeline_mode = #tpu.pipeline_mode<synchronous>, transform_indices = @transform_8, window_bounds = array<i64: 2, 4, 128, 32>}, {pipeline_mode = #tpu.pipeline_mode<synchronous>, transform_indices = @transform_9, window_bounds = array<i64: 2, 4, 1, 32>}, {pipeline_mode = #tpu.pipeline_mode<synchronous>, transform_indices = @transform_10, window_bounds = array<i64: 2, 4, 32, 128>}, {pipeline_mode = #tpu.pipeline_mode<synchronous>, transform_indices = @transform_11, window_bounds = array<i64: 2, 1, 128>}, {pipeline_mode = #tpu.pipeline_mode<synchronous>, transform_indices = @transform_12, window_bounds = array<i64: 2, 1, 128>}, {pipeline_mode = #tpu.pipeline_mode<synchronous>, transform_indices = @transform_13, window_bounds = array<i64: 2, 1, 128>}, {pipeline_mode = #tpu.pipeline_mode<synchronous>, transform_indices = @transform_14, window_bounds = array<i64: 2, 128, 256>}, {pipeline_mode = #tpu.pipeline_mode<synchronous>, transform_indices = @transform_15, window_bounds = array<i64: 2, 1, 256>}, {pipeline_mode = #tpu.pipeline_mode<synchronous>, transform_indices = @transform_16, window_bounds = array<i64: 2, 256, 128>}, {pipeline_mode = #tpu.pipeline_mode<synchronous>, transform_indices = @transform_17, window_bounds = array<i64: 2, 1, 128>}, {pipeline_mode = #tpu.pipeline_mode<synchronous>, transform_indices = @transform_18, window_bounds = array<i64: 2, 1, 128>}, {pipeline_mode = #tpu.pipeline_mode<synchronous>, transform_indices = @transform_19, window_bounds = array<i64: 2, 1, 128>}, {pipeline_mode = #tpu.pipeline_mode<synchronous>, transform_indices = @transform_20, window_bounds = array<i64: 128, 128>}, {pipeline_mode = #tpu.pipeline_mode<synchronous>, transform_indices = @transform_21, window_bounds = array<i64: 1, 128>}, {pipeline_mode = #tpu.pipeline_mode<synchronous>, transform_indices = @transform_22, window_bounds = array<i64: 128, 128>}, {pipeline_mode = #tpu.pipeline_mode<synchronous>, transform_indices = @transform_23, window_bounds = array<i64: 1, 128>}, {pipeline_mode = #tpu.pipeline_mode<synchronous>, transform_indices = @transform_24, window_bounds = array<i64: 2, 128>}]} {
    %c0 = arith.constant 0 : index
    %c0_0 = arith.constant 0 : index
    %0 = vector.load %arg1[%c0, %c0_0] : memref<16x128xf32, #tpu.memory_space<vmem>>, vector<16x128xf32>
    %c0_1 = arith.constant 0 : index
    %c0_2 = arith.constant 0 : index
    %1 = vector.load %arg2[%c0_1, %c0_2] : memref<1x128xf32, #tpu.memory_space<vmem>>, vector<1x128xf32>
    %c0_3 = arith.constant 0 : index
    %c0_4 = arith.constant 0 : index
    %2 = vector.load %arg3[%c0_3, %c0_4] : memref<1x128xf32, #tpu.memory_space<vmem>>, vector<1x128xf32>
    %cst = arith.constant dense<0.000000e+00> : vector<16xf32>
    %3 = vector.multi_reduction <add>, %0, %cst [1] : vector<16x128xf32> to vector<16xf32>
    %4 = vector.shape_cast %3 : vector<16xf32> to vector<16x1xf32>
    %cst_5 = arith.constant 1.280000e+02 : f32
    %5 = vector.broadcast %cst_5 : f32 to vector<16x1xf32>
    %6 = arith.divf %4, %5 : vector<16x1xf32>
    %7 = vector.broadcast %6 : vector<16x1xf32> to vector<16x128xf32>
    %8 = arith.subf %0, %7 : vector<16x128xf32>
    %9 = arith.mulf %8, %8 : vector<16x128xf32>
    %cst_6 = arith.constant dense<0.000000e+00> : vector<16xf32>
    %10 = vector.multi_reduction <add>, %9, %cst_6 [1] : vector<16x128xf32> to vector<16xf32>
    %11 = vector.shape_cast %10 : vector<16xf32> to vector<16x1xf32>
    %cst_7 = arith.constant 1.280000e+02 : f32
    %12 = vector.broadcast %cst_7 : f32 to vector<16x1xf32>
    %13 = arith.divf %11, %12 : vector<16x1xf32>
    %14 = vector.broadcast %6 : vector<16x1xf32> to vector<16x128xf32>
    %15 = arith.subf %0, %14 : vector<16x128xf32>
    %cst_8 = arith.constant 9.99999996E-13 : f32
    %16 = vector.broadcast %cst_8 : f32 to vector<16x1xf32>
    %17 = arith.addf %13, %16 : vector<16x1xf32>
    %18 = math.rsqrt %17 : vector<16x1xf32>
    %19 = vector.broadcast %18 : vector<16x1xf32> to vector<16x128xf32>
    %20 = arith.mulf %15, %19 : vector<16x128xf32>
    %21 = vector.broadcast %1 : vector<1x128xf32> to vector<16x128xf32>
    %22 = arith.mulf %20, %21 : vector<16x128xf32>
    %23 = vector.broadcast %2 : vector<1x128xf32> to vector<16x128xf32>
    %24 = arith.addf %22, %23 : vector<16x128xf32>
    %c0_9 = arith.constant 0 : index
    %c0_10 = arith.constant 0 : index
    %25 = vector.load %arg4[%c0_9, %c0_10] : memref<2x8xf32, #tpu.memory_space<vmem>>, vector<1x8xf32>
    %c1 = arith.constant 1 : index
    %c0_11 = arith.constant 0 : index
    %26 = vector.load %arg4[%c1, %c0_11] : memref<2x8xf32, #tpu.memory_space<vmem>>, vector<1x8xf32>
    %27 = arith.truncf %24 : vector<16x128xf32> to vector<16x128xbf16>
    %cst_12 = arith.constant 0.000000e+00 : f32
    %28 = vector.broadcast %cst_12 : f32 to vector<16x128xf32>
    %c0_13 = arith.constant 0 : index
    %c0_14 = arith.constant 0 : index
    %c0_15 = arith.constant 0 : index
    %c0_16 = arith.constant 0 : index
    %29 = vector.load %arg5[%c0_13, %c0_14, %c0_15, %c0_16] : memref<2x4x128x32xbf16, #tpu.memory_space<vmem>>, vector<1x1x128x32xbf16>
    %30 = vector.shape_cast %29 : vector<1x1x128x32xbf16> to vector<128x32xbf16>
    %cst_17 = arith.constant dense<0.000000e+00> : vector<16x32xf32>
    %31 = tpu.matmul %27, %30, %cst_17 {dimension_numbers = #tpu.dot_dimension_numbers<[1], [0], [0], [1], [0, 0, 1, 1], [], []>} : vector<16x128xbf16>, vector<128x32xbf16>, vector<16x32xf32> -> vector<16x32xf32>
    %c0_18 = arith.constant 0 : index
    %c0_19 = arith.constant 0 : index
    %c0_20 = arith.constant 0 : index
    %c0_21 = arith.constant 0 : index
    %32 = vector.load %arg6[%c0_18, %c0_19, %c0_20, %c0_21] : memref<2x4x1x32xf32, #tpu.memory_space<vmem>>, vector<1x1x1x32xf32>
    %33 = vector.shape_cast %32 : vector<1x1x1x32xf32> to vector<1x32xf32>
    %34 = vector.broadcast %33 : vector<1x32xf32> to vector<16x32xf32>
    %35 = arith.addf %31, %34 : vector<16x32xf32>
    %c0_22 = arith.constant 0 : index
    %c0_23 = arith.constant 0 : index
    %c0_24 = arith.constant 0 : index
    %c0_25 = arith.constant 0 : index
    %36 = vector.load %arg7[%c0_22, %c0_23, %c0_24, %c0_25] : memref<2x4x128x32xbf16, #tpu.memory_space<vmem>>, vector<1x1x128x32xbf16>
    %37 = vector.shape_cast %36 : vector<1x1x128x32xbf16> to vector<128x32xbf16>
    %cst_26 = arith.constant dense<0.000000e+00> : vector<16x32xf32>
    %38 = tpu.matmul %27, %37, %cst_26 {dimension_numbers = #tpu.dot_dimension_numbers<[1], [0], [0], [1], [0, 0, 1, 1], [], []>} : vector<16x128xbf16>, vector<128x32xbf16>, vector<16x32xf32> -> vector<16x32xf32>
    %c0_27 = arith.constant 0 : index
    %c0_28 = arith.constant 0 : index
    %c0_29 = arith.constant 0 : index
    %c0_30 = arith.constant 0 : index
    %39 = vector.load %arg8[%c0_27, %c0_28, %c0_29, %c0_30] : memref<2x4x1x32xf32, #tpu.memory_space<vmem>>, vector<1x1x1x32xf32>
    %40 = vector.shape_cast %39 : vector<1x1x1x32xf32> to vector<1x32xf32>
    %41 = vector.broadcast %40 : vector<1x32xf32> to vector<16x32xf32>
    %42 = arith.addf %38, %41 : vector<16x32xf32>
    %c0_31 = arith.constant 0 : index
    %c0_32 = arith.constant 0 : index
    %c0_33 = arith.constant 0 : index
    %c0_34 = arith.constant 0 : index
    %43 = vector.load %arg9[%c0_31, %c0_32, %c0_33, %c0_34] : memref<2x4x128x32xbf16, #tpu.memory_space<vmem>>, vector<1x1x128x32xbf16>
    %44 = vector.shape_cast %43 : vector<1x1x128x32xbf16> to vector<128x32xbf16>
    %cst_35 = arith.constant dense<0.000000e+00> : vector<16x32xf32>
    %45 = tpu.matmul %27, %44, %cst_35 {dimension_numbers = #tpu.dot_dimension_numbers<[1], [0], [0], [1], [0, 0, 1, 1], [], []>} : vector<16x128xbf16>, vector<128x32xbf16>, vector<16x32xf32> -> vector<16x32xf32>
    %c0_36 = arith.constant 0 : index
    %c0_37 = arith.constant 0 : index
    %c0_38 = arith.constant 0 : index
    %c0_39 = arith.constant 0 : index
    %46 = vector.load %arg10[%c0_36, %c0_37, %c0_38, %c0_39] : memref<2x4x1x32xf32, #tpu.memory_space<vmem>>, vector<1x1x1x32xf32>
    %47 = vector.shape_cast %46 : vector<1x1x1x32xf32> to vector<1x32xf32>
    %48 = vector.broadcast %47 : vector<1x32xf32> to vector<16x32xf32>
    %49 = arith.addf %45, %48 : vector<16x32xf32>
    %50 = arith.truncf %35 : vector<16x32xf32> to vector<16x32xbf16>
    %51 = arith.truncf %42 : vector<16x32xf32> to vector<16x32xbf16>
    %52 = arith.truncf %49 : vector<16x32xf32> to vector<16x32xbf16>
    %53 = vector.extract_strided_slice %50 {offsets = [0, 0], sizes = [8, 32], strides = [1, 1]} : vector<16x32xbf16> to vector<8x32xbf16>
    %54 = vector.extract_strided_slice %51 {offsets = [0, 0], sizes = [8, 32], strides = [1, 1]} : vector<16x32xbf16> to vector<8x32xbf16>
    %cst_40 = arith.constant dense<0.000000e+00> : vector<8x8xf32>
    %55 = tpu.matmul %53, %54, %cst_40 {dimension_numbers = #tpu.dot_dimension_numbers<[1], [1], [0], [0], [0, 0, 1, 0], [], []>} : vector<8x32xbf16>, vector<8x32xbf16>, vector<8x8xf32> -> vector<8x8xf32>
    %56 = vector.broadcast %25 : vector<1x8xf32> to vector<8x8xf32>
    %57 = arith.addf %55, %56 : vector<8x8xf32>
    %cst_41 = arith.constant dense<0xFF800000> : vector<8xf32>
    %58 = vector.multi_reduction <maximumf>, %57, %cst_41 [1] : vector<8x8xf32> to vector<8xf32>
    %59 = vector.shape_cast %58 : vector<8xf32> to vector<8x1xf32>
    %60 = vector.broadcast %59 : vector<8x1xf32> to vector<8x8xf32>
    %61 = arith.subf %57, %60 : vector<8x8xf32>
    %62 = math.exp %61 : vector<8x8xf32>
    %cst_42 = arith.constant dense<0.000000e+00> : vector<8xf32>
    %63 = vector.multi_reduction <add>, %62, %cst_42 [1] : vector<8x8xf32> to vector<8xf32>
    %64 = vector.shape_cast %63 : vector<8xf32> to vector<8x1xf32>
    %65 = tpu.reciprocal %64 {approx = true} : vector<8x1xf32> -> vector<8x1xf32>
    %66 = vector.broadcast %65 : vector<8x1xf32> to vector<8x8xf32>
    %67 = arith.mulf %62, %66 : vector<8x8xf32>
    %68 = arith.truncf %67 : vector<8x8xf32> to vector<8x8xbf16>
    %69 = vector.extract_strided_slice %52 {offsets = [0, 0], sizes = [8, 32], strides = [1, 1]} : vector<16x32xbf16> to vector<8x32xbf16>
    %cst_43 = arith.constant dense<0.000000e+00> : vector<8x32xf32>
    %70 = tpu.matmul %68, %69, %cst_43 {dimension_numbers = #tpu.dot_dimension_numbers<[1], [0], [0], [1], [0, 0, 1, 1], [], []>} : vector<8x8xbf16>, vector<8x32xbf16>, vector<8x32xf32> -> vector<8x32xf32>
    %71 = vector.extract_strided_slice %50 {offsets = [8, 0], sizes = [8, 32], strides = [1, 1]} : vector<16x32xbf16> to vector<8x32xbf16>
    %72 = vector.extract_strided_slice %51 {offsets = [8, 0], sizes = [8, 32], strides = [1, 1]} : vector<16x32xbf16> to vector<8x32xbf16>
    %cst_44 = arith.constant dense<0.000000e+00> : vector<8x8xf32>
    %73 = tpu.matmul %71, %72, %cst_44 {dimension_numbers = #tpu.dot_dimension_numbers<[1], [1], [0], [0], [0, 0, 1, 0], [], []>} : vector<8x32xbf16>, vector<8x32xbf16>, vector<8x8xf32> -> vector<8x8xf32>
    %74 = vector.broadcast %26 : vector<1x8xf32> to vector<8x8xf32>
    %75 = arith.addf %73, %74 : vector<8x8xf32>
    %cst_45 = arith.constant dense<0xFF800000> : vector<8xf32>
    %76 = vector.multi_reduction <maximumf>, %75, %cst_45 [1] : vector<8x8xf32> to vector<8xf32>
    %77 = vector.shape_cast %76 : vector<8xf32> to vector<8x1xf32>
    %78 = vector.broadcast %77 : vector<8x1xf32> to vector<8x8xf32>
    %79 = arith.subf %75, %78 : vector<8x8xf32>
    %80 = math.exp %79 : vector<8x8xf32>
    %cst_46 = arith.constant dense<0.000000e+00> : vector<8xf32>
    %81 = vector.multi_reduction <add>, %80, %cst_46 [1] : vector<8x8xf32> to vector<8xf32>
    %82 = vector.shape_cast %81 : vector<8xf32> to vector<8x1xf32>
    %83 = tpu.reciprocal %82 {approx = true} : vector<8x1xf32> -> vector<8x1xf32>
    %84 = vector.broadcast %83 : vector<8x1xf32> to vector<8x8xf32>
    %85 = arith.mulf %80, %84 : vector<8x8xf32>
    %86 = arith.truncf %85 : vector<8x8xf32> to vector<8x8xbf16>
    %87 = vector.extract_strided_slice %52 {offsets = [8, 0], sizes = [8, 32], strides = [1, 1]} : vector<16x32xbf16> to vector<8x32xbf16>
    %cst_47 = arith.constant dense<0.000000e+00> : vector<8x32xf32>
    %88 = tpu.matmul %86, %87, %cst_47 {dimension_numbers = #tpu.dot_dimension_numbers<[1], [0], [0], [1], [0, 0, 1, 1], [], []>} : vector<8x8xbf16>, vector<8x32xbf16>, vector<8x32xf32> -> vector<8x32xf32>
    %89 = tpu.concatenate %70, %88 in 0 : vector<8x32xf32>, vector<8x32xf32> -> vector<16x32xf32>
    %90 = arith.truncf %89 : vector<16x32xf32> to vector<16x32xbf16>
    %c0_48 = arith.constant 0 : index
    %c0_49 = arith.constant 0 : index
    %c0_50 = arith.constant 0 : index
    %c0_51 = arith.constant 0 : index
    %91 = vector.load %arg11[%c0_48, %c0_49, %c0_50, %c0_51] : memref<2x4x32x128xbf16, #tpu.memory_space<vmem>>, vector<1x1x32x128xbf16>
    %92 = vector.shape_cast %91 : vector<1x1x32x128xbf16> to vector<32x128xbf16>
    %cst_52 = arith.constant dense<0.000000e+00> : vector<16x128xf32>
    %93 = tpu.matmul %90, %92, %cst_52 {dimension_numbers = #tpu.dot_dimension_numbers<[1], [0], [0], [1], [0, 0, 1, 1], [], []>} : vector<16x32xbf16>, vector<32x128xbf16>, vector<16x128xf32> -> vector<16x128xf32>
    %94 = arith.addf %28, %93 : vector<16x128xf32>
    %c0_53 = arith.constant 0 : index
    %c1_54 = arith.constant 1 : index
    %c0_55 = arith.constant 0 : index
    %c0_56 = arith.constant 0 : index
    %95 = vector.load %arg5[%c0_53, %c1_54, %c0_55, %c0_56] : memref<2x4x128x32xbf16, #tpu.memory_space<vmem>>, vector<1x1x128x32xbf16>
    %96 = vector.shape_cast %95 : vector<1x1x128x32xbf16> to vector<128x32xbf16>
    %cst_57 = arith.constant dense<0.000000e+00> : vector<16x32xf32>
    %97 = tpu.matmul %27, %96, %cst_57 {dimension_numbers = #tpu.dot_dimension_numbers<[1], [0], [0], [1], [0, 0, 1, 1], [], []>} : vector<16x128xbf16>, vector<128x32xbf16>, vector<16x32xf32> -> vector<16x32xf32>
    %c0_58 = arith.constant 0 : index
    %c1_59 = arith.constant 1 : index
    %c0_60 = arith.constant 0 : index
    %c0_61 = arith.constant 0 : index
    %98 = vector.load %arg6[%c0_58, %c1_59, %c0_60, %c0_61] : memref<2x4x1x32xf32, #tpu.memory_space<vmem>>, vector<1x1x1x32xf32>
    %99 = vector.shape_cast %98 : vector<1x1x1x32xf32> to vector<1x32xf32>
    %100 = vector.broadcast %99 : vector<1x32xf32> to vector<16x32xf32>
    %101 = arith.addf %97, %100 : vector<16x32xf32>
    %c0_62 = arith.constant 0 : index
    %c1_63 = arith.constant 1 : index
    %c0_64 = arith.constant 0 : index
    %c0_65 = arith.constant 0 : index
    %102 = vector.load %arg7[%c0_62, %c1_63, %c0_64, %c0_65] : memref<2x4x128x32xbf16, #tpu.memory_space<vmem>>, vector<1x1x128x32xbf16>
    %103 = vector.shape_cast %102 : vector<1x1x128x32xbf16> to vector<128x32xbf16>
    %cst_66 = arith.constant dense<0.000000e+00> : vector<16x32xf32>
    %104 = tpu.matmul %27, %103, %cst_66 {dimension_numbers = #tpu.dot_dimension_numbers<[1], [0], [0], [1], [0, 0, 1, 1], [], []>} : vector<16x128xbf16>, vector<128x32xbf16>, vector<16x32xf32> -> vector<16x32xf32>
    %c0_67 = arith.constant 0 : index
    %c1_68 = arith.constant 1 : index
    %c0_69 = arith.constant 0 : index
    %c0_70 = arith.constant 0 : index
    %105 = vector.load %arg8[%c0_67, %c1_68, %c0_69, %c0_70] : memref<2x4x1x32xf32, #tpu.memory_space<vmem>>, vector<1x1x1x32xf32>
    %106 = vector.shape_cast %105 : vector<1x1x1x32xf32> to vector<1x32xf32>
    %107 = vector.broadcast %106 : vector<1x32xf32> to vector<16x32xf32>
    %108 = arith.addf %104, %107 : vector<16x32xf32>
    %c0_71 = arith.constant 0 : index
    %c1_72 = arith.constant 1 : index
    %c0_73 = arith.constant 0 : index
    %c0_74 = arith.constant 0 : index
    %109 = vector.load %arg9[%c0_71, %c1_72, %c0_73, %c0_74] : memref<2x4x128x32xbf16, #tpu.memory_space<vmem>>, vector<1x1x128x32xbf16>
    %110 = vector.shape_cast %109 : vector<1x1x128x32xbf16> to vector<128x32xbf16>
    %cst_75 = arith.constant dense<0.000000e+00> : vector<16x32xf32>
    %111 = tpu.matmul %27, %110, %cst_75 {dimension_numbers = #tpu.dot_dimension_numbers<[1], [0], [0], [1], [0, 0, 1, 1], [], []>} : vector<16x128xbf16>, vector<128x32xbf16>, vector<16x32xf32> -> vector<16x32xf32>
    %c0_76 = arith.constant 0 : index
    %c1_77 = arith.constant 1 : index
    %c0_78 = arith.constant 0 : index
    %c0_79 = arith.constant 0 : index
    %112 = vector.load %arg10[%c0_76, %c1_77, %c0_78, %c0_79] : memref<2x4x1x32xf32, #tpu.memory_space<vmem>>, vector<1x1x1x32xf32>
    %113 = vector.shape_cast %112 : vector<1x1x1x32xf32> to vector<1x32xf32>
    %114 = vector.broadcast %113 : vector<1x32xf32> to vector<16x32xf32>
    %115 = arith.addf %111, %114 : vector<16x32xf32>
    %116 = arith.truncf %101 : vector<16x32xf32> to vector<16x32xbf16>
    %117 = arith.truncf %108 : vector<16x32xf32> to vector<16x32xbf16>
    %118 = arith.truncf %115 : vector<16x32xf32> to vector<16x32xbf16>
    %119 = vector.extract_strided_slice %116 {offsets = [0, 0], sizes = [8, 32], strides = [1, 1]} : vector<16x32xbf16> to vector<8x32xbf16>
    %120 = vector.extract_strided_slice %117 {offsets = [0, 0], sizes = [8, 32], strides = [1, 1]} : vector<16x32xbf16> to vector<8x32xbf16>
    %cst_80 = arith.constant dense<0.000000e+00> : vector<8x8xf32>
    %121 = tpu.matmul %119, %120, %cst_80 {dimension_numbers = #tpu.dot_dimension_numbers<[1], [1], [0], [0], [0, 0, 1, 0], [], []>} : vector<8x32xbf16>, vector<8x32xbf16>, vector<8x8xf32> -> vector<8x8xf32>
    %122 = vector.broadcast %25 : vector<1x8xf32> to vector<8x8xf32>
    %123 = arith.addf %121, %122 : vector<8x8xf32>
    %cst_81 = arith.constant dense<0xFF800000> : vector<8xf32>
    %124 = vector.multi_reduction <maximumf>, %123, %cst_81 [1] : vector<8x8xf32> to vector<8xf32>
    %125 = vector.shape_cast %124 : vector<8xf32> to vector<8x1xf32>
    %126 = vector.broadcast %125 : vector<8x1xf32> to vector<8x8xf32>
    %127 = arith.subf %123, %126 : vector<8x8xf32>
    %128 = math.exp %127 : vector<8x8xf32>
    %cst_82 = arith.constant dense<0.000000e+00> : vector<8xf32>
    %129 = vector.multi_reduction <add>, %128, %cst_82 [1] : vector<8x8xf32> to vector<8xf32>
    %130 = vector.shape_cast %129 : vector<8xf32> to vector<8x1xf32>
    %131 = tpu.reciprocal %130 {approx = true} : vector<8x1xf32> -> vector<8x1xf32>
    %132 = vector.broadcast %131 : vector<8x1xf32> to vector<8x8xf32>
    %133 = arith.mulf %128, %132 : vector<8x8xf32>
    %134 = arith.truncf %133 : vector<8x8xf32> to vector<8x8xbf16>
    %135 = vector.extract_strided_slice %118 {offsets = [0, 0], sizes = [8, 32], strides = [1, 1]} : vector<16x32xbf16> to vector<8x32xbf16>
    %cst_83 = arith.constant dense<0.000000e+00> : vector<8x32xf32>
    %136 = tpu.matmul %134, %135, %cst_83 {dimension_numbers = #tpu.dot_dimension_numbers<[1], [0], [0], [1], [0, 0, 1, 1], [], []>} : vector<8x8xbf16>, vector<8x32xbf16>, vector<8x32xf32> -> vector<8x32xf32>
    %137 = vector.extract_strided_slice %116 {offsets = [8, 0], sizes = [8, 32], strides = [1, 1]} : vector<16x32xbf16> to vector<8x32xbf16>
    %138 = vector.extract_strided_slice %117 {offsets = [8, 0], sizes = [8, 32], strides = [1, 1]} : vector<16x32xbf16> to vector<8x32xbf16>
    %cst_84 = arith.constant dense<0.000000e+00> : vector<8x8xf32>
    %139 = tpu.matmul %137, %138, %cst_84 {dimension_numbers = #tpu.dot_dimension_numbers<[1], [1], [0], [0], [0, 0, 1, 0], [], []>} : vector<8x32xbf16>, vector<8x32xbf16>, vector<8x8xf32> -> vector<8x8xf32>
    %140 = vector.broadcast %26 : vector<1x8xf32> to vector<8x8xf32>
    %141 = arith.addf %139, %140 : vector<8x8xf32>
    %cst_85 = arith.constant dense<0xFF800000> : vector<8xf32>
    %142 = vector.multi_reduction <maximumf>, %141, %cst_85 [1] : vector<8x8xf32> to vector<8xf32>
    %143 = vector.shape_cast %142 : vector<8xf32> to vector<8x1xf32>
    %144 = vector.broadcast %143 : vector<8x1xf32> to vector<8x8xf32>
    %145 = arith.subf %141, %144 : vector<8x8xf32>
    %146 = math.exp %145 : vector<8x8xf32>
    %cst_86 = arith.constant dense<0.000000e+00> : vector<8xf32>
    %147 = vector.multi_reduction <add>, %146, %cst_86 [1] : vector<8x8xf32> to vector<8xf32>
    %148 = vector.shape_cast %147 : vector<8xf32> to vector<8x1xf32>
    %149 = tpu.reciprocal %148 {approx = true} : vector<8x1xf32> -> vector<8x1xf32>
    %150 = vector.broadcast %149 : vector<8x1xf32> to vector<8x8xf32>
    %151 = arith.mulf %146, %150 : vector<8x8xf32>
    %152 = arith.truncf %151 : vector<8x8xf32> to vector<8x8xbf16>
    %153 = vector.extract_strided_slice %118 {offsets = [8, 0], sizes = [8, 32], strides = [1, 1]} : vector<16x32xbf16> to vector<8x32xbf16>
    %cst_87 = arith.constant dense<0.000000e+00> : vector<8x32xf32>
    %154 = tpu.matmul %152, %153, %cst_87 {dimension_numbers = #tpu.dot_dimension_numbers<[1], [0], [0], [1], [0, 0, 1, 1], [], []>} : vector<8x8xbf16>, vector<8x32xbf16>, vector<8x32xf32> -> vector<8x32xf32>
    %155 = tpu.concatenate %136, %154 in 0 : vector<8x32xf32>, vector<8x32xf32> -> vector<16x32xf32>
    %156 = arith.truncf %155 : vector<16x32xf32> to vector<16x32xbf16>
    %c0_88 = arith.constant 0 : index
    %c1_89 = arith.constant 1 : index
    %c0_90 = arith.constant 0 : index
    %c0_91 = arith.constant 0 : index
    %157 = vector.load %arg11[%c0_88, %c1_89, %c0_90, %c0_91] : memref<2x4x32x128xbf16, #tpu.memory_space<vmem>>, vector<1x1x32x128xbf16>
    %158 = vector.shape_cast %157 : vector<1x1x32x128xbf16> to vector<32x128xbf16>
    %cst_92 = arith.constant dense<0.000000e+00> : vector<16x128xf32>
    %159 = tpu.matmul %156, %158, %cst_92 {dimension_numbers = #tpu.dot_dimension_numbers<[1], [0], [0], [1], [0, 0, 1, 1], [], []>} : vector<16x32xbf16>, vector<32x128xbf16>, vector<16x128xf32> -> vector<16x128xf32>
    %160 = arith.addf %94, %159 : vector<16x128xf32>
    %c0_93 = arith.constant 0 : index
    %c2 = arith.constant 2 : index
    %c0_94 = arith.constant 0 : index
    %c0_95 = arith.constant 0 : index
    %161 = vector.load %arg5[%c0_93, %c2, %c0_94, %c0_95] : memref<2x4x128x32xbf16, #tpu.memory_space<vmem>>, vector<1x1x128x32xbf16>
    %162 = vector.shape_cast %161 : vector<1x1x128x32xbf16> to vector<128x32xbf16>
    %cst_96 = arith.constant dense<0.000000e+00> : vector<16x32xf32>
    %163 = tpu.matmul %27, %162, %cst_96 {dimension_numbers = #tpu.dot_dimension_numbers<[1], [0], [0], [1], [0, 0, 1, 1], [], []>} : vector<16x128xbf16>, vector<128x32xbf16>, vector<16x32xf32> -> vector<16x32xf32>
    %c0_97 = arith.constant 0 : index
    %c2_98 = arith.constant 2 : index
    %c0_99 = arith.constant 0 : index
    %c0_100 = arith.constant 0 : index
    %164 = vector.load %arg6[%c0_97, %c2_98, %c0_99, %c0_100] : memref<2x4x1x32xf32, #tpu.memory_space<vmem>>, vector<1x1x1x32xf32>
    %165 = vector.shape_cast %164 : vector<1x1x1x32xf32> to vector<1x32xf32>
    %166 = vector.broadcast %165 : vector<1x32xf32> to vector<16x32xf32>
    %167 = arith.addf %163, %166 : vector<16x32xf32>
    %c0_101 = arith.constant 0 : index
    %c2_102 = arith.constant 2 : index
    %c0_103 = arith.constant 0 : index
    %c0_104 = arith.constant 0 : index
    %168 = vector.load %arg7[%c0_101, %c2_102, %c0_103, %c0_104] : memref<2x4x128x32xbf16, #tpu.memory_space<vmem>>, vector<1x1x128x32xbf16>
    %169 = vector.shape_cast %168 : vector<1x1x128x32xbf16> to vector<128x32xbf16>
    %cst_105 = arith.constant dense<0.000000e+00> : vector<16x32xf32>
    %170 = tpu.matmul %27, %169, %cst_105 {dimension_numbers = #tpu.dot_dimension_numbers<[1], [0], [0], [1], [0, 0, 1, 1], [], []>} : vector<16x128xbf16>, vector<128x32xbf16>, vector<16x32xf32> -> vector<16x32xf32>
    %c0_106 = arith.constant 0 : index
    %c2_107 = arith.constant 2 : index
    %c0_108 = arith.constant 0 : index
    %c0_109 = arith.constant 0 : index
    %171 = vector.load %arg8[%c0_106, %c2_107, %c0_108, %c0_109] : memref<2x4x1x32xf32, #tpu.memory_space<vmem>>, vector<1x1x1x32xf32>
    %172 = vector.shape_cast %171 : vector<1x1x1x32xf32> to vector<1x32xf32>
    %173 = vector.broadcast %172 : vector<1x32xf32> to vector<16x32xf32>
    %174 = arith.addf %170, %173 : vector<16x32xf32>
    %c0_110 = arith.constant 0 : index
    %c2_111 = arith.constant 2 : index
    %c0_112 = arith.constant 0 : index
    %c0_113 = arith.constant 0 : index
    %175 = vector.load %arg9[%c0_110, %c2_111, %c0_112, %c0_113] : memref<2x4x128x32xbf16, #tpu.memory_space<vmem>>, vector<1x1x128x32xbf16>
    %176 = vector.shape_cast %175 : vector<1x1x128x32xbf16> to vector<128x32xbf16>
    %cst_114 = arith.constant dense<0.000000e+00> : vector<16x32xf32>
    %177 = tpu.matmul %27, %176, %cst_114 {dimension_numbers = #tpu.dot_dimension_numbers<[1], [0], [0], [1], [0, 0, 1, 1], [], []>} : vector<16x128xbf16>, vector<128x32xbf16>, vector<16x32xf32> -> vector<16x32xf32>
    %c0_115 = arith.constant 0 : index
    %c2_116 = arith.constant 2 : index
    %c0_117 = arith.constant 0 : index
    %c0_118 = arith.constant 0 : index
    %178 = vector.load %arg10[%c0_115, %c2_116, %c0_117, %c0_118] : memref<2x4x1x32xf32, #tpu.memory_space<vmem>>, vector<1x1x1x32xf32>
    %179 = vector.shape_cast %178 : vector<1x1x1x32xf32> to vector<1x32xf32>
    %180 = vector.broadcast %179 : vector<1x32xf32> to vector<16x32xf32>
    %181 = arith.addf %177, %180 : vector<16x32xf32>
    %182 = arith.truncf %167 : vector<16x32xf32> to vector<16x32xbf16>
    %183 = arith.truncf %174 : vector<16x32xf32> to vector<16x32xbf16>
    %184 = arith.truncf %181 : vector<16x32xf32> to vector<16x32xbf16>
    %185 = vector.extract_strided_slice %182 {offsets = [0, 0], sizes = [8, 32], strides = [1, 1]} : vector<16x32xbf16> to vector<8x32xbf16>
    %186 = vector.extract_strided_slice %183 {offsets = [0, 0], sizes = [8, 32], strides = [1, 1]} : vector<16x32xbf16> to vector<8x32xbf16>
    %cst_119 = arith.constant dense<0.000000e+00> : vector<8x8xf32>
    %187 = tpu.matmul %185, %186, %cst_119 {dimension_numbers = #tpu.dot_dimension_numbers<[1], [1], [0], [0], [0, 0, 1, 0], [], []>} : vector<8x32xbf16>, vector<8x32xbf16>, vector<8x8xf32> -> vector<8x8xf32>
    %188 = vector.broadcast %25 : vector<1x8xf32> to vector<8x8xf32>
    %189 = arith.addf %187, %188 : vector<8x8xf32>
    %cst_120 = arith.constant dense<0xFF800000> : vector<8xf32>
    %190 = vector.multi_reduction <maximumf>, %189, %cst_120 [1] : vector<8x8xf32> to vector<8xf32>
    %191 = vector.shape_cast %190 : vector<8xf32> to vector<8x1xf32>
    %192 = vector.broadcast %191 : vector<8x1xf32> to vector<8x8xf32>
    %193 = arith.subf %189, %192 : vector<8x8xf32>
    %194 = math.exp %193 : vector<8x8xf32>
    %cst_121 = arith.constant dense<0.000000e+00> : vector<8xf32>
    %195 = vector.multi_reduction <add>, %194, %cst_121 [1] : vector<8x8xf32> to vector<8xf32>
    %196 = vector.shape_cast %195 : vector<8xf32> to vector<8x1xf32>
    %197 = tpu.reciprocal %196 {approx = true} : vector<8x1xf32> -> vector<8x1xf32>
    %198 = vector.broadcast %197 : vector<8x1xf32> to vector<8x8xf32>
    %199 = arith.mulf %194, %198 : vector<8x8xf32>
    %200 = arith.truncf %199 : vector<8x8xf32> to vector<8x8xbf16>
    %201 = vector.extract_strided_slice %184 {offsets = [0, 0], sizes = [8, 32], strides = [1, 1]} : vector<16x32xbf16> to vector<8x32xbf16>
    %cst_122 = arith.constant dense<0.000000e+00> : vector<8x32xf32>
    %202 = tpu.matmul %200, %201, %cst_122 {dimension_numbers = #tpu.dot_dimension_numbers<[1], [0], [0], [1], [0, 0, 1, 1], [], []>} : vector<8x8xbf16>, vector<8x32xbf16>, vector<8x32xf32> -> vector<8x32xf32>
    %203 = vector.extract_strided_slice %182 {offsets = [8, 0], sizes = [8, 32], strides = [1, 1]} : vector<16x32xbf16> to vector<8x32xbf16>
    %204 = vector.extract_strided_slice %183 {offsets = [8, 0], sizes = [8, 32], strides = [1, 1]} : vector<16x32xbf16> to vector<8x32xbf16>
    %cst_123 = arith.constant dense<0.000000e+00> : vector<8x8xf32>
    %205 = tpu.matmul %203, %204, %cst_123 {dimension_numbers = #tpu.dot_dimension_numbers<[1], [1], [0], [0], [0, 0, 1, 0], [], []>} : vector<8x32xbf16>, vector<8x32xbf16>, vector<8x8xf32> -> vector<8x8xf32>
    %206 = vector.broadcast %26 : vector<1x8xf32> to vector<8x8xf32>
    %207 = arith.addf %205, %206 : vector<8x8xf32>
    %cst_124 = arith.constant dense<0xFF800000> : vector<8xf32>
    %208 = vector.multi_reduction <maximumf>, %207, %cst_124 [1] : vector<8x8xf32> to vector<8xf32>
    %209 = vector.shape_cast %208 : vector<8xf32> to vector<8x1xf32>
    %210 = vector.broadcast %209 : vector<8x1xf32> to vector<8x8xf32>
    %211 = arith.subf %207, %210 : vector<8x8xf32>
    %212 = math.exp %211 : vector<8x8xf32>
    %cst_125 = arith.constant dense<0.000000e+00> : vector<8xf32>
    %213 = vector.multi_reduction <add>, %212, %cst_125 [1] : vector<8x8xf32> to vector<8xf32>
    %214 = vector.shape_cast %213 : vector<8xf32> to vector<8x1xf32>
    %215 = tpu.reciprocal %214 {approx = true} : vector<8x1xf32> -> vector<8x1xf32>
    %216 = vector.broadcast %215 : vector<8x1xf32> to vector<8x8xf32>
    %217 = arith.mulf %212, %216 : vector<8x8xf32>
    %218 = arith.truncf %217 : vector<8x8xf32> to vector<8x8xbf16>
    %219 = vector.extract_strided_slice %184 {offsets = [8, 0], sizes = [8, 32], strides = [1, 1]} : vector<16x32xbf16> to vector<8x32xbf16>
    %cst_126 = arith.constant dense<0.000000e+00> : vector<8x32xf32>
    %220 = tpu.matmul %218, %219, %cst_126 {dimension_numbers = #tpu.dot_dimension_numbers<[1], [0], [0], [1], [0, 0, 1, 1], [], []>} : vector<8x8xbf16>, vector<8x32xbf16>, vector<8x32xf32> -> vector<8x32xf32>
    %221 = tpu.concatenate %202, %220 in 0 : vector<8x32xf32>, vector<8x32xf32> -> vector<16x32xf32>
    %222 = arith.truncf %221 : vector<16x32xf32> to vector<16x32xbf16>
    %c0_127 = arith.constant 0 : index
    %c2_128 = arith.constant 2 : index
    %c0_129 = arith.constant 0 : index
    %c0_130 = arith.constant 0 : index
    %223 = vector.load %arg11[%c0_127, %c2_128, %c0_129, %c0_130] : memref<2x4x32x128xbf16, #tpu.memory_space<vmem>>, vector<1x1x32x128xbf16>
    %224 = vector.shape_cast %223 : vector<1x1x32x128xbf16> to vector<32x128xbf16>
    %cst_131 = arith.constant dense<0.000000e+00> : vector<16x128xf32>
    %225 = tpu.matmul %222, %224, %cst_131 {dimension_numbers = #tpu.dot_dimension_numbers<[1], [0], [0], [1], [0, 0, 1, 1], [], []>} : vector<16x32xbf16>, vector<32x128xbf16>, vector<16x128xf32> -> vector<16x128xf32>
    %226 = arith.addf %160, %225 : vector<16x128xf32>
    %c0_132 = arith.constant 0 : index
    %c3 = arith.constant 3 : index
    %c0_133 = arith.constant 0 : index
    %c0_134 = arith.constant 0 : index
    %227 = vector.load %arg5[%c0_132, %c3, %c0_133, %c0_134] : memref<2x4x128x32xbf16, #tpu.memory_space<vmem>>, vector<1x1x128x32xbf16>
    %228 = vector.shape_cast %227 : vector<1x1x128x32xbf16> to vector<128x32xbf16>
    %cst_135 = arith.constant dense<0.000000e+00> : vector<16x32xf32>
    %229 = tpu.matmul %27, %228, %cst_135 {dimension_numbers = #tpu.dot_dimension_numbers<[1], [0], [0], [1], [0, 0, 1, 1], [], []>} : vector<16x128xbf16>, vector<128x32xbf16>, vector<16x32xf32> -> vector<16x32xf32>
    %c0_136 = arith.constant 0 : index
    %c3_137 = arith.constant 3 : index
    %c0_138 = arith.constant 0 : index
    %c0_139 = arith.constant 0 : index
    %230 = vector.load %arg6[%c0_136, %c3_137, %c0_138, %c0_139] : memref<2x4x1x32xf32, #tpu.memory_space<vmem>>, vector<1x1x1x32xf32>
    %231 = vector.shape_cast %230 : vector<1x1x1x32xf32> to vector<1x32xf32>
    %232 = vector.broadcast %231 : vector<1x32xf32> to vector<16x32xf32>
    %233 = arith.addf %229, %232 : vector<16x32xf32>
    %c0_140 = arith.constant 0 : index
    %c3_141 = arith.constant 3 : index
    %c0_142 = arith.constant 0 : index
    %c0_143 = arith.constant 0 : index
    %234 = vector.load %arg7[%c0_140, %c3_141, %c0_142, %c0_143] : memref<2x4x128x32xbf16, #tpu.memory_space<vmem>>, vector<1x1x128x32xbf16>
    %235 = vector.shape_cast %234 : vector<1x1x128x32xbf16> to vector<128x32xbf16>
    %cst_144 = arith.constant dense<0.000000e+00> : vector<16x32xf32>
    %236 = tpu.matmul %27, %235, %cst_144 {dimension_numbers = #tpu.dot_dimension_numbers<[1], [0], [0], [1], [0, 0, 1, 1], [], []>} : vector<16x128xbf16>, vector<128x32xbf16>, vector<16x32xf32> -> vector<16x32xf32>
    %c0_145 = arith.constant 0 : index
    %c3_146 = arith.constant 3 : index
    %c0_147 = arith.constant 0 : index
    %c0_148 = arith.constant 0 : index
    %237 = vector.load %arg8[%c0_145, %c3_146, %c0_147, %c0_148] : memref<2x4x1x32xf32, #tpu.memory_space<vmem>>, vector<1x1x1x32xf32>
    %238 = vector.shape_cast %237 : vector<1x1x1x32xf32> to vector<1x32xf32>
    %239 = vector.broadcast %238 : vector<1x32xf32> to vector<16x32xf32>
    %240 = arith.addf %236, %239 : vector<16x32xf32>
    %c0_149 = arith.constant 0 : index
    %c3_150 = arith.constant 3 : index
    %c0_151 = arith.constant 0 : index
    %c0_152 = arith.constant 0 : index
    %241 = vector.load %arg9[%c0_149, %c3_150, %c0_151, %c0_152] : memref<2x4x128x32xbf16, #tpu.memory_space<vmem>>, vector<1x1x128x32xbf16>
    %242 = vector.shape_cast %241 : vector<1x1x128x32xbf16> to vector<128x32xbf16>
    %cst_153 = arith.constant dense<0.000000e+00> : vector<16x32xf32>
    %243 = tpu.matmul %27, %242, %cst_153 {dimension_numbers = #tpu.dot_dimension_numbers<[1], [0], [0], [1], [0, 0, 1, 1], [], []>} : vector<16x128xbf16>, vector<128x32xbf16>, vector<16x32xf32> -> vector<16x32xf32>
    %c0_154 = arith.constant 0 : index
    %c3_155 = arith.constant 3 : index
    %c0_156 = arith.constant 0 : index
    %c0_157 = arith.constant 0 : index
    %244 = vector.load %arg10[%c0_154, %c3_155, %c0_156, %c0_157] : memref<2x4x1x32xf32, #tpu.memory_space<vmem>>, vector<1x1x1x32xf32>
    %245 = vector.shape_cast %244 : vector<1x1x1x32xf32> to vector<1x32xf32>
    %246 = vector.broadcast %245 : vector<1x32xf32> to vector<16x32xf32>
    %247 = arith.addf %243, %246 : vector<16x32xf32>
    %248 = arith.truncf %233 : vector<16x32xf32> to vector<16x32xbf16>
    %249 = arith.truncf %240 : vector<16x32xf32> to vector<16x32xbf16>
    %250 = arith.truncf %247 : vector<16x32xf32> to vector<16x32xbf16>
    %251 = vector.extract_strided_slice %248 {offsets = [0, 0], sizes = [8, 32], strides = [1, 1]} : vector<16x32xbf16> to vector<8x32xbf16>
    %252 = vector.extract_strided_slice %249 {offsets = [0, 0], sizes = [8, 32], strides = [1, 1]} : vector<16x32xbf16> to vector<8x32xbf16>
    %cst_158 = arith.constant dense<0.000000e+00> : vector<8x8xf32>
    %253 = tpu.matmul %251, %252, %cst_158 {dimension_numbers = #tpu.dot_dimension_numbers<[1], [1], [0], [0], [0, 0, 1, 0], [], []>} : vector<8x32xbf16>, vector<8x32xbf16>, vector<8x8xf32> -> vector<8x8xf32>
    %254 = vector.broadcast %25 : vector<1x8xf32> to vector<8x8xf32>
    %255 = arith.addf %253, %254 : vector<8x8xf32>
    %cst_159 = arith.constant dense<0xFF800000> : vector<8xf32>
    %256 = vector.multi_reduction <maximumf>, %255, %cst_159 [1] : vector<8x8xf32> to vector<8xf32>
    %257 = vector.shape_cast %256 : vector<8xf32> to vector<8x1xf32>
    %258 = vector.broadcast %257 : vector<8x1xf32> to vector<8x8xf32>
    %259 = arith.subf %255, %258 : vector<8x8xf32>
    %260 = math.exp %259 : vector<8x8xf32>
    %cst_160 = arith.constant dense<0.000000e+00> : vector<8xf32>
    %261 = vector.multi_reduction <add>, %260, %cst_160 [1] : vector<8x8xf32> to vector<8xf32>
    %262 = vector.shape_cast %261 : vector<8xf32> to vector<8x1xf32>
    %263 = tpu.reciprocal %262 {approx = true} : vector<8x1xf32> -> vector<8x1xf32>
    %264 = vector.broadcast %263 : vector<8x1xf32> to vector<8x8xf32>
    %265 = arith.mulf %260, %264 : vector<8x8xf32>
    %266 = arith.truncf %265 : vector<8x8xf32> to vector<8x8xbf16>
    %267 = vector.extract_strided_slice %250 {offsets = [0, 0], sizes = [8, 32], strides = [1, 1]} : vector<16x32xbf16> to vector<8x32xbf16>
    %cst_161 = arith.constant dense<0.000000e+00> : vector<8x32xf32>
    %268 = tpu.matmul %266, %267, %cst_161 {dimension_numbers = #tpu.dot_dimension_numbers<[1], [0], [0], [1], [0, 0, 1, 1], [], []>} : vector<8x8xbf16>, vector<8x32xbf16>, vector<8x32xf32> -> vector<8x32xf32>
    %269 = vector.extract_strided_slice %248 {offsets = [8, 0], sizes = [8, 32], strides = [1, 1]} : vector<16x32xbf16> to vector<8x32xbf16>
    %270 = vector.extract_strided_slice %249 {offsets = [8, 0], sizes = [8, 32], strides = [1, 1]} : vector<16x32xbf16> to vector<8x32xbf16>
    %cst_162 = arith.constant dense<0.000000e+00> : vector<8x8xf32>
    %271 = tpu.matmul %269, %270, %cst_162 {dimension_numbers = #tpu.dot_dimension_numbers<[1], [1], [0], [0], [0, 0, 1, 0], [], []>} : vector<8x32xbf16>, vector<8x32xbf16>, vector<8x8xf32> -> vector<8x8xf32>
    %272 = vector.broadcast %26 : vector<1x8xf32> to vector<8x8xf32>
    %273 = arith.addf %271, %272 : vector<8x8xf32>
    %cst_163 = arith.constant dense<0xFF800000> : vector<8xf32>
    %274 = vector.multi_reduction <maximumf>, %273, %cst_163 [1] : vector<8x8xf32> to vector<8xf32>
    %275 = vector.shape_cast %274 : vector<8xf32> to vector<8x1xf32>
    %276 = vector.broadcast %275 : vector<8x1xf32> to vector<8x8xf32>
    %277 = arith.subf %273, %276 : vector<8x8xf32>
    %278 = math.exp %277 : vector<8x8xf32>
    %cst_164 = arith.constant dense<0.000000e+00> : vector<8xf32>
    %279 = vector.multi_reduction <add>, %278, %cst_164 [1] : vector<8x8xf32> to vector<8xf32>
    %280 = vector.shape_cast %279 : vector<8xf32> to vector<8x1xf32>
    %281 = tpu.reciprocal %280 {approx = true} : vector<8x1xf32> -> vector<8x1xf32>
    %282 = vector.broadcast %281 : vector<8x1xf32> to vector<8x8xf32>
    %283 = arith.mulf %278, %282 : vector<8x8xf32>
    %284 = arith.truncf %283 : vector<8x8xf32> to vector<8x8xbf16>
    %285 = vector.extract_strided_slice %250 {offsets = [8, 0], sizes = [8, 32], strides = [1, 1]} : vector<16x32xbf16> to vector<8x32xbf16>
    %cst_165 = arith.constant dense<0.000000e+00> : vector<8x32xf32>
    %286 = tpu.matmul %284, %285, %cst_165 {dimension_numbers = #tpu.dot_dimension_numbers<[1], [0], [0], [1], [0, 0, 1, 1], [], []>} : vector<8x8xbf16>, vector<8x32xbf16>, vector<8x32xf32> -> vector<8x32xf32>
    %287 = tpu.concatenate %268, %286 in 0 : vector<8x32xf32>, vector<8x32xf32> -> vector<16x32xf32>
    %288 = arith.truncf %287 : vector<16x32xf32> to vector<16x32xbf16>
    %c0_166 = arith.constant 0 : index
    %c3_167 = arith.constant 3 : index
    %c0_168 = arith.constant 0 : index
    %c0_169 = arith.constant 0 : index
    %289 = vector.load %arg11[%c0_166, %c3_167, %c0_168, %c0_169] : memref<2x4x32x128xbf16, #tpu.memory_space<vmem>>, vector<1x1x32x128xbf16>
    %290 = vector.shape_cast %289 : vector<1x1x32x128xbf16> to vector<32x128xbf16>
    %cst_170 = arith.constant dense<0.000000e+00> : vector<16x128xf32>
    %291 = tpu.matmul %288, %290, %cst_170 {dimension_numbers = #tpu.dot_dimension_numbers<[1], [0], [0], [1], [0, 0, 1, 1], [], []>} : vector<16x32xbf16>, vector<32x128xbf16>, vector<16x128xf32> -> vector<16x128xf32>
    %292 = arith.addf %226, %291 : vector<16x128xf32>
    %c0_171 = arith.constant 0 : index
    %c0_172 = arith.constant 0 : index
    %c0_173 = arith.constant 0 : index
    %293 = vector.load %arg12[%c0_171, %c0_172, %c0_173] : memref<2x1x128xf32, #tpu.memory_space<vmem>>, vector<1x1x128xf32>
    %294 = vector.shape_cast %293 : vector<1x1x128xf32> to vector<1x128xf32>
    %295 = vector.broadcast %294 : vector<1x128xf32> to vector<16x128xf32>
    %296 = arith.addf %292, %295 : vector<16x128xf32>
    %297 = arith.addf %296, %24 : vector<16x128xf32>
    %c0_174 = arith.constant 0 : index
    %c0_175 = arith.constant 0 : index
    %c0_176 = arith.constant 0 : index
    %298 = vector.load %arg13[%c0_174, %c0_175, %c0_176] : memref<2x1x128xf32, #tpu.memory_space<vmem>>, vector<1x1x128xf32>
    %299 = vector.shape_cast %298 : vector<1x1x128xf32> to vector<1x128xf32>
    %c0_177 = arith.constant 0 : index
    %c0_178 = arith.constant 0 : index
    %c0_179 = arith.constant 0 : index
    %300 = vector.load %arg14[%c0_177, %c0_178, %c0_179] : memref<2x1x128xf32, #tpu.memory_space<vmem>>, vector<1x1x128xf32>
    %301 = vector.shape_cast %300 : vector<1x1x128xf32> to vector<1x128xf32>
    %cst_180 = arith.constant dense<0.000000e+00> : vector<16xf32>
    %302 = vector.multi_reduction <add>, %297, %cst_180 [1] : vector<16x128xf32> to vector<16xf32>
    %303 = vector.shape_cast %302 : vector<16xf32> to vector<16x1xf32>
    %cst_181 = arith.constant 1.280000e+02 : f32
    %304 = vector.broadcast %cst_181 : f32 to vector<16x1xf32>
    %305 = arith.divf %303, %304 : vector<16x1xf32>
    %306 = vector.broadcast %305 : vector<16x1xf32> to vector<16x128xf32>
    %307 = arith.subf %297, %306 : vector<16x128xf32>
    %308 = arith.mulf %307, %307 : vector<16x128xf32>
    %cst_182 = arith.constant dense<0.000000e+00> : vector<16xf32>
    %309 = vector.multi_reduction <add>, %308, %cst_182 [1] : vector<16x128xf32> to vector<16xf32>
    %310 = vector.shape_cast %309 : vector<16xf32> to vector<16x1xf32>
    %cst_183 = arith.constant 1.280000e+02 : f32
    %311 = vector.broadcast %cst_183 : f32 to vector<16x1xf32>
    %312 = arith.divf %310, %311 : vector<16x1xf32>
    %313 = vector.broadcast %305 : vector<16x1xf32> to vector<16x128xf32>
    %314 = arith.subf %297, %313 : vector<16x128xf32>
    %cst_184 = arith.constant 9.99999996E-13 : f32
    %315 = vector.broadcast %cst_184 : f32 to vector<16x1xf32>
    %316 = arith.addf %312, %315 : vector<16x1xf32>
    %317 = math.rsqrt %316 : vector<16x1xf32>
    %318 = vector.broadcast %317 : vector<16x1xf32> to vector<16x128xf32>
    %319 = arith.mulf %314, %318 : vector<16x128xf32>
    %320 = vector.broadcast %299 : vector<1x128xf32> to vector<16x128xf32>
    %321 = arith.mulf %319, %320 : vector<16x128xf32>
    %322 = vector.broadcast %301 : vector<1x128xf32> to vector<16x128xf32>
    %323 = arith.addf %321, %322 : vector<16x128xf32>
    %324 = arith.truncf %323 : vector<16x128xf32> to vector<16x128xbf16>
    %c0_185 = arith.constant 0 : index
    %c0_186 = arith.constant 0 : index
    %c0_187 = arith.constant 0 : index
    %325 = vector.load %arg15[%c0_185, %c0_186, %c0_187] : memref<2x128x256xbf16, #tpu.memory_space<vmem>>, vector<1x128x256xbf16>
    %326 = vector.shape_cast %325 : vector<1x128x256xbf16> to vector<128x256xbf16>
    %cst_188 = arith.constant dense<0.000000e+00> : vector<16x256xf32>
    %327 = tpu.matmul %324, %326, %cst_188 {dimension_numbers = #tpu.dot_dimension_numbers<[1], [0], [0], [1], [0, 0, 1, 1], [], []>} : vector<16x128xbf16>, vector<128x256xbf16>, vector<16x256xf32> -> vector<16x256xf32>
    %c0_189 = arith.constant 0 : index
    %c0_190 = arith.constant 0 : index
    %c0_191 = arith.constant 0 : index
    %328 = vector.load %arg16[%c0_189, %c0_190, %c0_191] : memref<2x1x256xf32, #tpu.memory_space<vmem>>, vector<1x1x256xf32>
    %329 = vector.shape_cast %328 : vector<1x1x256xf32> to vector<1x256xf32>
    %330 = vector.broadcast %329 : vector<1x256xf32> to vector<16x256xf32>
    %331 = arith.addf %327, %330 : vector<16x256xf32>
    %cst_192 = arith.constant 5.000000e-01 : f32
    %332 = vector.broadcast %cst_192 : f32 to vector<16x256xf32>
    %333 = arith.mulf %332, %331 : vector<16x256xf32>
    %cst_193 = arith.constant 0.707106769 : f32
    %334 = vector.broadcast %cst_193 : f32 to vector<16x256xf32>
    %335 = arith.mulf %331, %334 : vector<16x256xf32>
    %336 = math.erf %335 : vector<16x256xf32>
    %cst_194 = arith.constant 1.000000e+00 : f32
    %337 = vector.broadcast %cst_194 : f32 to vector<16x256xf32>
    %338 = arith.addf %337, %336 : vector<16x256xf32>
    %339 = arith.mulf %333, %338 : vector<16x256xf32>
    %340 = arith.truncf %339 : vector<16x256xf32> to vector<16x256xbf16>
    %c0_195 = arith.constant 0 : index
    %c0_196 = arith.constant 0 : index
    %c0_197 = arith.constant 0 : index
    %341 = vector.load %arg17[%c0_195, %c0_196, %c0_197] : memref<2x256x128xbf16, #tpu.memory_space<vmem>>, vector<1x256x128xbf16>
    %342 = vector.shape_cast %341 : vector<1x256x128xbf16> to vector<256x128xbf16>
    %cst_198 = arith.constant dense<0.000000e+00> : vector<16x128xf32>
    %343 = tpu.matmul %340, %342, %cst_198 {dimension_numbers = #tpu.dot_dimension_numbers<[1], [0], [0], [1], [0, 0, 1, 1], [], []>} : vector<16x256xbf16>, vector<256x128xbf16>, vector<16x128xf32> -> vector<16x128xf32>
    %c0_199 = arith.constant 0 : index
    %c0_200 = arith.constant 0 : index
    %c0_201 = arith.constant 0 : index
    %344 = vector.load %arg18[%c0_199, %c0_200, %c0_201] : memref<2x1x128xf32, #tpu.memory_space<vmem>>, vector<1x1x128xf32>
    %345 = vector.shape_cast %344 : vector<1x1x128xf32> to vector<1x128xf32>
    %346 = vector.broadcast %345 : vector<1x128xf32> to vector<16x128xf32>
    %347 = arith.addf %343, %346 : vector<16x128xf32>
    %348 = arith.addf %347, %323 : vector<16x128xf32>
    %c0_202 = arith.constant 0 : index
    %c0_203 = arith.constant 0 : index
    %c0_204 = arith.constant 0 : index
    %349 = vector.load %arg19[%c0_202, %c0_203, %c0_204] : memref<2x1x128xf32, #tpu.memory_space<vmem>>, vector<1x1x128xf32>
    %350 = vector.shape_cast %349 : vector<1x1x128xf32> to vector<1x128xf32>
    %c0_205 = arith.constant 0 : index
    %c0_206 = arith.constant 0 : index
    %c0_207 = arith.constant 0 : index
    %351 = vector.load %arg20[%c0_205, %c0_206, %c0_207] : memref<2x1x128xf32, #tpu.memory_space<vmem>>, vector<1x1x128xf32>
    %352 = vector.shape_cast %351 : vector<1x1x128xf32> to vector<1x128xf32>
    %cst_208 = arith.constant dense<0.000000e+00> : vector<16xf32>
    %353 = vector.multi_reduction <add>, %348, %cst_208 [1] : vector<16x128xf32> to vector<16xf32>
    %354 = vector.shape_cast %353 : vector<16xf32> to vector<16x1xf32>
    %cst_209 = arith.constant 1.280000e+02 : f32
    %355 = vector.broadcast %cst_209 : f32 to vector<16x1xf32>
    %356 = arith.divf %354, %355 : vector<16x1xf32>
    %357 = vector.broadcast %356 : vector<16x1xf32> to vector<16x128xf32>
    %358 = arith.subf %348, %357 : vector<16x128xf32>
    %359 = arith.mulf %358, %358 : vector<16x128xf32>
    %cst_210 = arith.constant dense<0.000000e+00> : vector<16xf32>
    %360 = vector.multi_reduction <add>, %359, %cst_210 [1] : vector<16x128xf32> to vector<16xf32>
    %361 = vector.shape_cast %360 : vector<16xf32> to vector<16x1xf32>
    %cst_211 = arith.constant 1.280000e+02 : f32
    %362 = vector.broadcast %cst_211 : f32 to vector<16x1xf32>
    %363 = arith.divf %361, %362 : vector<16x1xf32>
    %364 = vector.broadcast %356 : vector<16x1xf32> to vector<16x128xf32>
    %365 = arith.subf %348, %364 : vector<16x128xf32>
    %cst_212 = arith.constant 9.99999996E-13 : f32
    %366 = vector.broadcast %cst_212 : f32 to vector<16x1xf32>
    %367 = arith.addf %363, %366 : vector<16x1xf32>
    %368 = math.rsqrt %367 : vector<16x1xf32>
    %369 = vector.broadcast %368 : vector<16x1xf32> to vector<16x128xf32>
    %370 = arith.mulf %365, %369 : vector<16x128xf32>
    %371 = vector.broadcast %350 : vector<1x128xf32> to vector<16x128xf32>
    %372 = arith.mulf %370, %371 : vector<16x128xf32>
    %373 = vector.broadcast %352 : vector<1x128xf32> to vector<16x128xf32>
    %374 = arith.addf %372, %373 : vector<16x128xf32>
    %375 = arith.truncf %374 : vector<16x128xf32> to vector<16x128xbf16>
    %cst_213 = arith.constant 0.000000e+00 : f32
    %376 = vector.broadcast %cst_213 : f32 to vector<16x128xf32>
    %c1_214 = arith.constant 1 : index
    %c0_215 = arith.constant 0 : index
    %c0_216 = arith.constant 0 : index
    %c0_217 = arith.constant 0 : index
    %377 = vector.load %arg5[%c1_214, %c0_215, %c0_216, %c0_217] : memref<2x4x128x32xbf16, #tpu.memory_space<vmem>>, vector<1x1x128x32xbf16>
    %378 = vector.shape_cast %377 : vector<1x1x128x32xbf16> to vector<128x32xbf16>
    %cst_218 = arith.constant dense<0.000000e+00> : vector<16x32xf32>
    %379 = tpu.matmul %375, %378, %cst_218 {dimension_numbers = #tpu.dot_dimension_numbers<[1], [0], [0], [1], [0, 0, 1, 1], [], []>} : vector<16x128xbf16>, vector<128x32xbf16>, vector<16x32xf32> -> vector<16x32xf32>
    %c1_219 = arith.constant 1 : index
    %c0_220 = arith.constant 0 : index
    %c0_221 = arith.constant 0 : index
    %c0_222 = arith.constant 0 : index
    %380 = vector.load %arg6[%c1_219, %c0_220, %c0_221, %c0_222] : memref<2x4x1x32xf32, #tpu.memory_space<vmem>>, vector<1x1x1x32xf32>
    %381 = vector.shape_cast %380 : vector<1x1x1x32xf32> to vector<1x32xf32>
    %382 = vector.broadcast %381 : vector<1x32xf32> to vector<16x32xf32>
    %383 = arith.addf %379, %382 : vector<16x32xf32>
    %c1_223 = arith.constant 1 : index
    %c0_224 = arith.constant 0 : index
    %c0_225 = arith.constant 0 : index
    %c0_226 = arith.constant 0 : index
    %384 = vector.load %arg7[%c1_223, %c0_224, %c0_225, %c0_226] : memref<2x4x128x32xbf16, #tpu.memory_space<vmem>>, vector<1x1x128x32xbf16>
    %385 = vector.shape_cast %384 : vector<1x1x128x32xbf16> to vector<128x32xbf16>
    %cst_227 = arith.constant dense<0.000000e+00> : vector<16x32xf32>
    %386 = tpu.matmul %375, %385, %cst_227 {dimension_numbers = #tpu.dot_dimension_numbers<[1], [0], [0], [1], [0, 0, 1, 1], [], []>} : vector<16x128xbf16>, vector<128x32xbf16>, vector<16x32xf32> -> vector<16x32xf32>
    %c1_228 = arith.constant 1 : index
    %c0_229 = arith.constant 0 : index
    %c0_230 = arith.constant 0 : index
    %c0_231 = arith.constant 0 : index
    %387 = vector.load %arg8[%c1_228, %c0_229, %c0_230, %c0_231] : memref<2x4x1x32xf32, #tpu.memory_space<vmem>>, vector<1x1x1x32xf32>
    %388 = vector.shape_cast %387 : vector<1x1x1x32xf32> to vector<1x32xf32>
    %389 = vector.broadcast %388 : vector<1x32xf32> to vector<16x32xf32>
    %390 = arith.addf %386, %389 : vector<16x32xf32>
    %c1_232 = arith.constant 1 : index
    %c0_233 = arith.constant 0 : index
    %c0_234 = arith.constant 0 : index
    %c0_235 = arith.constant 0 : index
    %391 = vector.load %arg9[%c1_232, %c0_233, %c0_234, %c0_235] : memref<2x4x128x32xbf16, #tpu.memory_space<vmem>>, vector<1x1x128x32xbf16>
    %392 = vector.shape_cast %391 : vector<1x1x128x32xbf16> to vector<128x32xbf16>
    %cst_236 = arith.constant dense<0.000000e+00> : vector<16x32xf32>
    %393 = tpu.matmul %375, %392, %cst_236 {dimension_numbers = #tpu.dot_dimension_numbers<[1], [0], [0], [1], [0, 0, 1, 1], [], []>} : vector<16x128xbf16>, vector<128x32xbf16>, vector<16x32xf32> -> vector<16x32xf32>
    %c1_237 = arith.constant 1 : index
    %c0_238 = arith.constant 0 : index
    %c0_239 = arith.constant 0 : index
    %c0_240 = arith.constant 0 : index
    %394 = vector.load %arg10[%c1_237, %c0_238, %c0_239, %c0_240] : memref<2x4x1x32xf32, #tpu.memory_space<vmem>>, vector<1x1x1x32xf32>
    %395 = vector.shape_cast %394 : vector<1x1x1x32xf32> to vector<1x32xf32>
    %396 = vector.broadcast %395 : vector<1x32xf32> to vector<16x32xf32>
    %397 = arith.addf %393, %396 : vector<16x32xf32>
    %398 = arith.truncf %383 : vector<16x32xf32> to vector<16x32xbf16>
    %399 = arith.truncf %390 : vector<16x32xf32> to vector<16x32xbf16>
    %400 = arith.truncf %397 : vector<16x32xf32> to vector<16x32xbf16>
    %401 = vector.extract_strided_slice %398 {offsets = [0, 0], sizes = [8, 32], strides = [1, 1]} : vector<16x32xbf16> to vector<8x32xbf16>
    %402 = vector.extract_strided_slice %399 {offsets = [0, 0], sizes = [8, 32], strides = [1, 1]} : vector<16x32xbf16> to vector<8x32xbf16>
    %cst_241 = arith.constant dense<0.000000e+00> : vector<8x8xf32>
    %403 = tpu.matmul %401, %402, %cst_241 {dimension_numbers = #tpu.dot_dimension_numbers<[1], [1], [0], [0], [0, 0, 1, 0], [], []>} : vector<8x32xbf16>, vector<8x32xbf16>, vector<8x8xf32> -> vector<8x8xf32>
    %404 = vector.broadcast %25 : vector<1x8xf32> to vector<8x8xf32>
    %405 = arith.addf %403, %404 : vector<8x8xf32>
    %cst_242 = arith.constant dense<0xFF800000> : vector<8xf32>
    %406 = vector.multi_reduction <maximumf>, %405, %cst_242 [1] : vector<8x8xf32> to vector<8xf32>
    %407 = vector.shape_cast %406 : vector<8xf32> to vector<8x1xf32>
    %408 = vector.broadcast %407 : vector<8x1xf32> to vector<8x8xf32>
    %409 = arith.subf %405, %408 : vector<8x8xf32>
    %410 = math.exp %409 : vector<8x8xf32>
    %cst_243 = arith.constant dense<0.000000e+00> : vector<8xf32>
    %411 = vector.multi_reduction <add>, %410, %cst_243 [1] : vector<8x8xf32> to vector<8xf32>
    %412 = vector.shape_cast %411 : vector<8xf32> to vector<8x1xf32>
    %413 = tpu.reciprocal %412 {approx = true} : vector<8x1xf32> -> vector<8x1xf32>
    %414 = vector.broadcast %413 : vector<8x1xf32> to vector<8x8xf32>
    %415 = arith.mulf %410, %414 : vector<8x8xf32>
    %416 = arith.truncf %415 : vector<8x8xf32> to vector<8x8xbf16>
    %417 = vector.extract_strided_slice %400 {offsets = [0, 0], sizes = [8, 32], strides = [1, 1]} : vector<16x32xbf16> to vector<8x32xbf16>
    %cst_244 = arith.constant dense<0.000000e+00> : vector<8x32xf32>
    %418 = tpu.matmul %416, %417, %cst_244 {dimension_numbers = #tpu.dot_dimension_numbers<[1], [0], [0], [1], [0, 0, 1, 1], [], []>} : vector<8x8xbf16>, vector<8x32xbf16>, vector<8x32xf32> -> vector<8x32xf32>
    %419 = vector.extract_strided_slice %398 {offsets = [8, 0], sizes = [8, 32], strides = [1, 1]} : vector<16x32xbf16> to vector<8x32xbf16>
    %420 = vector.extract_strided_slice %399 {offsets = [8, 0], sizes = [8, 32], strides = [1, 1]} : vector<16x32xbf16> to vector<8x32xbf16>
    %cst_245 = arith.constant dense<0.000000e+00> : vector<8x8xf32>
    %421 = tpu.matmul %419, %420, %cst_245 {dimension_numbers = #tpu.dot_dimension_numbers<[1], [1], [0], [0], [0, 0, 1, 0], [], []>} : vector<8x32xbf16>, vector<8x32xbf16>, vector<8x8xf32> -> vector<8x8xf32>
    %422 = vector.broadcast %26 : vector<1x8xf32> to vector<8x8xf32>
    %423 = arith.addf %421, %422 : vector<8x8xf32>
    %cst_246 = arith.constant dense<0xFF800000> : vector<8xf32>
    %424 = vector.multi_reduction <maximumf>, %423, %cst_246 [1] : vector<8x8xf32> to vector<8xf32>
    %425 = vector.shape_cast %424 : vector<8xf32> to vector<8x1xf32>
    %426 = vector.broadcast %425 : vector<8x1xf32> to vector<8x8xf32>
    %427 = arith.subf %423, %426 : vector<8x8xf32>
    %428 = math.exp %427 : vector<8x8xf32>
    %cst_247 = arith.constant dense<0.000000e+00> : vector<8xf32>
    %429 = vector.multi_reduction <add>, %428, %cst_247 [1] : vector<8x8xf32> to vector<8xf32>
    %430 = vector.shape_cast %429 : vector<8xf32> to vector<8x1xf32>
    %431 = tpu.reciprocal %430 {approx = true} : vector<8x1xf32> -> vector<8x1xf32>
    %432 = vector.broadcast %431 : vector<8x1xf32> to vector<8x8xf32>
    %433 = arith.mulf %428, %432 : vector<8x8xf32>
    %434 = arith.truncf %433 : vector<8x8xf32> to vector<8x8xbf16>
    %435 = vector.extract_strided_slice %400 {offsets = [8, 0], sizes = [8, 32], strides = [1, 1]} : vector<16x32xbf16> to vector<8x32xbf16>
    %cst_248 = arith.constant dense<0.000000e+00> : vector<8x32xf32>
    %436 = tpu.matmul %434, %435, %cst_248 {dimension_numbers = #tpu.dot_dimension_numbers<[1], [0], [0], [1], [0, 0, 1, 1], [], []>} : vector<8x8xbf16>, vector<8x32xbf16>, vector<8x32xf32> -> vector<8x32xf32>
    %437 = tpu.concatenate %418, %436 in 0 : vector<8x32xf32>, vector<8x32xf32> -> vector<16x32xf32>
    %438 = arith.truncf %437 : vector<16x32xf32> to vector<16x32xbf16>
    %c1_249 = arith.constant 1 : index
    %c0_250 = arith.constant 0 : index
    %c0_251 = arith.constant 0 : index
    %c0_252 = arith.constant 0 : index
    %439 = vector.load %arg11[%c1_249, %c0_250, %c0_251, %c0_252] : memref<2x4x32x128xbf16, #tpu.memory_space<vmem>>, vector<1x1x32x128xbf16>
    %440 = vector.shape_cast %439 : vector<1x1x32x128xbf16> to vector<32x128xbf16>
    %cst_253 = arith.constant dense<0.000000e+00> : vector<16x128xf32>
    %441 = tpu.matmul %438, %440, %cst_253 {dimension_numbers = #tpu.dot_dimension_numbers<[1], [0], [0], [1], [0, 0, 1, 1], [], []>} : vector<16x32xbf16>, vector<32x128xbf16>, vector<16x128xf32> -> vector<16x128xf32>
    %442 = arith.addf %376, %441 : vector<16x128xf32>
    %c1_254 = arith.constant 1 : index
    %c1_255 = arith.constant 1 : index
    %c0_256 = arith.constant 0 : index
    %c0_257 = arith.constant 0 : index
    %443 = vector.load %arg5[%c1_254, %c1_255, %c0_256, %c0_257] : memref<2x4x128x32xbf16, #tpu.memory_space<vmem>>, vector<1x1x128x32xbf16>
    %444 = vector.shape_cast %443 : vector<1x1x128x32xbf16> to vector<128x32xbf16>
    %cst_258 = arith.constant dense<0.000000e+00> : vector<16x32xf32>
    %445 = tpu.matmul %375, %444, %cst_258 {dimension_numbers = #tpu.dot_dimension_numbers<[1], [0], [0], [1], [0, 0, 1, 1], [], []>} : vector<16x128xbf16>, vector<128x32xbf16>, vector<16x32xf32> -> vector<16x32xf32>
    %c1_259 = arith.constant 1 : index
    %c1_260 = arith.constant 1 : index
    %c0_261 = arith.constant 0 : index
    %c0_262 = arith.constant 0 : index
    %446 = vector.load %arg6[%c1_259, %c1_260, %c0_261, %c0_262] : memref<2x4x1x32xf32, #tpu.memory_space<vmem>>, vector<1x1x1x32xf32>
    %447 = vector.shape_cast %446 : vector<1x1x1x32xf32> to vector<1x32xf32>
    %448 = vector.broadcast %447 : vector<1x32xf32> to vector<16x32xf32>
    %449 = arith.addf %445, %448 : vector<16x32xf32>
    %c1_263 = arith.constant 1 : index
    %c1_264 = arith.constant 1 : index
    %c0_265 = arith.constant 0 : index
    %c0_266 = arith.constant 0 : index
    %450 = vector.load %arg7[%c1_263, %c1_264, %c0_265, %c0_266] : memref<2x4x128x32xbf16, #tpu.memory_space<vmem>>, vector<1x1x128x32xbf16>
    %451 = vector.shape_cast %450 : vector<1x1x128x32xbf16> to vector<128x32xbf16>
    %cst_267 = arith.constant dense<0.000000e+00> : vector<16x32xf32>
    %452 = tpu.matmul %375, %451, %cst_267 {dimension_numbers = #tpu.dot_dimension_numbers<[1], [0], [0], [1], [0, 0, 1, 1], [], []>} : vector<16x128xbf16>, vector<128x32xbf16>, vector<16x32xf32> -> vector<16x32xf32>
    %c1_268 = arith.constant 1 : index
    %c1_269 = arith.constant 1 : index
    %c0_270 = arith.constant 0 : index
    %c0_271 = arith.constant 0 : index
    %453 = vector.load %arg8[%c1_268, %c1_269, %c0_270, %c0_271] : memref<2x4x1x32xf32, #tpu.memory_space<vmem>>, vector<1x1x1x32xf32>
    %454 = vector.shape_cast %453 : vector<1x1x1x32xf32> to vector<1x32xf32>
    %455 = vector.broadcast %454 : vector<1x32xf32> to vector<16x32xf32>
    %456 = arith.addf %452, %455 : vector<16x32xf32>
    %c1_272 = arith.constant 1 : index
    %c1_273 = arith.constant 1 : index
    %c0_274 = arith.constant 0 : index
    %c0_275 = arith.constant 0 : index
    %457 = vector.load %arg9[%c1_272, %c1_273, %c0_274, %c0_275] : memref<2x4x128x32xbf16, #tpu.memory_space<vmem>>, vector<1x1x128x32xbf16>
    %458 = vector.shape_cast %457 : vector<1x1x128x32xbf16> to vector<128x32xbf16>
    %cst_276 = arith.constant dense<0.000000e+00> : vector<16x32xf32>
    %459 = tpu.matmul %375, %458, %cst_276 {dimension_numbers = #tpu.dot_dimension_numbers<[1], [0], [0], [1], [0, 0, 1, 1], [], []>} : vector<16x128xbf16>, vector<128x32xbf16>, vector<16x32xf32> -> vector<16x32xf32>
    %c1_277 = arith.constant 1 : index
    %c1_278 = arith.constant 1 : index
    %c0_279 = arith.constant 0 : index
    %c0_280 = arith.constant 0 : index
    %460 = vector.load %arg10[%c1_277, %c1_278, %c0_279, %c0_280] : memref<2x4x1x32xf32, #tpu.memory_space<vmem>>, vector<1x1x1x32xf32>
    %461 = vector.shape_cast %460 : vector<1x1x1x32xf32> to vector<1x32xf32>
    %462 = vector.broadcast %461 : vector<1x32xf32> to vector<16x32xf32>
    %463 = arith.addf %459, %462 : vector<16x32xf32>
    %464 = arith.truncf %449 : vector<16x32xf32> to vector<16x32xbf16>
    %465 = arith.truncf %456 : vector<16x32xf32> to vector<16x32xbf16>
    %466 = arith.truncf %463 : vector<16x32xf32> to vector<16x32xbf16>
    %467 = vector.extract_strided_slice %464 {offsets = [0, 0], sizes = [8, 32], strides = [1, 1]} : vector<16x32xbf16> to vector<8x32xbf16>
    %468 = vector.extract_strided_slice %465 {offsets = [0, 0], sizes = [8, 32], strides = [1, 1]} : vector<16x32xbf16> to vector<8x32xbf16>
    %cst_281 = arith.constant dense<0.000000e+00> : vector<8x8xf32>
    %469 = tpu.matmul %467, %468, %cst_281 {dimension_numbers = #tpu.dot_dimension_numbers<[1], [1], [0], [0], [0, 0, 1, 0], [], []>} : vector<8x32xbf16>, vector<8x32xbf16>, vector<8x8xf32> -> vector<8x8xf32>
    %470 = vector.broadcast %25 : vector<1x8xf32> to vector<8x8xf32>
    %471 = arith.addf %469, %470 : vector<8x8xf32>
    %cst_282 = arith.constant dense<0xFF800000> : vector<8xf32>
    %472 = vector.multi_reduction <maximumf>, %471, %cst_282 [1] : vector<8x8xf32> to vector<8xf32>
    %473 = vector.shape_cast %472 : vector<8xf32> to vector<8x1xf32>
    %474 = vector.broadcast %473 : vector<8x1xf32> to vector<8x8xf32>
    %475 = arith.subf %471, %474 : vector<8x8xf32>
    %476 = math.exp %475 : vector<8x8xf32>
    %cst_283 = arith.constant dense<0.000000e+00> : vector<8xf32>
    %477 = vector.multi_reduction <add>, %476, %cst_283 [1] : vector<8x8xf32> to vector<8xf32>
    %478 = vector.shape_cast %477 : vector<8xf32> to vector<8x1xf32>
    %479 = tpu.reciprocal %478 {approx = true} : vector<8x1xf32> -> vector<8x1xf32>
    %480 = vector.broadcast %479 : vector<8x1xf32> to vector<8x8xf32>
    %481 = arith.mulf %476, %480 : vector<8x8xf32>
    %482 = arith.truncf %481 : vector<8x8xf32> to vector<8x8xbf16>
    %483 = vector.extract_strided_slice %466 {offsets = [0, 0], sizes = [8, 32], strides = [1, 1]} : vector<16x32xbf16> to vector<8x32xbf16>
    %cst_284 = arith.constant dense<0.000000e+00> : vector<8x32xf32>
    %484 = tpu.matmul %482, %483, %cst_284 {dimension_numbers = #tpu.dot_dimension_numbers<[1], [0], [0], [1], [0, 0, 1, 1], [], []>} : vector<8x8xbf16>, vector<8x32xbf16>, vector<8x32xf32> -> vector<8x32xf32>
    %485 = vector.extract_strided_slice %464 {offsets = [8, 0], sizes = [8, 32], strides = [1, 1]} : vector<16x32xbf16> to vector<8x32xbf16>
    %486 = vector.extract_strided_slice %465 {offsets = [8, 0], sizes = [8, 32], strides = [1, 1]} : vector<16x32xbf16> to vector<8x32xbf16>
    %cst_285 = arith.constant dense<0.000000e+00> : vector<8x8xf32>
    %487 = tpu.matmul %485, %486, %cst_285 {dimension_numbers = #tpu.dot_dimension_numbers<[1], [1], [0], [0], [0, 0, 1, 0], [], []>} : vector<8x32xbf16>, vector<8x32xbf16>, vector<8x8xf32> -> vector<8x8xf32>
    %488 = vector.broadcast %26 : vector<1x8xf32> to vector<8x8xf32>
    %489 = arith.addf %487, %488 : vector<8x8xf32>
    %cst_286 = arith.constant dense<0xFF800000> : vector<8xf32>
    %490 = vector.multi_reduction <maximumf>, %489, %cst_286 [1] : vector<8x8xf32> to vector<8xf32>
    %491 = vector.shape_cast %490 : vector<8xf32> to vector<8x1xf32>
    %492 = vector.broadcast %491 : vector<8x1xf32> to vector<8x8xf32>
    %493 = arith.subf %489, %492 : vector<8x8xf32>
    %494 = math.exp %493 : vector<8x8xf32>
    %cst_287 = arith.constant dense<0.000000e+00> : vector<8xf32>
    %495 = vector.multi_reduction <add>, %494, %cst_287 [1] : vector<8x8xf32> to vector<8xf32>
    %496 = vector.shape_cast %495 : vector<8xf32> to vector<8x1xf32>
    %497 = tpu.reciprocal %496 {approx = true} : vector<8x1xf32> -> vector<8x1xf32>
    %498 = vector.broadcast %497 : vector<8x1xf32> to vector<8x8xf32>
    %499 = arith.mulf %494, %498 : vector<8x8xf32>
    %500 = arith.truncf %499 : vector<8x8xf32> to vector<8x8xbf16>
    %501 = vector.extract_strided_slice %466 {offsets = [8, 0], sizes = [8, 32], strides = [1, 1]} : vector<16x32xbf16> to vector<8x32xbf16>
    %cst_288 = arith.constant dense<0.000000e+00> : vector<8x32xf32>
    %502 = tpu.matmul %500, %501, %cst_288 {dimension_numbers = #tpu.dot_dimension_numbers<[1], [0], [0], [1], [0, 0, 1, 1], [], []>} : vector<8x8xbf16>, vector<8x32xbf16>, vector<8x32xf32> -> vector<8x32xf32>
    %503 = tpu.concatenate %484, %502 in 0 : vector<8x32xf32>, vector<8x32xf32> -> vector<16x32xf32>
    %504 = arith.truncf %503 : vector<16x32xf32> to vector<16x32xbf16>
    %c1_289 = arith.constant 1 : index
    %c1_290 = arith.constant 1 : index
    %c0_291 = arith.constant 0 : index
    %c0_292 = arith.constant 0 : index
    %505 = vector.load %arg11[%c1_289, %c1_290, %c0_291, %c0_292] : memref<2x4x32x128xbf16, #tpu.memory_space<vmem>>, vector<1x1x32x128xbf16>
    %506 = vector.shape_cast %505 : vector<1x1x32x128xbf16> to vector<32x128xbf16>
    %cst_293 = arith.constant dense<0.000000e+00> : vector<16x128xf32>
    %507 = tpu.matmul %504, %506, %cst_293 {dimension_numbers = #tpu.dot_dimension_numbers<[1], [0], [0], [1], [0, 0, 1, 1], [], []>} : vector<16x32xbf16>, vector<32x128xbf16>, vector<16x128xf32> -> vector<16x128xf32>
    %508 = arith.addf %442, %507 : vector<16x128xf32>
    %c1_294 = arith.constant 1 : index
    %c2_295 = arith.constant 2 : index
    %c0_296 = arith.constant 0 : index
    %c0_297 = arith.constant 0 : index
    %509 = vector.load %arg5[%c1_294, %c2_295, %c0_296, %c0_297] : memref<2x4x128x32xbf16, #tpu.memory_space<vmem>>, vector<1x1x128x32xbf16>
    %510 = vector.shape_cast %509 : vector<1x1x128x32xbf16> to vector<128x32xbf16>
    %cst_298 = arith.constant dense<0.000000e+00> : vector<16x32xf32>
    %511 = tpu.matmul %375, %510, %cst_298 {dimension_numbers = #tpu.dot_dimension_numbers<[1], [0], [0], [1], [0, 0, 1, 1], [], []>} : vector<16x128xbf16>, vector<128x32xbf16>, vector<16x32xf32> -> vector<16x32xf32>
    %c1_299 = arith.constant 1 : index
    %c2_300 = arith.constant 2 : index
    %c0_301 = arith.constant 0 : index
    %c0_302 = arith.constant 0 : index
    %512 = vector.load %arg6[%c1_299, %c2_300, %c0_301, %c0_302] : memref<2x4x1x32xf32, #tpu.memory_space<vmem>>, vector<1x1x1x32xf32>
    %513 = vector.shape_cast %512 : vector<1x1x1x32xf32> to vector<1x32xf32>
    %514 = vector.broadcast %513 : vector<1x32xf32> to vector<16x32xf32>
    %515 = arith.addf %511, %514 : vector<16x32xf32>
    %c1_303 = arith.constant 1 : index
    %c2_304 = arith.constant 2 : index
    %c0_305 = arith.constant 0 : index
    %c0_306 = arith.constant 0 : index
    %516 = vector.load %arg7[%c1_303, %c2_304, %c0_305, %c0_306] : memref<2x4x128x32xbf16, #tpu.memory_space<vmem>>, vector<1x1x128x32xbf16>
    %517 = vector.shape_cast %516 : vector<1x1x128x32xbf16> to vector<128x32xbf16>
    %cst_307 = arith.constant dense<0.000000e+00> : vector<16x32xf32>
    %518 = tpu.matmul %375, %517, %cst_307 {dimension_numbers = #tpu.dot_dimension_numbers<[1], [0], [0], [1], [0, 0, 1, 1], [], []>} : vector<16x128xbf16>, vector<128x32xbf16>, vector<16x32xf32> -> vector<16x32xf32>
    %c1_308 = arith.constant 1 : index
    %c2_309 = arith.constant 2 : index
    %c0_310 = arith.constant 0 : index
    %c0_311 = arith.constant 0 : index
    %519 = vector.load %arg8[%c1_308, %c2_309, %c0_310, %c0_311] : memref<2x4x1x32xf32, #tpu.memory_space<vmem>>, vector<1x1x1x32xf32>
    %520 = vector.shape_cast %519 : vector<1x1x1x32xf32> to vector<1x32xf32>
    %521 = vector.broadcast %520 : vector<1x32xf32> to vector<16x32xf32>
    %522 = arith.addf %518, %521 : vector<16x32xf32>
    %c1_312 = arith.constant 1 : index
    %c2_313 = arith.constant 2 : index
    %c0_314 = arith.constant 0 : index
    %c0_315 = arith.constant 0 : index
    %523 = vector.load %arg9[%c1_312, %c2_313, %c0_314, %c0_315] : memref<2x4x128x32xbf16, #tpu.memory_space<vmem>>, vector<1x1x128x32xbf16>
    %524 = vector.shape_cast %523 : vector<1x1x128x32xbf16> to vector<128x32xbf16>
    %cst_316 = arith.constant dense<0.000000e+00> : vector<16x32xf32>
    %525 = tpu.matmul %375, %524, %cst_316 {dimension_numbers = #tpu.dot_dimension_numbers<[1], [0], [0], [1], [0, 0, 1, 1], [], []>} : vector<16x128xbf16>, vector<128x32xbf16>, vector<16x32xf32> -> vector<16x32xf32>
    %c1_317 = arith.constant 1 : index
    %c2_318 = arith.constant 2 : index
    %c0_319 = arith.constant 0 : index
    %c0_320 = arith.constant 0 : index
    %526 = vector.load %arg10[%c1_317, %c2_318, %c0_319, %c0_320] : memref<2x4x1x32xf32, #tpu.memory_space<vmem>>, vector<1x1x1x32xf32>
    %527 = vector.shape_cast %526 : vector<1x1x1x32xf32> to vector<1x32xf32>
    %528 = vector.broadcast %527 : vector<1x32xf32> to vector<16x32xf32>
    %529 = arith.addf %525, %528 : vector<16x32xf32>
    %530 = arith.truncf %515 : vector<16x32xf32> to vector<16x32xbf16>
    %531 = arith.truncf %522 : vector<16x32xf32> to vector<16x32xbf16>
    %532 = arith.truncf %529 : vector<16x32xf32> to vector<16x32xbf16>
    %533 = vector.extract_strided_slice %530 {offsets = [0, 0], sizes = [8, 32], strides = [1, 1]} : vector<16x32xbf16> to vector<8x32xbf16>
    %534 = vector.extract_strided_slice %531 {offsets = [0, 0], sizes = [8, 32], strides = [1, 1]} : vector<16x32xbf16> to vector<8x32xbf16>
    %cst_321 = arith.constant dense<0.000000e+00> : vector<8x8xf32>
    %535 = tpu.matmul %533, %534, %cst_321 {dimension_numbers = #tpu.dot_dimension_numbers<[1], [1], [0], [0], [0, 0, 1, 0], [], []>} : vector<8x32xbf16>, vector<8x32xbf16>, vector<8x8xf32> -> vector<8x8xf32>
    %536 = vector.broadcast %25 : vector<1x8xf32> to vector<8x8xf32>
    %537 = arith.addf %535, %536 : vector<8x8xf32>
    %cst_322 = arith.constant dense<0xFF800000> : vector<8xf32>
    %538 = vector.multi_reduction <maximumf>, %537, %cst_322 [1] : vector<8x8xf32> to vector<8xf32>
    %539 = vector.shape_cast %538 : vector<8xf32> to vector<8x1xf32>
    %540 = vector.broadcast %539 : vector<8x1xf32> to vector<8x8xf32>
    %541 = arith.subf %537, %540 : vector<8x8xf32>
    %542 = math.exp %541 : vector<8x8xf32>
    %cst_323 = arith.constant dense<0.000000e+00> : vector<8xf32>
    %543 = vector.multi_reduction <add>, %542, %cst_323 [1] : vector<8x8xf32> to vector<8xf32>
    %544 = vector.shape_cast %543 : vector<8xf32> to vector<8x1xf32>
    %545 = tpu.reciprocal %544 {approx = true} : vector<8x1xf32> -> vector<8x1xf32>
    %546 = vector.broadcast %545 : vector<8x1xf32> to vector<8x8xf32>
    %547 = arith.mulf %542, %546 : vector<8x8xf32>
    %548 = arith.truncf %547 : vector<8x8xf32> to vector<8x8xbf16>
    %549 = vector.extract_strided_slice %532 {offsets = [0, 0], sizes = [8, 32], strides = [1, 1]} : vector<16x32xbf16> to vector<8x32xbf16>
    %cst_324 = arith.constant dense<0.000000e+00> : vector<8x32xf32>
    %550 = tpu.matmul %548, %549, %cst_324 {dimension_numbers = #tpu.dot_dimension_numbers<[1], [0], [0], [1], [0, 0, 1, 1], [], []>} : vector<8x8xbf16>, vector<8x32xbf16>, vector<8x32xf32> -> vector<8x32xf32>
    %551 = vector.extract_strided_slice %530 {offsets = [8, 0], sizes = [8, 32], strides = [1, 1]} : vector<16x32xbf16> to vector<8x32xbf16>
    %552 = vector.extract_strided_slice %531 {offsets = [8, 0], sizes = [8, 32], strides = [1, 1]} : vector<16x32xbf16> to vector<8x32xbf16>
    %cst_325 = arith.constant dense<0.000000e+00> : vector<8x8xf32>
    %553 = tpu.matmul %551, %552, %cst_325 {dimension_numbers = #tpu.dot_dimension_numbers<[1], [1], [0], [0], [0, 0, 1, 0], [], []>} : vector<8x32xbf16>, vector<8x32xbf16>, vector<8x8xf32> -> vector<8x8xf32>
    %554 = vector.broadcast %26 : vector<1x8xf32> to vector<8x8xf32>
    %555 = arith.addf %553, %554 : vector<8x8xf32>
    %cst_326 = arith.constant dense<0xFF800000> : vector<8xf32>
    %556 = vector.multi_reduction <maximumf>, %555, %cst_326 [1] : vector<8x8xf32> to vector<8xf32>
    %557 = vector.shape_cast %556 : vector<8xf32> to vector<8x1xf32>
    %558 = vector.broadcast %557 : vector<8x1xf32> to vector<8x8xf32>
    %559 = arith.subf %555, %558 : vector<8x8xf32>
    %560 = math.exp %559 : vector<8x8xf32>
    %cst_327 = arith.constant dense<0.000000e+00> : vector<8xf32>
    %561 = vector.multi_reduction <add>, %560, %cst_327 [1] : vector<8x8xf32> to vector<8xf32>
    %562 = vector.shape_cast %561 : vector<8xf32> to vector<8x1xf32>
    %563 = tpu.reciprocal %562 {approx = true} : vector<8x1xf32> -> vector<8x1xf32>
    %564 = vector.broadcast %563 : vector<8x1xf32> to vector<8x8xf32>
    %565 = arith.mulf %560, %564 : vector<8x8xf32>
    %566 = arith.truncf %565 : vector<8x8xf32> to vector<8x8xbf16>
    %567 = vector.extract_strided_slice %532 {offsets = [8, 0], sizes = [8, 32], strides = [1, 1]} : vector<16x32xbf16> to vector<8x32xbf16>
    %cst_328 = arith.constant dense<0.000000e+00> : vector<8x32xf32>
    %568 = tpu.matmul %566, %567, %cst_328 {dimension_numbers = #tpu.dot_dimension_numbers<[1], [0], [0], [1], [0, 0, 1, 1], [], []>} : vector<8x8xbf16>, vector<8x32xbf16>, vector<8x32xf32> -> vector<8x32xf32>
    %569 = tpu.concatenate %550, %568 in 0 : vector<8x32xf32>, vector<8x32xf32> -> vector<16x32xf32>
    %570 = arith.truncf %569 : vector<16x32xf32> to vector<16x32xbf16>
    %c1_329 = arith.constant 1 : index
    %c2_330 = arith.constant 2 : index
    %c0_331 = arith.constant 0 : index
    %c0_332 = arith.constant 0 : index
    %571 = vector.load %arg11[%c1_329, %c2_330, %c0_331, %c0_332] : memref<2x4x32x128xbf16, #tpu.memory_space<vmem>>, vector<1x1x32x128xbf16>
    %572 = vector.shape_cast %571 : vector<1x1x32x128xbf16> to vector<32x128xbf16>
    %cst_333 = arith.constant dense<0.000000e+00> : vector<16x128xf32>
    %573 = tpu.matmul %570, %572, %cst_333 {dimension_numbers = #tpu.dot_dimension_numbers<[1], [0], [0], [1], [0, 0, 1, 1], [], []>} : vector<16x32xbf16>, vector<32x128xbf16>, vector<16x128xf32> -> vector<16x128xf32>
    %574 = arith.addf %508, %573 : vector<16x128xf32>
    %c1_334 = arith.constant 1 : index
    %c3_335 = arith.constant 3 : index
    %c0_336 = arith.constant 0 : index
    %c0_337 = arith.constant 0 : index
    %575 = vector.load %arg5[%c1_334, %c3_335, %c0_336, %c0_337] : memref<2x4x128x32xbf16, #tpu.memory_space<vmem>>, vector<1x1x128x32xbf16>
    %576 = vector.shape_cast %575 : vector<1x1x128x32xbf16> to vector<128x32xbf16>
    %cst_338 = arith.constant dense<0.000000e+00> : vector<16x32xf32>
    %577 = tpu.matmul %375, %576, %cst_338 {dimension_numbers = #tpu.dot_dimension_numbers<[1], [0], [0], [1], [0, 0, 1, 1], [], []>} : vector<16x128xbf16>, vector<128x32xbf16>, vector<16x32xf32> -> vector<16x32xf32>
    %c1_339 = arith.constant 1 : index
    %c3_340 = arith.constant 3 : index
    %c0_341 = arith.constant 0 : index
    %c0_342 = arith.constant 0 : index
    %578 = vector.load %arg6[%c1_339, %c3_340, %c0_341, %c0_342] : memref<2x4x1x32xf32, #tpu.memory_space<vmem>>, vector<1x1x1x32xf32>
    %579 = vector.shape_cast %578 : vector<1x1x1x32xf32> to vector<1x32xf32>
    %580 = vector.broadcast %579 : vector<1x32xf32> to vector<16x32xf32>
    %581 = arith.addf %577, %580 : vector<16x32xf32>
    %c1_343 = arith.constant 1 : index
    %c3_344 = arith.constant 3 : index
    %c0_345 = arith.constant 0 : index
    %c0_346 = arith.constant 0 : index
    %582 = vector.load %arg7[%c1_343, %c3_344, %c0_345, %c0_346] : memref<2x4x128x32xbf16, #tpu.memory_space<vmem>>, vector<1x1x128x32xbf16>
    %583 = vector.shape_cast %582 : vector<1x1x128x32xbf16> to vector<128x32xbf16>
    %cst_347 = arith.constant dense<0.000000e+00> : vector<16x32xf32>
    %584 = tpu.matmul %375, %583, %cst_347 {dimension_numbers = #tpu.dot_dimension_numbers<[1], [0], [0], [1], [0, 0, 1, 1], [], []>} : vector<16x128xbf16>, vector<128x32xbf16>, vector<16x32xf32> -> vector<16x32xf32>
    %c1_348 = arith.constant 1 : index
    %c3_349 = arith.constant 3 : index
    %c0_350 = arith.constant 0 : index
    %c0_351 = arith.constant 0 : index
    %585 = vector.load %arg8[%c1_348, %c3_349, %c0_350, %c0_351] : memref<2x4x1x32xf32, #tpu.memory_space<vmem>>, vector<1x1x1x32xf32>
    %586 = vector.shape_cast %585 : vector<1x1x1x32xf32> to vector<1x32xf32>
    %587 = vector.broadcast %586 : vector<1x32xf32> to vector<16x32xf32>
    %588 = arith.addf %584, %587 : vector<16x32xf32>
    %c1_352 = arith.constant 1 : index
    %c3_353 = arith.constant 3 : index
    %c0_354 = arith.constant 0 : index
    %c0_355 = arith.constant 0 : index
    %589 = vector.load %arg9[%c1_352, %c3_353, %c0_354, %c0_355] : memref<2x4x128x32xbf16, #tpu.memory_space<vmem>>, vector<1x1x128x32xbf16>
    %590 = vector.shape_cast %589 : vector<1x1x128x32xbf16> to vector<128x32xbf16>
    %cst_356 = arith.constant dense<0.000000e+00> : vector<16x32xf32>
    %591 = tpu.matmul %375, %590, %cst_356 {dimension_numbers = #tpu.dot_dimension_numbers<[1], [0], [0], [1], [0, 0, 1, 1], [], []>} : vector<16x128xbf16>, vector<128x32xbf16>, vector<16x32xf32> -> vector<16x32xf32>
    %c1_357 = arith.constant 1 : index
    %c3_358 = arith.constant 3 : index
    %c0_359 = arith.constant 0 : index
    %c0_360 = arith.constant 0 : index
    %592 = vector.load %arg10[%c1_357, %c3_358, %c0_359, %c0_360] : memref<2x4x1x32xf32, #tpu.memory_space<vmem>>, vector<1x1x1x32xf32>
    %593 = vector.shape_cast %592 : vector<1x1x1x32xf32> to vector<1x32xf32>
    %594 = vector.broadcast %593 : vector<1x32xf32> to vector<16x32xf32>
    %595 = arith.addf %591, %594 : vector<16x32xf32>
    %596 = arith.truncf %581 : vector<16x32xf32> to vector<16x32xbf16>
    %597 = arith.truncf %588 : vector<16x32xf32> to vector<16x32xbf16>
    %598 = arith.truncf %595 : vector<16x32xf32> to vector<16x32xbf16>
    %599 = vector.extract_strided_slice %596 {offsets = [0, 0], sizes = [8, 32], strides = [1, 1]} : vector<16x32xbf16> to vector<8x32xbf16>
    %600 = vector.extract_strided_slice %597 {offsets = [0, 0], sizes = [8, 32], strides = [1, 1]} : vector<16x32xbf16> to vector<8x32xbf16>
    %cst_361 = arith.constant dense<0.000000e+00> : vector<8x8xf32>
    %601 = tpu.matmul %599, %600, %cst_361 {dimension_numbers = #tpu.dot_dimension_numbers<[1], [1], [0], [0], [0, 0, 1, 0], [], []>} : vector<8x32xbf16>, vector<8x32xbf16>, vector<8x8xf32> -> vector<8x8xf32>
    %602 = vector.broadcast %25 : vector<1x8xf32> to vector<8x8xf32>
    %603 = arith.addf %601, %602 : vector<8x8xf32>
    %cst_362 = arith.constant dense<0xFF800000> : vector<8xf32>
    %604 = vector.multi_reduction <maximumf>, %603, %cst_362 [1] : vector<8x8xf32> to vector<8xf32>
    %605 = vector.shape_cast %604 : vector<8xf32> to vector<8x1xf32>
    %606 = vector.broadcast %605 : vector<8x1xf32> to vector<8x8xf32>
    %607 = arith.subf %603, %606 : vector<8x8xf32>
    %608 = math.exp %607 : vector<8x8xf32>
    %cst_363 = arith.constant dense<0.000000e+00> : vector<8xf32>
    %609 = vector.multi_reduction <add>, %608, %cst_363 [1] : vector<8x8xf32> to vector<8xf32>
    %610 = vector.shape_cast %609 : vector<8xf32> to vector<8x1xf32>
    %611 = tpu.reciprocal %610 {approx = true} : vector<8x1xf32> -> vector<8x1xf32>
    %612 = vector.broadcast %611 : vector<8x1xf32> to vector<8x8xf32>
    %613 = arith.mulf %608, %612 : vector<8x8xf32>
    %614 = arith.truncf %613 : vector<8x8xf32> to vector<8x8xbf16>
    %615 = vector.extract_strided_slice %598 {offsets = [0, 0], sizes = [8, 32], strides = [1, 1]} : vector<16x32xbf16> to vector<8x32xbf16>
    %cst_364 = arith.constant dense<0.000000e+00> : vector<8x32xf32>
    %616 = tpu.matmul %614, %615, %cst_364 {dimension_numbers = #tpu.dot_dimension_numbers<[1], [0], [0], [1], [0, 0, 1, 1], [], []>} : vector<8x8xbf16>, vector<8x32xbf16>, vector<8x32xf32> -> vector<8x32xf32>
    %617 = vector.extract_strided_slice %596 {offsets = [8, 0], sizes = [8, 32], strides = [1, 1]} : vector<16x32xbf16> to vector<8x32xbf16>
    %618 = vector.extract_strided_slice %597 {offsets = [8, 0], sizes = [8, 32], strides = [1, 1]} : vector<16x32xbf16> to vector<8x32xbf16>
    %cst_365 = arith.constant dense<0.000000e+00> : vector<8x8xf32>
    %619 = tpu.matmul %617, %618, %cst_365 {dimension_numbers = #tpu.dot_dimension_numbers<[1], [1], [0], [0], [0, 0, 1, 0], [], []>} : vector<8x32xbf16>, vector<8x32xbf16>, vector<8x8xf32> -> vector<8x8xf32>
    %620 = vector.broadcast %26 : vector<1x8xf32> to vector<8x8xf32>
    %621 = arith.addf %619, %620 : vector<8x8xf32>
    %cst_366 = arith.constant dense<0xFF800000> : vector<8xf32>
    %622 = vector.multi_reduction <maximumf>, %621, %cst_366 [1] : vector<8x8xf32> to vector<8xf32>
    %623 = vector.shape_cast %622 : vector<8xf32> to vector<8x1xf32>
    %624 = vector.broadcast %623 : vector<8x1xf32> to vector<8x8xf32>
    %625 = arith.subf %621, %624 : vector<8x8xf32>
    %626 = math.exp %625 : vector<8x8xf32>
    %cst_367 = arith.constant dense<0.000000e+00> : vector<8xf32>
    %627 = vector.multi_reduction <add>, %626, %cst_367 [1] : vector<8x8xf32> to vector<8xf32>
    %628 = vector.shape_cast %627 : vector<8xf32> to vector<8x1xf32>
    %629 = tpu.reciprocal %628 {approx = true} : vector<8x1xf32> -> vector<8x1xf32>
    %630 = vector.broadcast %629 : vector<8x1xf32> to vector<8x8xf32>
    %631 = arith.mulf %626, %630 : vector<8x8xf32>
    %632 = arith.truncf %631 : vector<8x8xf32> to vector<8x8xbf16>
    %633 = vector.extract_strided_slice %598 {offsets = [8, 0], sizes = [8, 32], strides = [1, 1]} : vector<16x32xbf16> to vector<8x32xbf16>
    %cst_368 = arith.constant dense<0.000000e+00> : vector<8x32xf32>
    %634 = tpu.matmul %632, %633, %cst_368 {dimension_numbers = #tpu.dot_dimension_numbers<[1], [0], [0], [1], [0, 0, 1, 1], [], []>} : vector<8x8xbf16>, vector<8x32xbf16>, vector<8x32xf32> -> vector<8x32xf32>
    %635 = tpu.concatenate %616, %634 in 0 : vector<8x32xf32>, vector<8x32xf32> -> vector<16x32xf32>
    %636 = arith.truncf %635 : vector<16x32xf32> to vector<16x32xbf16>
    %c1_369 = arith.constant 1 : index
    %c3_370 = arith.constant 3 : index
    %c0_371 = arith.constant 0 : index
    %c0_372 = arith.constant 0 : index
    %637 = vector.load %arg11[%c1_369, %c3_370, %c0_371, %c0_372] : memref<2x4x32x128xbf16, #tpu.memory_space<vmem>>, vector<1x1x32x128xbf16>
    %638 = vector.shape_cast %637 : vector<1x1x32x128xbf16> to vector<32x128xbf16>
    %cst_373 = arith.constant dense<0.000000e+00> : vector<16x128xf32>
    %639 = tpu.matmul %636, %638, %cst_373 {dimension_numbers = #tpu.dot_dimension_numbers<[1], [0], [0], [1], [0, 0, 1, 1], [], []>} : vector<16x32xbf16>, vector<32x128xbf16>, vector<16x128xf32> -> vector<16x128xf32>
    %640 = arith.addf %574, %639 : vector<16x128xf32>
    %c1_374 = arith.constant 1 : index
    %c0_375 = arith.constant 0 : index
    %c0_376 = arith.constant 0 : index
    %641 = vector.load %arg12[%c1_374, %c0_375, %c0_376] : memref<2x1x128xf32, #tpu.memory_space<vmem>>, vector<1x1x128xf32>
    %642 = vector.shape_cast %641 : vector<1x1x128xf32> to vector<1x128xf32>
    %643 = vector.broadcast %642 : vector<1x128xf32> to vector<16x128xf32>
    %644 = arith.addf %640, %643 : vector<16x128xf32>
    %645 = arith.addf %644, %374 : vector<16x128xf32>
    %c1_377 = arith.constant 1 : index
    %c0_378 = arith.constant 0 : index
    %c0_379 = arith.constant 0 : index
    %646 = vector.load %arg13[%c1_377, %c0_378, %c0_379] : memref<2x1x128xf32, #tpu.memory_space<vmem>>, vector<1x1x128xf32>
    %647 = vector.shape_cast %646 : vector<1x1x128xf32> to vector<1x128xf32>
    %c1_380 = arith.constant 1 : index
    %c0_381 = arith.constant 0 : index
    %c0_382 = arith.constant 0 : index
    %648 = vector.load %arg14[%c1_380, %c0_381, %c0_382] : memref<2x1x128xf32, #tpu.memory_space<vmem>>, vector<1x1x128xf32>
    %649 = vector.shape_cast %648 : vector<1x1x128xf32> to vector<1x128xf32>
    %cst_383 = arith.constant dense<0.000000e+00> : vector<16xf32>
    %650 = vector.multi_reduction <add>, %645, %cst_383 [1] : vector<16x128xf32> to vector<16xf32>
    %651 = vector.shape_cast %650 : vector<16xf32> to vector<16x1xf32>
    %cst_384 = arith.constant 1.280000e+02 : f32
    %652 = vector.broadcast %cst_384 : f32 to vector<16x1xf32>
    %653 = arith.divf %651, %652 : vector<16x1xf32>
    %654 = vector.broadcast %653 : vector<16x1xf32> to vector<16x128xf32>
    %655 = arith.subf %645, %654 : vector<16x128xf32>
    %656 = arith.mulf %655, %655 : vector<16x128xf32>
    %cst_385 = arith.constant dense<0.000000e+00> : vector<16xf32>
    %657 = vector.multi_reduction <add>, %656, %cst_385 [1] : vector<16x128xf32> to vector<16xf32>
    %658 = vector.shape_cast %657 : vector<16xf32> to vector<16x1xf32>
    %cst_386 = arith.constant 1.280000e+02 : f32
    %659 = vector.broadcast %cst_386 : f32 to vector<16x1xf32>
    %660 = arith.divf %658, %659 : vector<16x1xf32>
    %661 = vector.broadcast %653 : vector<16x1xf32> to vector<16x128xf32>
    %662 = arith.subf %645, %661 : vector<16x128xf32>
    %cst_387 = arith.constant 9.99999996E-13 : f32
    %663 = vector.broadcast %cst_387 : f32 to vector<16x1xf32>
    %664 = arith.addf %660, %663 : vector<16x1xf32>
    %665 = math.rsqrt %664 : vector<16x1xf32>
    %666 = vector.broadcast %665 : vector<16x1xf32> to vector<16x128xf32>
    %667 = arith.mulf %662, %666 : vector<16x128xf32>
    %668 = vector.broadcast %647 : vector<1x128xf32> to vector<16x128xf32>
    %669 = arith.mulf %667, %668 : vector<16x128xf32>
    %670 = vector.broadcast %649 : vector<1x128xf32> to vector<16x128xf32>
    %671 = arith.addf %669, %670 : vector<16x128xf32>
    %672 = arith.truncf %671 : vector<16x128xf32> to vector<16x128xbf16>
    %c1_388 = arith.constant 1 : index
    %c0_389 = arith.constant 0 : index
    %c0_390 = arith.constant 0 : index
    %673 = vector.load %arg15[%c1_388, %c0_389, %c0_390] : memref<2x128x256xbf16, #tpu.memory_space<vmem>>, vector<1x128x256xbf16>
    %674 = vector.shape_cast %673 : vector<1x128x256xbf16> to vector<128x256xbf16>
    %cst_391 = arith.constant dense<0.000000e+00> : vector<16x256xf32>
    %675 = tpu.matmul %672, %674, %cst_391 {dimension_numbers = #tpu.dot_dimension_numbers<[1], [0], [0], [1], [0, 0, 1, 1], [], []>} : vector<16x128xbf16>, vector<128x256xbf16>, vector<16x256xf32> -> vector<16x256xf32>
    %c1_392 = arith.constant 1 : index
    %c0_393 = arith.constant 0 : index
    %c0_394 = arith.constant 0 : index
    %676 = vector.load %arg16[%c1_392, %c0_393, %c0_394] : memref<2x1x256xf32, #tpu.memory_space<vmem>>, vector<1x1x256xf32>
    %677 = vector.shape_cast %676 : vector<1x1x256xf32> to vector<1x256xf32>
    %678 = vector.broadcast %677 : vector<1x256xf32> to vector<16x256xf32>
    %679 = arith.addf %675, %678 : vector<16x256xf32>
    %cst_395 = arith.constant 5.000000e-01 : f32
    %680 = vector.broadcast %cst_395 : f32 to vector<16x256xf32>
    %681 = arith.mulf %680, %679 : vector<16x256xf32>
    %cst_396 = arith.constant 0.707106769 : f32
    %682 = vector.broadcast %cst_396 : f32 to vector<16x256xf32>
    %683 = arith.mulf %679, %682 : vector<16x256xf32>
    %684 = math.erf %683 : vector<16x256xf32>
    %cst_397 = arith.constant 1.000000e+00 : f32
    %685 = vector.broadcast %cst_397 : f32 to vector<16x256xf32>
    %686 = arith.addf %685, %684 : vector<16x256xf32>
    %687 = arith.mulf %681, %686 : vector<16x256xf32>
    %688 = arith.truncf %687 : vector<16x256xf32> to vector<16x256xbf16>
    %c1_398 = arith.constant 1 : index
    %c0_399 = arith.constant 0 : index
    %c0_400 = arith.constant 0 : index
    %689 = vector.load %arg17[%c1_398, %c0_399, %c0_400] : memref<2x256x128xbf16, #tpu.memory_space<vmem>>, vector<1x256x128xbf16>
    %690 = vector.shape_cast %689 : vector<1x256x128xbf16> to vector<256x128xbf16>
    %cst_401 = arith.constant dense<0.000000e+00> : vector<16x128xf32>
    %691 = tpu.matmul %688, %690, %cst_401 {dimension_numbers = #tpu.dot_dimension_numbers<[1], [0], [0], [1], [0, 0, 1, 1], [], []>} : vector<16x256xbf16>, vector<256x128xbf16>, vector<16x128xf32> -> vector<16x128xf32>
    %c1_402 = arith.constant 1 : index
    %c0_403 = arith.constant 0 : index
    %c0_404 = arith.constant 0 : index
    %692 = vector.load %arg18[%c1_402, %c0_403, %c0_404] : memref<2x1x128xf32, #tpu.memory_space<vmem>>, vector<1x1x128xf32>
    %693 = vector.shape_cast %692 : vector<1x1x128xf32> to vector<1x128xf32>
    %694 = vector.broadcast %693 : vector<1x128xf32> to vector<16x128xf32>
    %695 = arith.addf %691, %694 : vector<16x128xf32>
    %696 = arith.addf %695, %671 : vector<16x128xf32>
    %c1_405 = arith.constant 1 : index
    %c0_406 = arith.constant 0 : index
    %c0_407 = arith.constant 0 : index
    %697 = vector.load %arg19[%c1_405, %c0_406, %c0_407] : memref<2x1x128xf32, #tpu.memory_space<vmem>>, vector<1x1x128xf32>
    %698 = vector.shape_cast %697 : vector<1x1x128xf32> to vector<1x128xf32>
    %c1_408 = arith.constant 1 : index
    %c0_409 = arith.constant 0 : index
    %c0_410 = arith.constant 0 : index
    %699 = vector.load %arg20[%c1_408, %c0_409, %c0_410] : memref<2x1x128xf32, #tpu.memory_space<vmem>>, vector<1x1x128xf32>
    %700 = vector.shape_cast %699 : vector<1x1x128xf32> to vector<1x128xf32>
    %cst_411 = arith.constant dense<0.000000e+00> : vector<16xf32>
    %701 = vector.multi_reduction <add>, %696, %cst_411 [1] : vector<16x128xf32> to vector<16xf32>
    %702 = vector.shape_cast %701 : vector<16xf32> to vector<16x1xf32>
    %cst_412 = arith.constant 1.280000e+02 : f32
    %703 = vector.broadcast %cst_412 : f32 to vector<16x1xf32>
    %704 = arith.divf %702, %703 : vector<16x1xf32>
    %705 = vector.broadcast %704 : vector<16x1xf32> to vector<16x128xf32>
    %706 = arith.subf %696, %705 : vector<16x128xf32>
    %707 = arith.mulf %706, %706 : vector<16x128xf32>
    %cst_413 = arith.constant dense<0.000000e+00> : vector<16xf32>
    %708 = vector.multi_reduction <add>, %707, %cst_413 [1] : vector<16x128xf32> to vector<16xf32>
    %709 = vector.shape_cast %708 : vector<16xf32> to vector<16x1xf32>
    %cst_414 = arith.constant 1.280000e+02 : f32
    %710 = vector.broadcast %cst_414 : f32 to vector<16x1xf32>
    %711 = arith.divf %709, %710 : vector<16x1xf32>
    %712 = vector.broadcast %704 : vector<16x1xf32> to vector<16x128xf32>
    %713 = arith.subf %696, %712 : vector<16x128xf32>
    %cst_415 = arith.constant 9.99999996E-13 : f32
    %714 = vector.broadcast %cst_415 : f32 to vector<16x1xf32>
    %715 = arith.addf %711, %714 : vector<16x1xf32>
    %716 = math.rsqrt %715 : vector<16x1xf32>
    %717 = vector.broadcast %716 : vector<16x1xf32> to vector<16x128xf32>
    %718 = arith.mulf %713, %717 : vector<16x128xf32>
    %719 = vector.broadcast %698 : vector<1x128xf32> to vector<16x128xf32>
    %720 = arith.mulf %718, %719 : vector<16x128xf32>
    %721 = vector.broadcast %700 : vector<1x128xf32> to vector<16x128xf32>
    %722 = arith.addf %720, %721 : vector<16x128xf32>
    %723 = vector.extract_strided_slice %722 {offsets = [0, 0], sizes = [1, 128], strides = [1, 1]} : vector<16x128xf32> to vector<1x128xf32>
    %724 = vector.extract_strided_slice %722 {offsets = [8, 0], sizes = [1, 128], strides = [1, 1]} : vector<16x128xf32> to vector<1x128xf32>
    %725 = tpu.concatenate %723, %724 in 0 : vector<1x128xf32>, vector<1x128xf32> -> vector<2x128xf32>
    %726 = arith.truncf %725 : vector<2x128xf32> to vector<2x128xbf16>
    %c0_416 = arith.constant 0 : index
    %c0_417 = arith.constant 0 : index
    %727 = vector.load %arg21[%c0_416, %c0_417] : memref<128x128xbf16, #tpu.memory_space<vmem>>, vector<128x128xbf16>
    %cst_418 = arith.constant dense<0.000000e+00> : vector<2x128xf32>
    %728 = tpu.matmul %726, %727, %cst_418 {dimension_numbers = #tpu.dot_dimension_numbers<[1], [0], [0], [1], [0, 0, 1, 1], [], []>} : vector<2x128xbf16>, vector<128x128xbf16>, vector<2x128xf32> -> vector<2x128xf32>
    %c0_419 = arith.constant 0 : index
    %c0_420 = arith.constant 0 : index
    %729 = vector.load %arg22[%c0_419, %c0_420] : memref<1x128xf32, #tpu.memory_space<vmem>>, vector<1x128xf32>
    %730 = vector.broadcast %729 : vector<1x128xf32> to vector<2x128xf32>
    %731 = arith.addf %728, %730 : vector<2x128xf32>
    %732 = math.tanh %731 : vector<2x128xf32>
    %733 = arith.truncf %732 : vector<2x128xf32> to vector<2x128xbf16>
    %c0_421 = arith.constant 0 : index
    %c0_422 = arith.constant 0 : index
    %734 = vector.load %arg23[%c0_421, %c0_422] : memref<128x128xbf16, #tpu.memory_space<vmem>>, vector<128x128xbf16>
    %cst_423 = arith.constant dense<0.000000e+00> : vector<2x128xf32>
    %735 = tpu.matmul %733, %734, %cst_423 {dimension_numbers = #tpu.dot_dimension_numbers<[1], [0], [0], [1], [0, 0, 1, 1], [], []>} : vector<2x128xbf16>, vector<128x128xbf16>, vector<2x128xf32> -> vector<2x128xf32>
    %c0_424 = arith.constant 0 : index
    %c0_425 = arith.constant 0 : index
    %736 = vector.load %arg24[%c0_424, %c0_425] : memref<1x128xf32, #tpu.memory_space<vmem>>, vector<1x128xf32>
    %737 = vector.broadcast %736 : vector<1x128xf32> to vector<2x128xf32>
    %738 = arith.addf %735, %737 : vector<2x128xf32>
    %c0_426 = arith.constant 0 : index
    %c0_427 = arith.constant 0 : index
    %739 = vector.load %arg25[%c0_426, %c0_427] : memref<2x128xf32, #tpu.memory_space<vmem>>, vector<2x128xf32>
    tpu.vector_store %arg25[%c0_426, %c0_427], %738 {strides = array<i32>} : memref<2x128xf32, #tpu.memory_space<vmem>>, vector<2x128xf32>,
    return
  }
  func.func @transform_0(%arg0: i32) -> (i32, i32) {
    %c0_i32 = arith.constant 0 : i32
    %c0_i32_0 = arith.constant 0 : i32
    %c0_i32_1 = arith.constant 0 : i32
    return %c0_i32, %c0_i32_0 : i32, i32
  }
  func.func @transform_1(%arg0: i32) -> (i32, i32) {
    %c0_i32 = arith.constant 0 : i32
    %c0_i32_0 = arith.constant 0 : i32
    %c0_i32_1 = arith.constant 0 : i32
    return %c0_i32, %c0_i32_0 : i32, i32
  }
  func.func @transform_2(%arg0: i32) -> (i32, i32) {
    %c0_i32 = arith.constant 0 : i32
    %c0_i32_0 = arith.constant 0 : i32
    %c0_i32_1 = arith.constant 0 : i32
    return %c0_i32, %c0_i32_0 : i32, i32
  }
  func.func @transform_3(%arg0: i32) -> (i32, i32) {
    %c0_i32 = arith.constant 0 : i32
    %c0_i32_0 = arith.constant 0 : i32
    %c0_i32_1 = arith.constant 0 : i32
    return %c0_i32, %c0_i32_0 : i32, i32
  }
  func.func @transform_4(%arg0: i32) -> (i32, i32, i32, i32) {
    %c0_i32 = arith.constant 0 : i32
    %c0_i32_0 = arith.constant 0 : i32
    %c0_i32_1 = arith.constant 0 : i32
    %c0_i32_2 = arith.constant 0 : i32
    %c0_i32_3 = arith.constant 0 : i32
    return %c0_i32, %c0_i32_0, %c0_i32_1, %c0_i32_2 : i32, i32, i32, i32
  }
  func.func @transform_5(%arg0: i32) -> (i32, i32, i32, i32) {
    %c0_i32 = arith.constant 0 : i32
    %c0_i32_0 = arith.constant 0 : i32
    %c0_i32_1 = arith.constant 0 : i32
    %c0_i32_2 = arith.constant 0 : i32
    %c0_i32_3 = arith.constant 0 : i32
    return %c0_i32, %c0_i32_0, %c0_i32_1, %c0_i32_2 : i32, i32, i32, i32
  }
  func.func @transform_6(%arg0: i32) -> (i32, i32, i32, i32) {
    %c0_i32 = arith.constant 0 : i32
    %c0_i32_0 = arith.constant 0 : i32
    %c0_i32_1 = arith.constant 0 : i32
    %c0_i32_2 = arith.constant 0 : i32
    %c0_i32_3 = arith.constant 0 : i32
    return %c0_i32, %c0_i32_0, %c0_i32_1, %c0_i32_2 : i32, i32, i32, i32
  }
  func.func @transform_7(%arg0: i32) -> (i32, i32, i32, i32) {
    %c0_i32 = arith.constant 0 : i32
    %c0_i32_0 = arith.constant 0 : i32
    %c0_i32_1 = arith.constant 0 : i32
    %c0_i32_2 = arith.constant 0 : i32
    %c0_i32_3 = arith.constant 0 : i32
    return %c0_i32, %c0_i32_0, %c0_i32_1, %c0_i32_2 : i32, i32, i32, i32
  }
  func.func @transform_8(%arg0: i32) -> (i32, i32, i32, i32) {
    %c0_i32 = arith.constant 0 : i32
    %c0_i32_0 = arith.constant 0 : i32
    %c0_i32_1 = arith.constant 0 : i32
    %c0_i32_2 = arith.constant 0 : i32
    %c0_i32_3 = arith.constant 0 : i32
    return %c0_i32, %c0_i32_0, %c0_i32_1, %c0_i32_2 : i32, i32, i32, i32
  }
  func.func @transform_9(%arg0: i32) -> (i32, i32, i32, i32) {
    %c0_i32 = arith.constant 0 : i32
    %c0_i32_0 = arith.constant 0 : i32
    %c0_i32_1 = arith.constant 0 : i32
    %c0_i32_2 = arith.constant 0 : i32
    %c0_i32_3 = arith.constant 0 : i32
    return %c0_i32, %c0_i32_0, %c0_i32_1, %c0_i32_2 : i32, i32, i32, i32
  }
  func.func @transform_10(%arg0: i32) -> (i32, i32, i32, i32) {
    %c0_i32 = arith.constant 0 : i32
    %c0_i32_0 = arith.constant 0 : i32
    %c0_i32_1 = arith.constant 0 : i32
    %c0_i32_2 = arith.constant 0 : i32
    %c0_i32_3 = arith.constant 0 : i32
    return %c0_i32, %c0_i32_0, %c0_i32_1, %c0_i32_2 : i32, i32, i32, i32
  }
  func.func @transform_11(%arg0: i32) -> (i32, i32, i32) {
    %c0_i32 = arith.constant 0 : i32
    %c0_i32_0 = arith.constant 0 : i32
    %c0_i32_1 = arith.constant 0 : i32
    %c0_i32_2 = arith.constant 0 : i32
    return %c0_i32, %c0_i32_0, %c0_i32_1 : i32, i32, i32
  }
  func.func @transform_12(%arg0: i32) -> (i32, i32, i32) {
    %c0_i32 = arith.constant 0 : i32
    %c0_i32_0 = arith.constant 0 : i32
    %c0_i32_1 = arith.constant 0 : i32
    %c0_i32_2 = arith.constant 0 : i32
    return %c0_i32, %c0_i32_0, %c0_i32_1 : i32, i32, i32
  }
  func.func @transform_13(%arg0: i32) -> (i32, i32, i32) {
    %c0_i32 = arith.constant 0 : i32
    %c0_i32_0 = arith.constant 0 : i32
    %c0_i32_1 = arith.constant 0 : i32
    %c0_i32_2 = arith.constant 0 : i32
    return %c0_i32, %c0_i32_0, %c0_i32_1 : i32, i32, i32
  }
  func.func @transform_14(%arg0: i32) -> (i32, i32, i32) {
    %c0_i32 = arith.constant 0 : i32
    %c0_i32_0 = arith.constant 0 : i32
    %c0_i32_1 = arith.constant 0 : i32
    %c0_i32_2 = arith.constant 0 : i32
    return %c0_i32, %c0_i32_0, %c0_i32_1 : i32, i32, i32
  }
  func.func @transform_15(%arg0: i32) -> (i32, i32, i32) {
    %c0_i32 = arith.constant 0 : i32
    %c0_i32_0 = arith.constant 0 : i32
    %c0_i32_1 = arith.constant 0 : i32
    %c0_i32_2 = arith.constant 0 : i32
    return %c0_i32, %c0_i32_0, %c0_i32_1 : i32, i32, i32
  }
  func.func @transform_16(%arg0: i32) -> (i32, i32, i32) {
    %c0_i32 = arith.constant 0 : i32
    %c0_i32_0 = arith.constant 0 : i32
    %c0_i32_1 = arith.constant 0 : i32
    %c0_i32_2 = arith.constant 0 : i32
    return %c0_i32, %c0_i32_0, %c0_i32_1 : i32, i32, i32
  }
  func.func @transform_17(%arg0: i32) -> (i32, i32, i32) {
    %c0_i32 = arith.constant 0 : i32
    %c0_i32_0 = arith.constant 0 : i32
    %c0_i32_1 = arith.constant 0 : i32
    %c0_i32_2 = arith.constant 0 : i32
    return %c0_i32, %c0_i32_0, %c0_i32_1 : i32, i32, i32
  }
  func.func @transform_18(%arg0: i32) -> (i32, i32, i32) {
    %c0_i32 = arith.constant 0 : i32
    %c0_i32_0 = arith.constant 0 : i32
    %c0_i32_1 = arith.constant 0 : i32
    %c0_i32_2 = arith.constant 0 : i32
    return %c0_i32, %c0_i32_0, %c0_i32_1 : i32, i32, i32
  }
  func.func @transform_19(%arg0: i32) -> (i32, i32, i32) {
    %c0_i32 = arith.constant 0 : i32
    %c0_i32_0 = arith.constant 0 : i32
    %c0_i32_1 = arith.constant 0 : i32
    %c0_i32_2 = arith.constant 0 : i32
    return %c0_i32, %c0_i32_0, %c0_i32_1 : i32, i32, i32
  }
  func.func @transform_20(%arg0: i32) -> (i32, i32) {
    %c0_i32 = arith.constant 0 : i32
    %c0_i32_0 = arith.constant 0 : i32
    %c0_i32_1 = arith.constant 0 : i32
    return %c0_i32, %c0_i32_0 : i32, i32
  }
  func.func @transform_21(%arg0: i32) -> (i32, i32) {
    %c0_i32 = arith.constant 0 : i32
    %c0_i32_0 = arith.constant 0 : i32
    %c0_i32_1 = arith.constant 0 : i32
    return %c0_i32, %c0_i32_0 : i32, i32
  }
  func.func @transform_22(%arg0: i32) -> (i32, i32) {
    %c0_i32 = arith.constant 0 : i32
    %c0_i32_0 = arith.constant 0 : i32
    %c0_i32_1 = arith.constant 0 : i32
    return %c0_i32, %c0_i32_0 : i32, i32
  }
  func.func @transform_23(%arg0: i32) -> (i32, i32) {
    %c0_i32 = arith.constant 0 : i32
    %c0_i32_0 = arith.constant 0 : i32
    %c0_i32_1 = arith.constant 0 : i32
    return %c0_i32, %c0_i32_0 : i32, i32
  }
  func.func @transform_24(%arg0: i32) -> (i32, i32) {
    %c0_i32 = arith.constant 0 : i32
    %c0_i32_0 = arith.constant 0 : i32
    %c0_i32_1 = arith.constant 0 : i32
    return %c0_i32, %c0_i32_0 : i32, i32
  }
}

</mosaic_0001>

<bundles_post_ra>
// kernel: bert_model_forward.1
= control target key start
LH: loop header
LB: loop body
LE: loop exit
PB: predicated region body
PF: predicated region fallthrough
CT: control target
= control target key end

     0   :  { %s8518_s0 = inlined_call_operand.vmem [shape: f32[16,128], index: 0, kind: input, shape index: {}]   ;;  %s8519_s1 = inlined_call_operand.vmem [shape: f32[1,128], index: 1, kind: input, shape index: {}]   ;;  %s8520_s2 = inlined_call_operand.vmem [shape: f32[1,128], index: 2, kind: input, shape index: {}]   ;;  %s8521_s3 = inlined_call_operand.vmem [shape: f32[2,8], index: 3, kind: input, shape index: {}]   ;;  %s8522_s4 = inlined_call_operand.vmem [shape: bf16[2,4,128,32], index: 4, kind: input, shape index: {}]   ;;  %s8523_s5 = inlined_call_operand.vmem [shape: f32[2,4,1,32], index: 5, kind: input, shape index: {}]   ;;  %s8524_s6 = inlined_call_operand.vmem [shape: bf16[2,4,128,32], index: 6, kind: input, shape index: {}]   ;;  %s8525_s7 = inlined_call_operand.vmem [shape: f32[2,4,1,32], index: 7, kind: input, shape index: {}]   ;;  %s8526_s8 = inlined_call_operand.vmem [shape: bf16[2,4,128,32], index: 8, kind: input, shape index: {}]   ;;  %s8527_s9 = inlined_call_operand.vmem [shape: f32[2,4,1,32], index: 9, kind: input, shape index: {}]   ;;  %s8528_s10 = inlined_call_operand.vmem [shape: bf16[2,4,32,128], index: 10, kind: input, shape index: {}]   ;;  %s8529_s11 = inlined_call_operand.vmem [shape: f32[2,1,128], index: 11, kind: input, shape index: {}]   ;;  %s8530_s12 = inlined_call_operand.vmem [shape: f32[2,1,128], index: 12, kind: input, shape index: {}]   ;;  %s8531_s13 = inlined_call_operand.vmem [shape: f32[2,1,128], index: 13, kind: input, shape index: {}]   ;;  %s8532_s14 = inlined_call_operand.vmem [shape: bf16[2,128,256], index: 14, kind: input, shape index: {}]   ;;  %s8533_s15 = inlined_call_operand.vmem [shape: f32[2,1,256], index: 15, kind: input, shape index: {}]   ;;  %s8534_s16 = inlined_call_operand.vmem [shape: bf16[2,256,128], index: 16, kind: input, shape index: {}]   ;;  %s8535_s17 = inlined_call_operand.vmem [shape: f32[2,1,128], index: 17, kind: input, shape index: {}]   ;;  %s8536_s18 = inlined_call_operand.vmem [shape: f32[2,1,128], index: 18, kind: input, shape index: {}]   ;;  %s8537_s19 = inlined_call_operand.vmem [shape: f32[2,1,128], index: 19, kind: input, shape index: {}]   ;;  %s8538_s20 = inlined_call_operand.vmem [shape: bf16[128,128], index: 20, kind: input, shape index: {}]   ;;  %s8539_s21 = inlined_call_operand.vmem [shape: f32[1,128], index: 21, kind: input, shape index: {}]   ;;  %s8540_s22 = inlined_call_operand.vmem [shape: bf16[128,128], index: 22, kind: input, shape index: {}]   ;;  %s8541_s23 = inlined_call_operand.vmem [shape: f32[1,128], index: 23, kind: input, shape index: {}]   ;;  %s8542_s24 = inlined_call_operand.hbm [shape: f32[2,128], index: 24, kind: output, shape index: {}]  }
   0x1   :  { %8550 = sst [smem:[#allocation5_spill]] %s8518_s0 }
   0x2   :  { %8551 = sst [smem:[#allocation6_spill]] %s8519_s1 }
   0x3   :  { %8552 = sst [smem:[#allocation7_spill]] %s8520_s2 }
   0x4   :  { %8553 = sst [smem:[#allocation8_spill]] %s8521_s3 }
   0x5   :  { %8554 = sst [smem:[#allocation9_spill]] %s8522_s4 }
   0x6   :  { %8555 = sst [smem:[#allocation10_spill]] %s8523_s5 }
   0x7   :  { %8556 = sst [smem:[#allocation11_spill]] %s8524_s6 }
   0x8   :  { %8557 = sst [smem:[#allocation12_spill]] %s8525_s7 }
   0x9   :  { %8558 = sst [smem:[#allocation13_spill]] %s8526_s8 }
   0xa   :  { %8559 = sst [smem:[#allocation14_spill]] %s8541_s23 }
   0xb   :  { %8560 = sst [smem:[#allocation15_spill]] %s8542_s24 }
   0xc   :  { %s8561_s27 = sld [smem:[#allocation5_spill]] }
  0x12   :  { %v79_v0 = vld [vmem:[%s8561_s27] sm:$0xff]  ;;  %v80_v1 = vld [vmem:[%s8561_s27 + $0x8] sm:$0xff] }
  0x13   :  { %83 = vadd.xlane.f32.xlu0 %v79_v0 }
  0x1b   :  { %85 = vadd.xlane.f32.xlu0 %v80_v1 }
  0x1c   :  { %29 = vsyncpa [#allocation3], 0  ;;  %v6760_v2 = vmov 128.0   ;;  %s8562_s0 = sld [smem:[#allocation9_spill]]  ;;  %vm396_vm7 = vcmask 261120   ;;  %vm432_vm8 = vcmask 1043456  }
  0x1d   :  { %6628 = vrcp.f32 %v6760_v2  ;;  %s8563_s3 = sld [smem:[#allocation11_spill]]  ;;  %vm416_vm9 = vcmask 64512   ;;  %s6761_s28 = smov [#allocation2]  }
  0x1e   :  { %s8564_s4 = sld [smem:[#allocation13_spill]] }
  0x1f   :  { %s8565_s7 = sld [smem:[#allocation6_spill]] }
  0x20   :  { %s8566_s8 = sld [smem:[#allocation7_spill]] }
  0x21   :  { %s8567_s26 = sld [smem:[#allocation12_spill]] }
  0x22   :  { %v6303_v17 = vld [vmem:[%s8562_s0 + $0x38] sm:$0xff]  ;;  %v6302_v20 = vld [vmem:[%s8562_s0 + $0x30] sm:$0xff]  ;;  %v6301_v23 = vld [vmem:[%s8562_s0 + $0x28] sm:$0xff]  ;;  %s8568_s6 = sld [smem:[#allocation10_spill]] }
  0x23   :  { %v6629_v3 = vpop.eup %6628  ;;  %v6311_v18 = vld [vmem:[%s8563_s3 + $0x38] sm:$0xff]  ;;  %211 = vmatpush.bf16.msra.mxu0 %v6303_v17  ;;  %v6310_v21 = vld [vmem:[%s8563_s3 + $0x30] sm:$0xff]  ;;  %v6309_v24 = vld [vmem:[%s8563_s3 + $0x28] sm:$0xff]  ;;  %s8569_s2 = sld [smem:[#allocation8_spill]] }
  0x24   :  { %v88_v4 = vmul.f32 128.0, %v6629_v3  ;;  %vm92_vm0 = vweird.f32 %v6629_v3  ;;  %v6319_v19 = vld [vmem:[%s8564_s4 + $0x38] sm:$0xff]  ;;  %293 = vmatpush.bf16.msra.mxu1 %v6311_v18  ;;  %v6318_v22 = vld [vmem:[%s8564_s4 + $0x30] sm:$0xff]  ;;  %v6317_v25 = vld [vmem:[%s8564_s4 + $0x28] sm:$0xff]  ;;  %s8574_s24 = sld [smem:[#allocation14_spill]] }
  0x25   :  { %375 = vmatpush.bf16.msra.mxu2 %v6319_v19  ;;  %v6300_v26 = vld [vmem:[%s8562_s0 + $0x20] sm:$0xff]  ;;  %v6299_v29 = vld [vmem:[%s8562_s0 + $0x18] sm:$0xff]  ;;  %v6298_v32 = vld [vmem:[%s8562_s0 + $0x10] sm:$0xff]  ;;  %s8575_s29 = sld [smem:[#allocation15_spill]] }
  0x26   :  { %v89_v5 = vsub.f32 1.0, %v88_v4  ;;  %v6308_v27 = vld [vmem:[%s8563_s3 + $0x20] sm:$0xff]  ;;  %v6307_v30 = vld [vmem:[%s8563_s3 + $0x18] sm:$0xff]  ;;  %v6306_v33 = vld [vmem:[%s8563_s3 + $0x10] sm:$0xff] }
  0x27   :  { %212 = vmatpush.bf16.msra.mxu0 %v6302_v20  ;;  %v6316_v28 = vld [vmem:[%s8564_s4 + $0x20] sm:$0xff]  ;;  %v6315_v31 = vld [vmem:[%s8564_s4 + $0x18] sm:$0xff]  ;;  %v6314_v34 = vld [vmem:[%s8564_s4 + $0x10] sm:$0xff] }
  0x28   :  { %v90_v6 = vmul.f32 %v6629_v3, %v89_v5  ;;  %294 = vmatpush.bf16.msra.mxu1 %v6310_v21  ;;  %v6297_v35 = vld [vmem:[%s8562_s0 + $0x8] sm:$0xff]  ;;  %v6296_v40 = vld [vmem:[%s8562_s0] sm:$0xff]  ;;  %v6336_v18 = vld [vmem:[%s8563_s3 + $0x70] sm:$0xff] }
  0x29   :  { %376 = vmatpush.bf16.msra.mxu2 %v6318_v22  ;;  %v6305_v36 = vld [vmem:[%s8563_s3 + $0x8] sm:$0xff]  ;;  %v6304_v41 = vld [vmem:[%s8563_s3] sm:$0xff] }
  0x2a   :  { %v91_v7 = vadd.f32 %v6629_v3, %v90_v6  ;;  %v6313_v37 = vld [vmem:[%s8564_s4 + $0x8] sm:$0xff]  ;;  %v6312_v42 = vld [vmem:[%s8564_s4] sm:$0xff] }
  0x2b   :  { %213 = vmatpush.bf16.msra.mxu0 %v6301_v23  ;;  %v6586_v59 = vld [vmem:[%s8565_s7] ss:$0 sm:$0xff] }
  0x2c   :  { %v6893_v8 = vsel %vm92_vm0, %v6629_v3, %v91_v7  ;;  %295 = vmatpush.bf16.msra.mxu1 %v6309_v24  ;;  %v6587_v63 = vld [vmem:[%s8566_s8] ss:$0 sm:$0xff] }
  0x2d   :  { %377 = vmatpush.bf16.msra.mxu2 %v6317_v25  ;;  %v6589_v6 = vld [vmem:[%s8567_s26] ss:$0 sm:$0xff]  ;;  %v6335_v25 = vld [vmem:[%s8563_s3 + $0x68] sm:$0xff] }
  0x2f   :  { %214 = vmatpush.bf16.msra.mxu0 %v6300_v26 }
  0x30   :  { %296 = vmatpush.bf16.msra.mxu1 %v6308_v27 }
  0x31   :  { %378 = vmatpush.bf16.msra.mxu2 %v6316_v28 }
  0x33   :  { %215 = vmatpush.bf16.msra.mxu0 %v6299_v29  ;;  %v6334_v29 = vld [vmem:[%s8563_s3 + $0x60] sm:$0xff] }
  0x34   :  { %297 = vmatpush.bf16.msra.mxu1 %v6307_v30 }
  0x35   :  { %379 = vmatpush.bf16.msra.mxu2 %v6315_v31 }
  0x37   :  { %216 = vmatpush.bf16.msra.mxu0 %v6298_v32  ;;  %v6333_v32 = vld [vmem:[%s8563_s3 + $0x58] sm:$0xff] }
  0x38   :  { %298 = vmatpush.bf16.msra.mxu1 %v6306_v33 }
  0x39   :  { %380 = vmatpush.bf16.msra.mxu2 %v6314_v34  ;;  %v6332_v34 = vld [vmem:[%s8563_s3 + $0x50] sm:$0xff] }
  0x3b   :  { %217 = vmatpush.bf16.msra.mxu0 %v6297_v35  ;;  %v6331_v35 = vld [vmem:[%s8563_s3 + $0x48] sm:$0xff] }
  0x3c   :  { %299 = vmatpush.bf16.msra.mxu1 %v6305_v36  ;;  %v6330_v36 = vld [vmem:[%s8563_s3 + $0x40] sm:$0xff] }
  0x3d   :  { %381 = vmatpush.bf16.msra.mxu2 %v6313_v37  ;;  %v7043_v37 = vld [vmem:[%s8569_s2] ss:$0 sm:$0xff] }
  0x3f   :  { %218 = vmatpush.bf16.msra.mxu0 %v6296_v40 }
  0x40   :  { %300 = vmatpush.bf16.msra.mxu1 %v6304_v41 }
  0x41   :  { %382 = vmatpush.bf16.msra.mxu2 %v6312_v42  ;;  %v7050_v42 = vld [vmem:[%s8567_s26 + $0x1] ss:$0 sm:$0xff] }
  0x86   :  { %v84_v9 = vpop.xlane.xlu0 %83 }
  0x87   :  { %v94_v10 = vmul.f32 %v6893_v8, %v84_v9 }
  0x89   :  { %v6896_v11 = vsub.f32 %v79_v0, %v94_v10  ;;  %v7004_v10 = vld [vmem:[%s8568_s6] ss:$0 sm:$0xff] }
  0x8b   :  { %v98_v12 = vmul.f32 %v6896_v11, %v6896_v11 }
  0x8d   :  { %100 = vadd.xlane.f32.xlu1 %v98_v12  ;;  %v6337_v12 = vld [vmem:[%s8563_s3 + $0x78] sm:$0xff] }
  0x8e   :  { %v86_v13 = vpop.xlane.xlu0 %85 }
  0x8f   :  { %v95_v14 = vmul.f32 %v6893_v8, %v86_v13 }
  0x91   :  { %v6901_v15 = vsub.f32 %v80_v1, %v95_v14  ;;  %v6590_v14 = vld [vmem:[%s8527_s9] ss:$0 sm:$0xff] }
  0x93   :  { %v99_v16 = vmul.f32 %v6901_v15, %v6901_v15 }
  0x95   :  { %102 = vadd.xlane.f32.xlu1 %v99_v16 }
 0x100   :  { %v101_v38 = vpop.xlane.xlu1 %100 }
 0x101   :  { %v104_v39 = vmul.f32 %v101_v38, %v6893_v8 }
 0x103   :  { %v106_v43 = vadd.f32 1e-12, %v104_v39 }
 0x105   :  { %6630 = vrsqrt.f32 %v106_v43  ;;  %vm114_vm2 = vweird.f32 %v106_v43 }
 0x108   :  { %v103_v44 = vpop.xlane.xlu1 %102 }
 0x109   :  { %v105_v45 = vmul.f32 %v103_v44, %v6893_v8 }
 0x10b   :  { %v6631_v46 = vpop.eup %6630  ;;  %v107_v47 = vadd.f32 1e-12, %v105_v45 }
 0x10c   :  { %v109_v48 = vmul.f32 %v6631_v46, %v106_v43  ;;  %vm115_vm1 = vweird.f32 %v6631_v46 }
 0x10d   :  { %6632 = vrsqrt.f32 %v107_v47  ;;  %vm116_vm3 = vmor %vm114_vm2, %vm115_vm1  ;;  %vm124_vm5 = vweird.f32 %v107_v47 }
 0x10e   :  { %v110_v49 = vmul.f32 %v6631_v46, %v109_v48 }
 0x110   :  { %v111_v50 = vmul.f32 0.5, %v110_v49 }
 0x112   :  { %v112_v51 = vsub.f32 1.5, %v111_v50 }
 0x113   :  { %v6633_v52 = vpop.eup %6632 }
 0x114   :  { %v113_v53 = vmul.f32 %v6631_v46, %v112_v51  ;;  %v119_v54 = vmul.f32 %v6633_v52, %v107_v47  ;;  %vm125_vm4 = vweird.f32 %v6633_v52 }
 0x115   :  { %vm126_vm6 = vmor %vm124_vm5, %vm125_vm4 }
 0x116   :  { %v120_v55 = vmul.f32 %v6633_v52, %v119_v54  ;;  %v117_v56 = vsel %vm116_vm3, %v6631_v46, %v113_v53 }
 0x117   :  { %v128_v60 = vmul.f32 %v117_v56, %v6896_v11 }
 0x118   :  { %v121_v57 = vmul.f32 0.5, %v120_v55  ;;  %v6345_v55 = vld [vmem:[%s8564_s4 + $0x78] sm:$0xff] }
 0x119   :  { %v133_v0 = vmul.f32 %v6586_v59, %v128_v60  ;;  %v6342_v60 = vld [vmem:[%s8564_s4 + $0x60] sm:$0xff] }
 0x11a   :  { %v122_v58 = vsub.f32 1.5, %v121_v57  ;;  %v6344_v57 = vld [vmem:[%s8564_s4 + $0x70] sm:$0xff] }
 0x11b   :  { %v6987_v3 = vadd.f32 %v6587_v63, %v133_v0  ;;  %v6340_v0 = vld [vmem:[%s8564_s4 + $0x50] sm:$0xff] }
 0x11c   :  { %v123_v61 = vmul.f32 %v6633_v52, %v122_v58  ;;  %v6343_v58 = vld [vmem:[%s8564_s4 + $0x68] sm:$0xff] }
 0x11e   :  { %v127_v62 = vsel %vm126_vm6, %v6633_v52, %v123_v61 }
 0x11f   :  { %v129_v1 = vmul.f32 %v127_v62, %v6901_v15  ;;  %v6341_v62 = vld [vmem:[%s8564_s4 + $0x58] sm:$0xff] }
 0x121   :  { %v134_v2 = vmul.f32 %v6586_v59, %v129_v1  ;;  %v6339_v1 = vld [vmem:[%s8564_s4 + $0x48] sm:$0xff] }
 0x123   :  { %v6989_v4 = vadd.f32 %v6587_v63, %v134_v2  ;;  %v6338_v2 = vld [vmem:[%s8564_s4 + $0x40] sm:$0xff] }
 0x125   :  { %v6993_v5 = vpack.c.bf16 %v6989_v4, %v6987_v3 }
 0x127   :  { %219 = vmatmul.bf16.vlgmr.msra.gmra.mxu0 %v6993_v5  ;;  %301 = vmatmul.bf16.vlgmr.msra.gmra.mxu1 %v6993_v5 }
 0x128   :  { %383 = vmatmul.bf16.vlgmr.msra.gmra.mxu2 %v6993_v5 }
 0x1a4   :  { %v302_v7 = vpop.f32.mrf.mxu1  ;;  %v220_v13 = vpop.f32.mrf.mxu0 }
 0x1a5   :  { %v303_v9 = vadd.f32 %v6589_v6, %v302_v7  ;;  %v221_v16 = vadd.f32 %v7004_v10, %v220_v13 }
 0x1a7   :  { %v391_v11 = vpack.c.bf16 %v303_v9, %v303_v9  ;;  %v389_v23 = vpack.c.bf16 %v221_v16, %v221_v16  ;;  %v7088_v9 = vld [vmem:[%s8569_s2 + $0x1] ss:$0 sm:$0xff] }
 0x1a9   :  { %v401_v15 = vsel %vm396_vm7, %v391_v11, 0 }
 0x1aa   :  { %410 = vmatpush.bf16.xpose.msrb.mxu2 %v401_v15 }
 0x1ab   :  { %v384_v17 = vpop.f32.mrf.mxu2 }
 0x1ac   :  { %v385_v19 = vadd.f32 %v6590_v14, %v384_v17  ;;  %v304_v20 = vpop.f32.mrf.mxu1  ;;  %v222_v59 = vpop.f32.mrf.mxu0 }
 0x1ad   :  { %v305_v21 = vadd.f32 %v6589_v6, %v304_v20  ;;  %v223_v61 = vadd.f32 %v7004_v10, %v222_v59 }
 0x1ae   :  { %v393_v22 = vpack.c.bf16 %v385_v19, %v385_v19 }
 0x1af   :  { %v392_v24 = vpack.c.bf16 %v305_v21, %v305_v21  ;;  %v390_v63 = vpack.c.bf16 %v223_v61, %v223_v61 }
 0x1b0   :  { %v434_v26 = vsel %vm432_vm8, %v393_v22, 0 }
 0x1b1   :  { %443 = vmatpush.bf16.msra.mxu3 %v434_v26  ;;  %4752 = vmatmul.msk.bf16.vlgmr.msrb.gmra.mxu2 %vm396_vm7, %v389_v23  ;;  %v454_v27 = vsel %vm396_vm7, %v392_v24, 0  ;;  %v6329_v23 = vld [vmem:[%s8562_s0 + $0x78] sm:$0xff]  ;;  %v6328_v24 = vld [vmem:[%s8562_s0 + $0x70] sm:$0xff]  ;;  %v6326_v26 = vld [vmem:[%s8562_s0 + $0x60] sm:$0xff] }
 0x1b2   :  { %659 = vmatpush.bf16.msra.mxu2 %v6337_v12 }
 0x1b3   :  { %v386_v28 = vpop.f32.mrf.mxu2 }
 0x1b4   :  { %v387_v30 = vadd.f32 %v6590_v14, %v386_v28  ;;  %v6594_v14 = vld [vmem:[%s8527_s9 + $0x1] ss:$0 sm:$0xff] }
 0x1b5   :  { %463 = vmatpush.bf16.xpose.msrb.mxu3 %v454_v27  ;;  %v6325_v27 = vld [vmem:[%s8562_s0 + $0x58] sm:$0xff] }
 0x1b6   :  { %660 = vmatpush.bf16.msra.mxu2 %v6336_v18  ;;  %v394_v31 = vpack.c.bf16 %v387_v30, %v387_v30 }
 0x1b8   :  { %v485_v33 = vsel %vm432_vm8, %v394_v31, 0 }
 0x1b9   :  { %494 = vmatpush.bf16.msrb.mxu1 %v485_v33  ;;  %v6324_v33 = vld [vmem:[%s8562_s0 + $0x50] sm:$0xff] }
 0x1ba   :  { %661 = vmatpush.bf16.msra.mxu2 %v6335_v25  ;;  %v6327_v25 = vld [vmem:[%s8562_s0 + $0x68] sm:$0xff] }
 0x1bd   :  { %575 = vmatpush.bf16.msra.mxu1 %v6329_v23  ;;  %v6362_v23 = vld [vmem:[%s8563_s3 + $0xb0] sm:$0xff] }
 0x1be   :  { %662 = vmatpush.bf16.msra.mxu2 %v6334_v29 }
 0x1c1   :  { %576 = vmatpush.bf16.msra.mxu1 %v6328_v24  ;;  %v6361_v24 = vld [vmem:[%s8563_s3 + $0xa8] sm:$0xff] }
 0x1c2   :  { %663 = vmatpush.bf16.msra.mxu2 %v6333_v32 }
 0x1c5   :  { %577 = vmatpush.bf16.msra.mxu1 %v6327_v25  ;;  %v6360_v25 = vld [vmem:[%s8563_s3 + $0xa0] sm:$0xff] }
 0x1c6   :  { %664 = vmatpush.bf16.msra.mxu2 %v6332_v34  ;;  %v6323_v34 = vld [vmem:[%s8562_s0 + $0x48] sm:$0xff] }
 0x1c9   :  { %578 = vmatpush.bf16.msra.mxu1 %v6326_v26  ;;  %v6321_v26 = vld [vmem:[%s8528_s10 + $0x8] sm:$0xff] }
 0x1ca   :  { %665 = vmatpush.bf16.msra.mxu2 %v6331_v35  ;;  %v6322_v35 = vld [vmem:[%s8562_s0 + $0x40] sm:$0xff] }
 0x1cd   :  { %579 = vmatpush.bf16.msra.mxu1 %v6325_v27  ;;  %v6359_v27 = vld [vmem:[%s8563_s3 + $0x98] sm:$0xff] }
 0x1ce   :  { %666 = vmatpush.bf16.msra.mxu2 %v6330_v36 }
 0x1d1   :  { %667 = vmatmul.bf16.vlgmr.msra.gmra.mxu2 %v6993_v5  ;;  %580 = vmatpush.bf16.msra.mxu1 %v6324_v33  ;;  %v6347_v33 = vld [vmem:[%s8528_s10 + $0x18] sm:$0xff] }
 0x1d5   :  { %581 = vmatpush.bf16.msra.mxu1 %v6323_v34 }
 0x1d9   :  { %582 = vmatpush.bf16.msra.mxu1 %v6322_v35 }
 0x234   :  { %v412_v38 = vpop.f32.mrf.mxu2 }
 0x235   :  { %v413_v39 = vadd.f32 %v7043_v37, %v412_v38 }
 0x237   :  { %v417_v40 = vsel %vm416_vm9, %v413_v39, -inf }
 0x238   :  { %418 = vmax.xlane.f32.xlu2 %v417_v40 }
 0x23c   :  { %v414_v41 = vpop.f32.mrf.mxu2 }
 0x254   :  { %v668_v43 = vpop.f32.mrf.mxu2 }
 0x255   :  { %v669_v44 = vadd.f32 %v7050_v42, %v668_v43 }
 0x257   :  { %v759_v45 = vpack.c.bf16 %v669_v44, %v669_v44 }
 0x259   :  { %v767_v46 = vsel %vm396_vm7, %v759_v45, 0 }
 0x25a   :  { %776 = vmatpush.bf16.xpose.msrb.mxu0 %v767_v46  ;;  %v6355_v46 = vld [vmem:[%s8562_s0 + $0xb8] sm:$0xff] }
 0x25c   :  { %v670_v38 = vpop.f32.mrf.mxu2 }
 0x2ab   :  { %v419_v47 = vpop.xlane.xlu2 %418 }
 0x2ac   :  { %v420_v48 = vsub.f32 %v413_v39, %v419_v47  ;;  %v671_v39 = vadd.f32 %v7050_v42, %v670_v38  ;;  %v6354_v42 = vld [vmem:[%s8562_s0 + $0xb0] sm:$0xff]  ;;  %v6353_v47 = vld [vmem:[%s8562_s0 + $0xa8] sm:$0xff] }
 0x2ae   :  { %v421_v49 = vmul.f32 1.442695, %v420_v48  ;;  %v760_v41 = vpack.c.bf16 %v671_v39, %v671_v39  ;;  %v6352_v48 = vld [vmem:[%s8562_s0 + $0xa0] sm:$0xff] }
 0x2b0   :  { %6634 = vpow2.f32 %v421_v49  ;;  %v817_v45 = vsel %vm396_vm7, %v760_v41, 0  ;;  %v6351_v49 = vld [vmem:[%s8562_s0 + $0x98] sm:$0xff] }
 0x2b6   :  { %v6635_v50 = vpop.eup %6634 }
 0x2b7   :  { %v423_v51 = vsel %vm416_vm9, %v6635_v50, 0.0 }
 0x2b8   :  { %424 = vadd.xlane.f32.xlu2 %v423_v51 }
 0x32b   :  { %v425_v52 = vpop.xlane.xlu2 %424 }
 0x32c   :  { %6636 = vrcp.f32 %v425_v52  ;;  %v6349_v52 = vld [vmem:[%s8562_s0 + $0x88] sm:$0xff] }
 0x332   :  { %v6637_v53 = vpop.eup %6636 }
 0x333   :  { %v427_v54 = vmul.f32 %v6637_v53, %v6635_v50  ;;  %v6350_v50 = vld [vmem:[%s8562_s0 + $0x90] sm:$0xff]  ;;  %v6348_v53 = vld [vmem:[%s8562_s0 + $0x80] sm:$0xff] }
 0x335   :  { %v428_v56 = vpack.c.bf16 %v427_v54, %v427_v54 }
 0x337   :  { %4753 = vmatmul.msk.bf16.vlgmr.msra.gmra.mxu3 %vm416_vm9, %v428_v56 }
 0x338   :  { %743 = vmatpush.bf16.msra.mxu3 %v6345_v55  ;;  %v6595_v55 = vld [vmem:[%s8568_s6 + $0x1] ss:$0 sm:$0xff] }
 0x33c   :  { %744 = vmatpush.bf16.msra.mxu3 %v6344_v57 }
 0x340   :  { %745 = vmatpush.bf16.msra.mxu3 %v6343_v58 }
 0x344   :  { %746 = vmatpush.bf16.msra.mxu3 %v6342_v60 }
 0x347   :  { %4754 = vmatmul.msk.bf16.vlgmr.msrb.gmra.mxu3 %vm396_vm7, %v390_v63 }
 0x348   :  { %747 = vmatpush.bf16.msra.mxu3 %v6341_v62 }
 0x34c   :  { %748 = vmatpush.bf16.msra.mxu3 %v6340_v0 }
 0x350   :  { %749 = vmatpush.bf16.msra.mxu3 %v6339_v1 }
 0x354   :  { %750 = vmatpush.bf16.msra.mxu3 %v6338_v2 }
 0x357   :  { %751 = vmatmul.bf16.vlgmr.msra.gmra.mxu3 %v6993_v5 }
 0x358   :  { %890 = vmatpush.bf16.msrb.mxu3 %v6347_v33  ;;  %v6373_v33 = vld [vmem:[%s8528_s10 + $0x28] sm:$0xff] }
 0x3ba   :  { %v7083_v6 = vpop.f32.mrf.mxu3 }
 0x3c2   :  { %v447_v7 = vpop.f32.mrf.mxu3 }
 0x3ca   :  { %v465_v10 = vpop.f32.mrf.mxu3 }
 0x3cb   :  { %v466_v11 = vadd.f32 %v7088_v9, %v465_v10 }
 0x3cd   :  { %v469_v12 = vsel %vm416_vm9, %v466_v11, -inf }
 0x3ce   :  { %470 = vmax.xlane.f32.xlu0 %v469_v12 }
 0x3d2   :  { %v467_v13 = vpop.f32.mrf.mxu3 }
 0x3da   :  { %v752_v15 = vpop.f32.mrf.mxu3 }
 0x3db   :  { %v753_v16 = vadd.f32 %v6594_v14, %v752_v15 }
 0x3dd   :  { %v761_v17 = vpack.c.bf16 %v753_v16, %v753_v16 }
 0x3df   :  { %v798_v18 = vsel %vm432_vm8, %v761_v17, 0 }
 0x3e0   :  { %807 = vmatpush.bf16.msra.mxu0 %v798_v18 }
 0x3e2   :  { %v754_v19 = vpop.f32.mrf.mxu3 }
 0x3e3   :  { %v755_v20 = vadd.f32 %v6594_v14, %v754_v19 }
 0x3e5   :  { %v762_v21 = vpack.c.bf16 %v755_v20, %v755_v20 }
 0x3e7   :  { %v848_v22 = vsel %vm432_vm8, %v762_v21, 0 }
 0x3e8   :  { %857 = vmatpush.bf16.msrb.mxu2 %v848_v22  ;;  %v6363_v22 = vld [vmem:[%s8563_s3 + $0xb8] sm:$0xff] }
 0x3ec   :  { %1081 = vmatpush.bf16.msra.mxu2 %v6363_v22 }
 0x3f0   :  { %1082 = vmatpush.bf16.msra.mxu2 %v6362_v23 }
 0x3f4   :  { %1083 = vmatpush.bf16.msra.mxu2 %v6361_v24 }
 0x3f8   :  { %1084 = vmatpush.bf16.msra.mxu2 %v6360_v25 }
 0x3fc   :  { %1085 = vmatpush.bf16.msra.mxu2 %v6359_v27 }
 0x441   :  { %v471_v28 = vpop.xlane.xlu0 %470 }
 0x442   :  { %v472_v29 = vsub.f32 %v466_v11, %v471_v28  ;;  %v6320_v28 = vld [vmem:[%s8528_s10] sm:$0xff] }
 0x444   :  { %v473_v30 = vmul.f32 1.442695, %v472_v29  ;;  %v6358_v29 = vld [vmem:[%s8563_s3 + $0x90] sm:$0xff] }
 0x445   :  { %1086 = vmatpush.bf16.msra.mxu2 %v6358_v29 }
 0x446   :  { %6638 = vpow2.f32 %v473_v30  ;;  %v6357_v30 = vld [vmem:[%s8563_s3 + $0x88] sm:$0xff] }
 0x449   :  { %1087 = vmatpush.bf16.msra.mxu2 %v6357_v30 }
 0x44c   :  { %v6639_v31 = vpop.eup %6638 }
 0x44d   :  { %v475_v32 = vsel %vm416_vm9, %v6639_v31, 0.0 }
 0x44e   :  { %476 = vadd.xlane.f32.xlu1 %v475_v32 }
 0x4c1   :  { %v477_v36 = vpop.xlane.xlu1 %476 }
 0x4c2   :  { %6640 = vrcp.f32 %v477_v36 }
 0x4c8   :  { %v6641_v40 = vpop.eup %6640 }
 0x4c9   :  { %v479_v43 = vmul.f32 %v6641_v40, %v6639_v31  ;;  %v6356_v31 = vld [vmem:[%s8563_s3 + $0x80] sm:$0xff] }
 0x4ca   :  { %1088 = vmatpush.bf16.msra.mxu2 %v6356_v31 }
 0x4cb   :  { %v480_v44 = vpack.c.bf16 %v479_v43, %v479_v43 }
 0x4cd   :  { %4755 = vmatmul.msk.bf16.vlgmr.msrb.gmra.mxu1 %vm416_vm9, %v480_v44  ;;  %v6346_v44 = vld [vmem:[%s8528_s10 + $0x10] sm:$0xff] }
 0x4ce   :  { %826 = vmatpush.bf16.xpose.msrb.mxu1 %v817_v45  ;;  %v6371_v45 = vld [vmem:[%s8564_s4 + $0xb8] sm:$0xff]  ;;  %891 = vmatpush.bf16.msrb.mxu3 %v6346_v44 }
 0x4d2   :  { %1165 = vmatpush.bf16.msra.mxu3 %v6371_v45 }
 0x4dd   :  { %583 = vmatmul.bf16.vlgmr.msra.gmra.mxu1 %v6993_v5 }
 0x4de   :  { %997 = vmatpush.bf16.msra.mxu1 %v6355_v46  ;;  %v6370_v46 = vld [vmem:[%s8564_s4 + $0xb0] sm:$0xff] }
 0x4df   :  { %1166 = vmatpush.bf16.msra.mxu3 %v6370_v46 }
 0x4e2   :  { %998 = vmatpush.bf16.msra.mxu1 %v6354_v42  ;;  %v6368_v42 = vld [vmem:[%s8564_s4 + $0xa0] sm:$0xff] }
 0x4e6   :  { %999 = vmatpush.bf16.msra.mxu1 %v6353_v47  ;;  %v6367_v47 = vld [vmem:[%s8564_s4 + $0x98] sm:$0xff] }
 0x4ea   :  { %1000 = vmatpush.bf16.msra.mxu1 %v6352_v48  ;;  %v6366_v48 = vld [vmem:[%s8564_s4 + $0x90] sm:$0xff] }
 0x4ee   :  { %1001 = vmatpush.bf16.msra.mxu1 %v6351_v49  ;;  %v6365_v49 = vld [vmem:[%s8564_s4 + $0x88] sm:$0xff] }
 0x4f2   :  { %1002 = vmatpush.bf16.msra.mxu1 %v6350_v50  ;;  %v6364_v50 = vld [vmem:[%s8564_s4 + $0x80] sm:$0xff] }
 0x4f6   :  { %1003 = vmatpush.bf16.msra.mxu1 %v6349_v52 }
 0x4fa   :  { %1004 = vmatpush.bf16.msra.mxu1 %v6348_v53 }
 0x54a   :  { %v7144_v51 = vpop.f32.mrf.mxu1 }
 0x54b   :  { %v500_v43 = vpack.c.bf16 %v7144_v51, %v7083_v6  ;;  %v6369_v6 = vld [vmem:[%s8564_s4 + $0xa8] sm:$0xff] }
 0x54c   :  { %1167 = vmatpush.bf16.msra.mxu3 %v6369_v6  ;;  %v6599_v6 = vld [vmem:[%s8567_s26 + $0x3] ss:$0 sm:$0xff] }
 0x550   :  { %1168 = vmatpush.bf16.msra.mxu3 %v6368_v42 }
 0x552   :  { %v498_v54 = vpop.f32.mrf.mxu1 }
 0x554   :  { %1169 = vmatpush.bf16.msra.mxu3 %v6367_v47 }
 0x558   :  { %1170 = vmatpush.bf16.msra.mxu3 %v6366_v48 }
 0x55a   :  { %v584_v56 = vpop.f32.mrf.mxu1 }
 0x55b   :  { %v585_v57 = vadd.f32 %v6595_v55, %v584_v56  ;;  %v6597_v56 = vld [vmem:[%s8567_s26 + $0x2] ss:$0 sm:$0xff] }
 0x55c   :  { %1171 = vmatpush.bf16.msra.mxu3 %v6365_v49 }
 0x55d   :  { %v757_v58 = vpack.c.bf16 %v585_v57, %v585_v57 }
 0x55f   :  { %4903 = vmatmul.msk.bf16.vlgmr.msrb.gmra.mxu0 %vm396_vm7, %v757_v58 }
 0x560   :  { %919 = vmatpush.bf16.msrb.mxu0 %v6321_v26  ;;  %1172 = vmatpush.bf16.msra.mxu3 %v6364_v50  ;;  %v6598_v26 = vld [vmem:[%s8527_s9 + $0x2] ss:$0 sm:$0xff]  ;;  %v6381_v50 = vld [vmem:[%s8562_s0 + $0xf8] sm:$0xff] }
 0x562   :  { %v586_v59 = vpop.f32.mrf.mxu1 }
 0x563   :  { %v587_v60 = vadd.f32 %v6595_v55, %v586_v59 }
 0x564   :  { %920 = vmatpush.bf16.msrb.mxu0 %v6320_v28 }
 0x565   :  { %v758_v61 = vpack.c.bf16 %v587_v60, %v587_v60  ;;  %v6596_v60 = vld [vmem:[%s8568_s6 + $0x2] ss:$0 sm:$0xff] }
 0x567   :  { %4905 = vmatmul.msk.bf16.vlgmr.msrb.gmra.mxu1 %vm396_vm7, %v758_v61 }
 0x577   :  { %1005 = vmatmul.bf16.vlgmr.msra.gmra.mxu1 %v6993_v5 }
 0x5dc   :  { %v778_v62 = vpop.f32.mrf.mxu0 }
 0x5dd   :  { %v779_v63 = vadd.f32 %v7043_v37, %v778_v62 }
 0x5df   :  { %v782_v0 = vsel %vm416_vm9, %v779_v63, -inf }
 0x5e0   :  { %783 = vmax.xlane.f32.xlu1 %v782_v0 }
 0x5e4   :  { %v780_v1 = vpop.f32.mrf.mxu0  ;;  %v828_v2 = vpop.f32.mrf.mxu1 }
 0x5e5   :  { %v829_v7 = vadd.f32 %v7088_v9, %v828_v2 }
 0x5e7   :  { %v832_v10 = vsel %vm416_vm9, %v829_v7, -inf }
 0x5e8   :  { %833 = vmax.xlane.f32.xlu2 %v832_v10  ;;  %v6389_v10 = vld [vmem:[%s8563_s3 + $0xf8] sm:$0xff] }
 0x5ec   :  { %v830_v11 = vpop.f32.mrf.mxu1 }
 0x5f4   :  { %v1006_v59 = vpop.f32.mrf.mxu1 }
 0x5fc   :  { %v1008_v11 = vpop.f32.mrf.mxu1 }
 0x653   :  { %v784_v12 = vpop.xlane.xlu1 %783 }
 0x654   :  { %v785_v13 = vsub.f32 %v779_v63, %v784_v12  ;;  %v1007_v63 = vadd.f32 %v6596_v60, %v1006_v59 }
 0x656   :  { %v786_v14 = vmul.f32 1.442695, %v785_v13  ;;  %v1179_v2 = vpack.c.bf16 %v1007_v63, %v1007_v63  ;;  %v1009_v13 = vadd.f32 %v6596_v60, %v1008_v11  ;;  %v6374_v11 = vld [vmem:[%s8562_s0 + $0xc0] sm:$0xff] }
 0x658   :  { %6642 = vpow2.f32 %v786_v14  ;;  %v6388_v14 = vld [vmem:[%s8563_s3 + $0xf0] sm:$0xff] }
 0x65b   :  { %v834_v15 = vpop.xlane.xlu2 %833 }
 0x65c   :  { %v835_v16 = vsub.f32 %v829_v7, %v834_v15  ;;  %v1180_v15 = vpack.c.bf16 %v1009_v13, %v1009_v13  ;;  %v6394_v13 = vld [vmem:[%s8564_s4 + $0xe0] sm:$0xff] }
 0x65e   :  { %v6643_v17 = vpop.eup %6642  ;;  %v836_v18 = vmul.f32 1.442695, %v835_v16  ;;  %v6387_v16 = vld [vmem:[%s8563_s3 + $0xe8] sm:$0xff] }
 0x65f   :  { %v788_v19 = vsel %vm416_vm9, %v6643_v17, 0.0 }
 0x660   :  { %6644 = vpow2.f32 %v836_v18  ;;  %789 = vadd.xlane.f32.xlu2 %v788_v19  ;;  %v6385_v18 = vld [vmem:[%s8563_s3 + $0xd8] sm:$0xff]  ;;  %v6384_v19 = vld [vmem:[%s8563_s3 + $0xd0] sm:$0xff] }
 0x666   :  { %v6645_v20 = vpop.eup %6644 }
 0x667   :  { %v838_v21 = vsel %vm416_vm9, %v6645_v20, 0.0 }
 0x668   :  { %839 = vadd.xlane.f32.xlu0 %v838_v21  ;;  %v6382_v21 = vld [vmem:[%s8563_s3 + $0xc0] sm:$0xff] }
 0x6d3   :  { %v790_v32 = vpop.xlane.xlu2 %789 }
 0x6d4   :  { %6646 = vrcp.f32 %v790_v32 }
 0x6da   :  { %v6647_v34 = vpop.eup %6646 }
 0x6db   :  { %v792_v35 = vmul.f32 %v6647_v34, %v6643_v17  ;;  %v840_v36 = vpop.xlane.xlu0 %839  ;;  %v6386_v17 = vld [vmem:[%s8563_s3 + $0xe0] sm:$0xff] }
 0x6dc   :  { %6648 = vrcp.f32 %v840_v36 }
 0x6dd   :  { %v793_v38 = vpack.c.bf16 %v792_v35, %v792_v35 }
 0x6df   :  { %4904 = vmatmul.msk.bf16.vlgmr.msra.gmra.mxu0 %vm416_vm9, %v793_v38  ;;  %v6372_v38 = vld [vmem:[%s8528_s10 + $0x20] sm:$0xff] }
 0x6e2   :  { %v6649_v39 = vpop.eup %6648 }
 0x6e3   :  { %v842_v40 = vmul.f32 %v6649_v39, %v6645_v20  ;;  %v6383_v20 = vld [vmem:[%s8563_s3 + $0xc8] sm:$0xff] }
 0x6e5   :  { %v843_v41 = vpack.c.bf16 %v842_v40, %v842_v40 }
 0x6e7   :  { %4906 = vmatmul.msk.bf16.vlgmr.msrb.gmra.mxu2 %vm416_vm9, %v843_v41 }
 0x6ef   :  { %4928 = vmatmul.msk.bf16.vlgmr.msrb.gmra.mxu0 %vm396_vm7, %v500_v43 }
 0x6f7   :  { %1089 = vmatmul.bf16.vlgmr.msra.gmra.mxu2 %v6993_v5 }
 0x75c   :  { %v809_v51 = vpop.f32.mrf.mxu0 }
 0x764   :  { %v811_v52 = vpop.f32.mrf.mxu0 }
 0x765   :  { %v6379_v52 = vld [vmem:[%s8562_s0 + $0xe8] sm:$0xff] }
 0x76a   :  { %v859_v53 = vpop.f32.mrf.mxu2 }
 0x76b   :  { %v863_v54 = vpack.c.bf16 %v859_v53, %v809_v51  ;;  %v6380_v51 = vld [vmem:[%s8562_s0 + $0xf0] sm:$0xff]  ;;  %v6378_v53 = vld [vmem:[%s8562_s0 + $0xe0] sm:$0xff] }
 0x76c   :  { %v7269_v23 = vpop.f32.mrf.mxu0 }
 0x76d   :  { %4919 = vmatmul.msk.bf16.vlgmr.msrb.gmra.mxu3 %vm396_vm7, %v863_v54 }
 0x76e   :  { %1312 = vmatpush.bf16.msrb.mxu3 %v6373_v33 }
 0x772   :  { %v861_v55 = vpop.f32.mrf.mxu2  ;;  %1313 = vmatpush.bf16.msrb.mxu3 %v6372_v38 }
 0x774   :  { %v7273_v25 = vpop.f32.mrf.mxu0 }
 0x77a   :  { %v1090_v57 = vpop.f32.mrf.mxu2 }
 0x77b   :  { %v1091_v58 = vadd.f32 %v6597_v56, %v1090_v57  ;;  %v6377_v57 = vld [vmem:[%s8562_s0 + $0xd8] sm:$0xff] }
 0x77d   :  { %v1181_v61 = vpack.c.bf16 %v1091_v58, %v1091_v58  ;;  %1173 = vmatmul.bf16.vlgmr.msra.gmra.mxu3 %v6993_v5 }
 0x77f   :  { %v1189_v62 = vsel %vm396_vm7, %v1181_v61, 0 }
 0x780   :  { %1198 = vmatpush.bf16.xpose.msra.mxu0 %v1189_v62 }
 0x782   :  { %v1092_v0 = vpop.f32.mrf.mxu2 }
 0x783   :  { %v1093_v1 = vadd.f32 %v6597_v56, %v1092_v0 }
 0x785   :  { %v1182_v7 = vpack.c.bf16 %v1093_v1, %v1093_v1  ;;  %v6376_v1 = vld [vmem:[%s8562_s0 + $0xd0] sm:$0xff] }
 0x787   :  { %5076 = vmatmul.msk.bf16.vlgmr.msra.gmra.mxu0 %vm396_vm7, %v1179_v2  ;;  %v1239_v12 = vsel %vm396_vm7, %v1182_v7, 0  ;;  %v6397_v2 = vld [vmem:[%s8564_s4 + $0xf8] sm:$0xff]  ;;  %v6375_v7 = vld [vmem:[%s8562_s0 + $0xc8] sm:$0xff] }
 0x788   :  { %1248 = vmatpush.bf16.xpose.msrb.mxu1 %v1239_v12  ;;  %v6395_v12 = vld [vmem:[%s8564_s4 + $0xe8] sm:$0xff] }
 0x78f   :  { %5078 = vmatmul.msk.bf16.vlgmr.msrb.gmra.mxu1 %vm396_vm7, %v1180_v15  ;;  %v6392_v15 = vld [vmem:[%s8564_s4 + $0xd0] sm:$0xff] }
 0x790   :  { %1476 = vmatpush.bf16.msra.mxu1 %v6389_v10  ;;  %v6396_v10 = vld [vmem:[%s8564_s4 + $0xf0] sm:$0xff] }
 0x794   :  { %1477 = vmatpush.bf16.msra.mxu1 %v6388_v14  ;;  %v6393_v14 = vld [vmem:[%s8564_s4 + $0xd8] sm:$0xff] }
 0x798   :  { %1478 = vmatpush.bf16.msra.mxu1 %v6387_v16  ;;  %v6391_v16 = vld [vmem:[%s8564_s4 + $0xc8] sm:$0xff] }
 0x79c   :  { %1479 = vmatpush.bf16.msra.mxu1 %v6386_v17  ;;  %v6390_v17 = vld [vmem:[%s8564_s4 + $0xc0] sm:$0xff] }
 0x7a0   :  { %1480 = vmatpush.bf16.msra.mxu1 %v6385_v18 }
 0x7a4   :  { %1481 = vmatpush.bf16.msra.mxu1 %v6384_v19 }
 0x7a8   :  { %1482 = vmatpush.bf16.msra.mxu1 %v6383_v20 }
 0x7ac   :  { %1483 = vmatpush.bf16.msra.mxu1 %v6382_v21 }
 0x7af   :  { %1484 = vmatmul.bf16.vlgmr.msra.gmra.mxu1 %v6993_v5 }
 0x7f0   :  { %v7267_v22 = vpop.f32.mrf.mxu3 }
 0x7f8   :  { %v7271_v24 = vpop.f32.mrf.mxu3 }
 0x800   :  { %v1174_v27 = vpop.f32.mrf.mxu3 }
 0x801   :  { %v1175_v28 = vadd.f32 %v6598_v26, %v1174_v27 }
 0x803   :  { %v1183_v29 = vpack.c.bf16 %v1175_v28, %v1175_v28 }
 0x804   :  { %v1200_v30 = vpop.f32.mrf.mxu0 }
 0x805   :  { %v1220_v31 = vsel %vm432_vm8, %v1183_v29, 0  ;;  %v1201_v32 = vadd.f32 %v7043_v37, %v1200_v30 }
 0x806   :  { %1229 = vmatpush.bf16.msrb.mxu0 %v1220_v31 }
 0x807   :  { %v1204_v34 = vsel %vm416_vm9, %v1201_v32, -inf }
 0x808   :  { %v1176_v35 = vpop.f32.mrf.mxu3  ;;  %1205 = vmax.xlane.f32.xlu1 %v1204_v34 }
 0x809   :  { %v1177_v36 = vadd.f32 %v6598_v26, %v1176_v35 }
 0x80a   :  { %1392 = vmatpush.bf16.msra.mxu0 %v6381_v50 }
 0x80b   :  { %v1184_v39 = vpack.c.bf16 %v1177_v36, %v1177_v36 }
 0x80c   :  { %v1202_v40 = vpop.f32.mrf.mxu0  ;;  %v1250_v41 = vpop.f32.mrf.mxu1 }
 0x80d   :  { %v1251_v43 = vadd.f32 %v7088_v9, %v1250_v41  ;;  %v1270_v44 = vsel %vm432_vm8, %v1184_v39, 0  ;;  %v6600_v41 = vld [vmem:[%s8568_s6 + $0x3] ss:$0 sm:$0xff] }
 0x80e   :  { %1279 = vmatpush.bf16.msrb.mxu2 %v1270_v44  ;;  %1393 = vmatpush.bf16.msra.mxu0 %v6380_v51 }
 0x80f   :  { %v1254_v45 = vsel %vm416_vm9, %v1251_v43, -inf }
 0x810   :  { %1255 = vmax.xlane.f32.xlu0 %v1254_v45 }
 0x812   :  { %1394 = vmatpush.bf16.msra.mxu0 %v6379_v52  ;;  %1560 = vmatpush.bf16.msra.mxu2 %v6397_v2 }
 0x814   :  { %v1252_v46 = vpop.f32.mrf.mxu1 }
 0x816   :  { %1395 = vmatpush.bf16.msra.mxu0 %v6378_v53  ;;  %1561 = vmatpush.bf16.msra.mxu2 %v6396_v10 }
 0x81a   :  { %1396 = vmatpush.bf16.msra.mxu0 %v6377_v57  ;;  %1562 = vmatpush.bf16.msra.mxu2 %v6395_v12 }
 0x81e   :  { %1397 = vmatpush.bf16.msra.mxu0 %v6376_v1  ;;  %1563 = vmatpush.bf16.msra.mxu2 %v6394_v13 }
 0x822   :  { %1398 = vmatpush.bf16.msra.mxu0 %v6375_v7  ;;  %1564 = vmatpush.bf16.msra.mxu2 %v6393_v14 }
 0x826   :  { %1399 = vmatpush.bf16.msra.mxu0 %v6374_v11  ;;  %1565 = vmatpush.bf16.msra.mxu2 %v6392_v15 }
 0x82a   :  { %1566 = vmatpush.bf16.msra.mxu2 %v6391_v16 }
 0x82c   :  { %v1485_v42 = vpop.f32.mrf.mxu1 }
 0x82d   :  { %v1486_v47 = vadd.f32 %v6599_v6, %v1485_v42 }
 0x82e   :  { %1567 = vmatpush.bf16.msra.mxu2 %v6390_v17 }
 0x82f   :  { %v1576_v48 = vpack.c.bf16 %v1486_v47, %v1486_v47 }
 0x831   :  { %v1584_v49 = vsel %vm396_vm7, %v1576_v48, 0 }
 0x832   :  { %1593 = vmatpush.bf16.xpose.msra.mxu3 %v1584_v49 }
 0x834   :  { %v1487_v19 = vpop.f32.mrf.mxu1 }
 0x835   :  { %v1488_v20 = vadd.f32 %v6599_v6, %v1487_v19 }
 0x837   :  { %v1577_v26 = vpack.c.bf16 %v1488_v20, %v1488_v20 }
 0x839   :  { %v1634_v30 = vsel %vm396_vm7, %v1577_v26, 0  ;;  %v6399_v26 = vld [vmem:[%s8528_s10 + $0x38] sm:$0xff] }
 0x87b   :  { %v1206_v54 = vpop.xlane.xlu1 %1205 }
 0x87c   :  { %v1207_v55 = vsub.f32 %v1201_v32, %v1206_v54  ;;  %v923_v54 = vadd.f32 %v7269_v23, %v7267_v22 }
 0x87e   :  { %v1208_v56 = vmul.f32 1.442695, %v1207_v55 }
 0x880   :  { %6650 = vpow2.f32 %v1208_v56 }
 0x883   :  { %v1256_v58 = vpop.xlane.xlu0 %1255 }
 0x884   :  { %v1257_v59 = vsub.f32 %v1251_v43, %v1256_v58 }
 0x886   :  { %v6651_v60 = vpop.eup %6650  ;;  %v1258_v61 = vmul.f32 1.442695, %v1257_v59 }
 0x887   :  { %v1210_v62 = vsel %vm416_vm9, %v6651_v60, 0.0 }
 0x888   :  { %6652 = vpow2.f32 %v1258_v61  ;;  %1211 = vadd.xlane.f32.xlu0 %v1210_v62 }
 0x88e   :  { %v6653_v63 = vpop.eup %6652 }
 0x88f   :  { %v1260_v0 = vsel %vm416_vm9, %v6653_v63, 0.0 }
 0x890   :  { %1261 = vadd.xlane.f32.xlu2 %v1260_v0 }
 0x8fb   :  { %v1212_v18 = vpop.xlane.xlu0 %1211 }
 0x8fc   :  { %6654 = vrcp.f32 %v1212_v18 }
 0x902   :  { %v6655_v21 = vpop.eup %6654 }
 0x903   :  { %v1214_v27 = vmul.f32 %v6655_v21, %v6651_v60  ;;  %v1262_v28 = vpop.xlane.xlu2 %1261 }
 0x904   :  { %6656 = vrcp.f32 %v1262_v28 }
 0x905   :  { %v1215_v29 = vpack.c.bf16 %v1214_v27, %v1214_v27  ;;  %v6398_v27 = vld [vmem:[%s8528_s10 + $0x30] sm:$0xff] }
 0x907   :  { %5077 = vmatmul.msk.bf16.vlgmr.msrb.gmra.mxu0 %vm416_vm9, %v1215_v29 }
 0x908   :  { %1643 = vmatpush.bf16.xpose.msrb.mxu0 %v1634_v30 }
 0x90a   :  { %v6657_v31 = vpop.eup %6656 }
 0x90b   :  { %v1264_v32 = vmul.f32 %v6657_v31, %v6653_v63 }
 0x90d   :  { %v1265_v33 = vpack.c.bf16 %v1264_v32, %v1264_v32 }
 0x90f   :  { %5079 = vmatmul.msk.bf16.vlgmr.msrb.gmra.mxu2 %vm416_vm9, %v1265_v33  ;;  %v6602_v33 = vld [vmem:[%s8529_s11] ss:$0 sm:$0xff] }
 0x910   :  { %1707 = vmatpush.bf16.msrb.mxu2 %v6399_v26  ;;  %v6403_v26 = vld [vmem:[%s8532_s14 + $0x14] sm:$0xf0] }
 0x914   :  { %1708 = vmatpush.bf16.msrb.mxu2 %v6398_v27  ;;  %v6402_v27 = vld [vmem:[%s8532_s14 + $0x14] sm:$0xf] }
 0x917   :  { %1400 = vmatmul.bf16.vlgmr.msra.gmra.mxu0 %v6993_v5 }
 0x91f   :  { %1568 = vmatmul.bf16.vlgmr.msra.gmra.mxu2 %v6993_v5  ;;  %v6601_v5 = vld [vmem:[%s8527_s9 + $0x3] ss:$0 sm:$0xff] }
 0x984   :  { %v1231_v34 = vpop.f32.mrf.mxu0 }
 0x98c   :  { %v1233_v35 = vpop.f32.mrf.mxu0 }
 0x992   :  { %v1281_v36 = vpop.f32.mrf.mxu2 }
 0x993   :  { %v1285_v38 = vpack.c.bf16 %v1281_v36, %v1231_v34 }
 0x994   :  { %v1401_v39 = vpop.f32.mrf.mxu0 }
 0x995   :  { %5092 = vmatmul.msk.bf16.vlgmr.msrb.gmra.mxu3 %vm396_vm7, %v1285_v38  ;;  %v1402_v45 = vadd.f32 %v6600_v41, %v1401_v39  ;;  %v925_v38 = vadd.f32 %v7273_v25, %v7271_v24 }
 0x997   :  { %v1574_v42 = vpack.c.bf16 %v1402_v45, %v1402_v45 }
 0x99a   :  { %v1283_v40 = vpop.f32.mrf.mxu2 }
 0x99c   :  { %v1403_v43 = vpop.f32.mrf.mxu0 }
 0x99d   :  { %v1404_v44 = vadd.f32 %v6600_v41, %v1403_v43 }
 0x99f   :  { %v1575_v46 = vpack.c.bf16 %v1404_v44, %v1404_v44 }
 0x9a1   :  { %5242 = vmatmul.msk.bf16.vlgmr.msrb.gmra.mxu0 %vm396_vm7, %v1575_v46 }
 0x9a2   :  { %v1569_v6 = vpop.f32.mrf.mxu2 }
 0x9a3   :  { %v1570_v47 = vadd.f32 %v6601_v5, %v1569_v6 }
 0x9a5   :  { %v1578_v48 = vpack.c.bf16 %v1570_v47, %v1570_v47  ;;  %5240 = vmatmul.msk.bf16.vlgmr.msra.gmra.mxu3 %vm396_vm7, %v1574_v42 }
 0x9a7   :  { %v1615_v49 = vsel %vm432_vm8, %v1578_v48, 0  ;;  %v6415_v48 = vld [vmem:[%s8532_s14 + $0x74] sm:$0xf0] }
 0x9a8   :  { %1624 = vmatpush.bf16.msrb.mxu3 %v1615_v49  ;;  %v6414_v49 = vld [vmem:[%s8532_s14 + $0x74] sm:$0xf] }
 0x9aa   :  { %v1571_v50 = vpop.f32.mrf.mxu2 }
 0x9ab   :  { %v1572_v51 = vadd.f32 %v6601_v5, %v1571_v50 }
 0x9ad   :  { %v1579_v52 = vpack.c.bf16 %v1572_v51, %v1572_v51  ;;  %v5317_v51 = vld [vmem:[%s8532_s14 + $0x78] sm:$0xf0] }
 0x9af   :  { %v1665_v53 = vsel %vm432_vm8, %v1579_v52, 0  ;;  %v5320_v52 = vor.u32 %v6414_v49, %v5317_v51 }
 0x9b0   :  { %1674 = vmatpush.bf16.msrb.mxu1 %v1665_v53  ;;  %v5307_v53 = vld [vmem:[%s8532_s14 + $0x60] sm:$0xf] }
 0x9b1   :  { %1894 = vmatpush.bf16.msra.mxu0 %v5320_v52 }
 0xa18   :  { %v1315_v55 = vpop.f32.mrf.mxu3 }
 0xa19   :  { %v1320_v56 = vadd.f32 %v1315_v55, %v923_v54  ;;  %v6413_v54 = vld [vmem:[%s8532_s14 + $0x64] sm:$0xf0]  ;;  %v6412_v55 = vld [vmem:[%s8532_s14 + $0x64] sm:$0xf] }
 0xa1e   :  { %v1645_v57 = vpop.f32.mrf.mxu0 }
 0xa1f   :  { %v1646_v58 = vadd.f32 %v7088_v9, %v1645_v57  ;;  %v5309_v57 = vld [vmem:[%s8532_s14 + $0x68] sm:$0xf0] }
 0xa20   :  { %v1317_v59 = vpop.f32.mrf.mxu3 }
 0xa21   :  { %v1649_v60 = vsel %vm416_vm9, %v1646_v58, -inf  ;;  %v1321_v40 = vadd.f32 %v1317_v59, %v925_v38  ;;  %v5299_v59 = vld [vmem:[%s8532_s14 + $0x50] sm:$0xf] }
 0xa22   :  { %1650 = vmax.xlane.f32.xlu2 %v1649_v60  ;;  %v6411_v60 = vld [vmem:[%s8532_s14 + $0x54] sm:$0xf0] }
 0xa26   :  { %v1647_v61 = vpop.f32.mrf.mxu0 }
 0xa27   :  { %v6410_v61 = vld [vmem:[%s8532_s14 + $0x54] sm:$0xf] }
 0xa28   :  { %v1595_v62 = vpop.f32.mrf.mxu3 }
 0xa29   :  { %v1596_v63 = vadd.f32 %v7043_v37, %v1595_v62  ;;  %v5300_v62 = vor.u32 %v6411_v60, %v5299_v59 }
 0xa2b   :  { %v1599_v0 = vsel %vm416_vm9, %v1596_v63, -inf }
 0xa2c   :  { %1600 = vmax.xlane.f32.xlu1 %v1599_v0 }
 0xa30   :  { %v1597_v1 = vpop.f32.mrf.mxu3 }
 0xa31   :  { %v5291_v1 = vld [vmem:[%s8532_s14 + $0x40] sm:$0xf] }
 0xa95   :  { %v1651_v2 = vpop.xlane.xlu2 %1650 }
 0xa96   :  { %v1652_v7 = vsub.f32 %v1646_v58, %v1651_v2  ;;  %v5312_v58 = vor.u32 %v6412_v55, %v5309_v57  ;;  %v6409_v2 = vld [vmem:[%s8532_s14 + $0x44] sm:$0xf0] }
 0xa98   :  { %v1653_v22 = vmul.f32 1.442695, %v1652_v7  ;;  %1895 = vmatpush.bf16.msra.mxu0 %v5312_v58  ;;  %v6408_v7 = vld [vmem:[%s8532_s14 + $0x44] sm:$0xf]  ;;  %v6604_v58 = vld [vmem:[%s8531_s13] ss:$0 sm:$0xff] }
 0xa9a   :  { %6658 = vpow2.f32 %v1653_v22  ;;  %v5292_v22 = vor.u32 %v6409_v2, %v5291_v1 }
 0xa9f   :  { %v1601_v23 = vpop.xlane.xlu1 %1600 }
 0xaa0   :  { %v6659_v10 = vpop.eup %6658  ;;  %v1602_v11 = vsub.f32 %v1596_v63, %v1601_v23  ;;  %v5301_v63 = vld [vmem:[%s8532_s14 + $0x58] sm:$0xf0]  ;;  %v5293_v23 = vld [vmem:[%s8532_s14 + $0x48] sm:$0xf0] }
 0xaa1   :  { %v1655_v9 = vsel %vm416_vm9, %v6659_v10, 0.0  ;;  %v5304_v0 = vor.u32 %v6410_v61, %v5301_v63 }
 0xaa2   :  { %v1603_v12 = vmul.f32 1.442695, %v1602_v11  ;;  %1656 = vadd.xlane.f32.xlu1 %v1655_v9  ;;  %v5283_v11 = vld [vmem:[%s8532_s14 + $0x30] sm:$0xf]  ;;  %v6407_v9 = vld [vmem:[%s8532_s14 + $0x34] sm:$0xf0] }
 0xaa3   :  { %1896 = vmatpush.bf16.msra.mxu0 %v5304_v0 }
 0xaa4   :  { %6660 = vpow2.f32 %v1603_v12  ;;  %v6406_v12 = vld [vmem:[%s8532_s14 + $0x34] sm:$0xf] }
 0xaaa   :  { %v6661_v13 = vpop.eup %6660 }
 0xaab   :  { %v1605_v14 = vsel %vm416_vm9, %v6661_v13, 0.0 }
 0xaac   :  { %1606 = vadd.xlane.f32.xlu0 %v1605_v14  ;;  %v5285_v14 = vld [vmem:[%s8532_s14 + $0x38] sm:$0xf0] }
 0xb15   :  { %v1657_v37 = vpop.xlane.xlu1 %1656 }
 0xb16   :  { %6662 = vrcp.f32 %v1657_v37  ;;  %v5288_v37 = vor.u32 %v6406_v12, %v5285_v14 }
 0xb1c   :  { %v6663_v15 = vpop.eup %6662 }
 0xb1d   :  { %v1659_v16 = vmul.f32 %v6663_v15, %v6659_v10  ;;  %v5296_v10 = vor.u32 %v6408_v7, %v5293_v23  ;;  %v5275_v15 = vld [vmem:[%s8532_s14 + $0x20] sm:$0xf] }
 0xb1f   :  { %v1660_v17 = vpack.c.bf16 %v1659_v16, %v1659_v16  ;;  %v1607_v18 = vpop.xlane.xlu0 %1606  ;;  %1897 = vmatpush.bf16.msra.mxu0 %v5296_v10  ;;  %v6405_v16 = vld [vmem:[%s8532_s14 + $0x24] sm:$0xf0] }
 0xb20   :  { %6664 = vrcp.f32 %v1607_v18  ;;  %v5276_v18 = vor.u32 %v6405_v16, %v5275_v15  ;;  %v6430_v16 = vld [vmem:[%s8534_s16 + $0x70] sm:$0xff] }
 0xb21   :  { %5243 = vmatmul.msk.bf16.vlgmr.msrb.gmra.mxu1 %vm416_vm9, %v1660_v17  ;;  %v6404_v17 = vld [vmem:[%s8532_s14 + $0x24] sm:$0xf] }
 0xb23   :  { %1898 = vmatpush.bf16.msra.mxu0 %v5288_v37 }
 0xb26   :  { %v6665_v19 = vpop.eup %6664 }
 0xb27   :  { %v1609_v20 = vmul.f32 %v6665_v19, %v6661_v13  ;;  %v5284_v13 = vor.u32 %v6407_v9, %v5283_v11  ;;  %v5277_v19 = vld [vmem:[%s8532_s14 + $0x28] sm:$0xf0]  ;;  %v6431_v11 = vld [vmem:[%s8534_s16 + $0x78] sm:$0xff] }
 0xb28   :  { %2232 = vmatpush.bf16.msra.mxu2 %v6431_v11  ;;  %v6426_v11 = vld [vmem:[%s8534_s16 + $0x50] sm:$0xff] }
 0xb29   :  { %v1610_v21 = vpack.c.bf16 %v1609_v20, %v1609_v20  ;;  %v5280_v20 = vor.u32 %v6404_v17, %v5277_v19 }
 0xb2b   :  { %5241 = vmatmul.msk.bf16.vlgmr.msrb.gmra.mxu3 %vm416_vm9, %v1610_v21  ;;  %1899 = vmatpush.bf16.msra.mxu0 %v5280_v20  ;;  %v5267_v21 = vld [vmem:[%s8532_s14 + $0x10] sm:$0xf] }
 0xb2c   :  { %2233 = vmatpush.bf16.msra.mxu2 %v6430_v16 }
 0xb9e   :  { %v1676_v28 = vpop.f32.mrf.mxu1 }
 0xba6   :  { %v1678_v29 = vpop.f32.mrf.mxu1 }
 0xba7   :  { %v5269_v29 = vld [vmem:[%s8532_s14 + $0x18] sm:$0xf0] }
 0xbae   :  { %v1626_v30 = vpop.f32.mrf.mxu3 }
 0xbaf   :  { %v1680_v31 = vpack.c.bf16 %v1676_v28, %v1626_v30  ;;  %v5268_v28 = vor.u32 %v6403_v26, %v5267_v21  ;;  %v5259_v30 = vld [vmem:[%s8532_s14] sm:$0xf]  ;;  %v6423_v21 = vld [vmem:[%s8534_s16 + $0x38] sm:$0xff] }
 0xbb0   :  { %2218 = vmatpush.bf16.msra.mxu1 %v6423_v21 }
 0xbb1   :  { %5256 = vmatmul.msk.bf16.vlgmr.msrb.gmra.mxu2 %vm396_vm7, %v1680_v31  ;;  %v6401_v31 = vld [vmem:[%s8532_s14 + $0x4] sm:$0xf0] }
 0xbb2   :  { %v5260_v38 = vor.u32 %v6401_v31, %v5259_v30  ;;  %v6429_v31 = vld [vmem:[%s8534_s16 + $0x68] sm:$0xff] }
 0xbb3   :  { %2234 = vmatpush.bf16.msra.mxu2 %v6429_v31 }
 0xbb6   :  { %v1628_v32 = vpop.f32.mrf.mxu3 }
 0xc34   :  { %v1710_v34 = vpop.f32.mrf.mxu2 }
 0xc35   :  { %v1715_v35 = vadd.f32 %v1710_v34, %v1320_v56  ;;  %v5308_v56 = vor.u32 %v6413_v54, %v5307_v53  ;;  %v6400_v34 = vld [vmem:[%s8532_s14 + $0x4] sm:$0xf]  ;;  %v6603_v53 = vld [vmem:[%s8530_s12] ss:$0 sm:$0xff] }
 0xc37   :  { %v1721_v36 = vadd.f32 %v6602_v33, %v1715_v35  ;;  %v5261_v35 = vld [vmem:[%s8532_s14 + $0x8] sm:$0xf0] }
 0xc39   :  { %v1723_v39 = vadd.f32 %v1721_v36, %v6987_v3 }
 0xc3b   :  { %1727 = vadd.xlane.f32.xlu2 %v1723_v39 }
 0xc3c   :  { %v1712_v41 = vpop.f32.mrf.mxu2 }
 0xc3d   :  { %v1716_v43 = vadd.f32 %v1712_v41, %v1321_v40 }
 0xc3f   :  { %v1722_v44 = vadd.f32 %v6602_v33, %v1716_v43  ;;  %v5272_v33 = vor.u32 %v6402_v27, %v5269_v29 }
 0xc41   :  { %v1724_v45 = vadd.f32 %v1722_v44, %v6989_v4  ;;  %v5315_v4 = vld [vmem:[%s8532_s14 + $0x70] sm:$0xf]  ;;  %1900 = vmatpush.bf16.msra.mxu0 %v5272_v33 }
 0xc42   :  { %v5316_v50 = vor.u32 %v6415_v48, %v5315_v4 }
 0xc43   :  { %1729 = vadd.xlane.f32.xlu0 %v1724_v45 }
 0xc44   :  { %1880 = vmatpush.bf16.msra.mxu3 %v5316_v50 }
 0xc48   :  { %1881 = vmatpush.bf16.msra.mxu3 %v5308_v56 }
 0xc4c   :  { %1882 = vmatpush.bf16.msra.mxu3 %v5300_v62  ;;  %v1794_v62 = vld [vmem:[%s8533_s15] sm:$0x3] }
 0xc4d   :  { %v1796_v2 = vperm.slane %v1794_v62, 0 }
 0xc50   :  { %1883 = vmatpush.bf16.msra.mxu3 %v5292_v22 }
 0xc54   :  { %1884 = vmatpush.bf16.msra.mxu3 %v5284_v13 }
 0xc58   :  { %1885 = vmatpush.bf16.msra.mxu3 %v5276_v18 }
 0xc5c   :  { %1886 = vmatpush.bf16.msra.mxu3 %v5268_v28 }
 0xc60   :  { %1887 = vmatpush.bf16.msra.mxu3 %v5260_v38  ;;  %v6422_v38 = vld [vmem:[%s8534_s16 + $0x30] sm:$0xff] }
 0xc61   :  { %2219 = vmatpush.bf16.msra.mxu1 %v6422_v38  ;;  %v6418_v38 = vld [vmem:[%s8534_s16 + $0x10] sm:$0xff] }
 0xcae   :  { %v1728_v46 = vpop.xlane.xlu2 %1727 }
 0xcaf   :  { %v1731_v5 = vmul.f32 %v1728_v46, %v6893_v8 }
 0xcb1   :  { %v7385_v6 = vsub.f32 %v1723_v39, %v1731_v5  ;;  %v5264_v39 = vor.u32 %v6400_v34, %v5261_v35 }
 0xcb3   :  { %v1735_v42 = vmul.f32 %v7385_v6, %v7385_v6  ;;  %1901 = vmatpush.bf16.msra.mxu0 %v5264_v39 }
 0xcb5   :  { %1737 = vadd.xlane.f32.xlu1 %v1735_v42 }
 0xcb6   :  { %v1730_v24 = vpop.xlane.xlu0 %1729 }
 0xcb7   :  { %v1732_v3 = vmul.f32 %v1730_v24, %v6893_v8 }
 0xcb9   :  { %v7390_v25 = vsub.f32 %v1724_v45, %v1732_v3 }
 0xcbb   :  { %v1736_v47 = vmul.f32 %v7390_v25, %v7390_v25 }
 0xcbd   :  { %1739 = vadd.xlane.f32.xlu2 %v1736_v47 }
 0xd28   :  { %v1738_v32 = vpop.xlane.xlu1 %1737 }
 0xd29   :  { %v1741_v36 = vmul.f32 %v1738_v32, %v6893_v8 }
 0xd2b   :  { %v1743_v40 = vadd.f32 1e-12, %v1741_v36 }
 0xd2d   :  { %6666 = vrsqrt.f32 %v1743_v40  ;;  %vm1751_vm11 = vweird.f32 %v1743_v40 }
 0xd30   :  { %v1740_v41 = vpop.xlane.xlu2 %1739 }
 0xd31   :  { %v1742_v43 = vmul.f32 %v1740_v41, %v6893_v8 }
 0xd33   :  { %v6667_v44 = vpop.eup %6666  ;;  %v1744_v45 = vadd.f32 1e-12, %v1742_v43 }
 0xd34   :  { %v1746_v46 = vmul.f32 %v6667_v44, %v1743_v40  ;;  %vm1752_vm10 = vweird.f32 %v6667_v44 }
 0xd35   :  { %6668 = vrsqrt.f32 %v1744_v45  ;;  %vm1753_vm12 = vmor %vm1751_vm11, %vm1752_vm10  ;;  %vm1761_vm14 = vweird.f32 %v1744_v45 }
 0xd36   :  { %v1747_v5 = vmul.f32 %v6667_v44, %v1746_v46 }
 0xd38   :  { %v1748_v42 = vmul.f32 0.5, %v1747_v5 }
 0xd3a   :  { %v1749_v24 = vsub.f32 1.5, %v1748_v42  ;;  %v6428_v42 = vld [vmem:[%s8534_s16 + $0x60] sm:$0xff] }
 0xd3b   :  { %v6669_v3 = vpop.eup %6668  ;;  %2235 = vmatpush.bf16.msra.mxu2 %v6428_v42 }
 0xd3c   :  { %v1750_v47 = vmul.f32 %v6667_v44, %v1749_v24  ;;  %v1756_v4 = vmul.f32 %v6669_v3, %v1744_v45  ;;  %vm1762_vm13 = vweird.f32 %v6669_v3 }
 0xd3d   :  { %vm1763_vm15 = vmor %vm1761_vm14, %vm1762_vm13 }
 0xd3e   :  { %v1757_v48 = vmul.f32 %v6669_v3, %v1756_v4  ;;  %v1754_v49 = vsel %vm1753_vm12, %v6667_v44, %v1750_v47 }
 0xd3f   :  { %v1765_v52 = vmul.f32 %v1754_v49, %v7385_v6 }
 0xd40   :  { %v1758_v50 = vmul.f32 0.5, %v1757_v48  ;;  %v6421_v48 = vld [vmem:[%s8534_s16 + $0x28] sm:$0xff] }
 0xd41   :  { %v1770_v57 = vmul.f32 %v6603_v53, %v1765_v52  ;;  %2220 = vmatpush.bf16.msra.mxu1 %v6421_v48 }
 0xd42   :  { %v1759_v51 = vsub.f32 1.5, %v1758_v50 }
 0xd43   :  { %v7500_v60 = vadd.f32 %v6604_v58, %v1770_v57 }
 0xd44   :  { %v1760_v54 = vmul.f32 %v6669_v3, %v1759_v51 }
 0xd46   :  { %v1764_v55 = vsel %vm1763_vm15, %v6669_v3, %v1760_v54 }
 0xd47   :  { %v1766_v56 = vmul.f32 %v1764_v55, %v7390_v25  ;;  %v1797_v25 = vperm.slane %v1794_v62, 1  ;;  %v6420_v62 = vld [vmem:[%s8534_s16 + $0x20] sm:$0xff] }
 0xd48   :  { %2221 = vmatpush.bf16.msra.mxu1 %v6420_v62 }
 0xd49   :  { %v1771_v59 = vmul.f32 %v6603_v53, %v1766_v56  ;;  %v6427_v56 = vld [vmem:[%s8534_s16 + $0x58] sm:$0xff] }
 0xd4a   :  { %2236 = vmatpush.bf16.msra.mxu2 %v6427_v56 }
 0xd4b   :  { %v7502_v61 = vadd.f32 %v6604_v58, %v1771_v59 }
 0xd4d   :  { %v1777_v6 = vpack.c.bf16 %v7502_v61, %v7500_v60 }
 0xd4e   :  { %2237 = vmatpush.bf16.msra.mxu2 %v6426_v11 }
 0xd4f   :  { %1888 = vmatmul.bf16.vlgmr.msra.gmra.mxu3 %v1777_v6  ;;  %1902 = vmatmul.bf16.vlgmr.msra.gmra.mxu0 %v1777_v6 }
 0xdcc   :  { %v1903_v63 = vpop.f32.mrf.mxu0 }
 0xdcd   :  { %v7509_v0 = vadd.f32 %v1903_v63, %v1797_v25 }
 0xdcf   :  { %v7512_v1 = vmul.f32 0.70710677, %v7509_v0 }
 0xdd1   :  { %v1956_v7 = vmul.f32 %v7512_v1, %v7512_v1 }
 0xdd2   :  { %v1889_v22 = vpop.f32.mrf.mxu3 }
 0xdd3   :  { %v7516_v23 = vmin.f32 %v1956_v7, 16.0  ;;  %v7518_v10 = vadd.f32 %v1889_v22, %v1796_v2 }
 0xdd4   :  { %v1905_v9 = vpop.f32.mrf.mxu0 }
 0xdd5   :  { %v1958_v12 = vmul.f32 2.1237322e-06, %v7516_v23  ;;  %v1969_v13 = vmul.f32 3.8918573e-05, %v7516_v23  ;;  %v7525_v14 = vadd.f32 %v1905_v9, %v1797_v25  ;;  %v7528_v37 = vmul.f32 0.70710677, %v7518_v10 }
 0xdd7   :  { %v1970_v15 = vadd.f32 0.001143296, %v1969_v13  ;;  %v1959_v17 = vadd.f32 0.00028619796, %v1958_v12  ;;  %v1916_v18 = vmul.f32 %v7528_v37, %v7528_v37  ;;  %v7536_v19 = vmul.f32 0.70710677, %v7525_v14 }
 0xdd9   :  { %v1971_v20 = vmul.f32 %v1970_v15, %v7516_v23  ;;  %v7542_v26 = vmin.f32 %v1916_v18, 16.0  ;;  %v2036_v27 = vmul.f32 %v7536_v19, %v7536_v19  ;;  %v1960_v32 = vmul.f32 %v1959_v17, %v7516_v23  ;;  %v6419_v17 = vld [vmem:[%s8534_s16 + $0x18] sm:$0xff] }
 0xdda   :  { %v1891_v28 = vpop.f32.mrf.mxu3  ;;  %2222 = vmatpush.bf16.msra.mxu1 %v6419_v17 }
 0xddb   :  { %v1972_v29 = vadd.f32 0.014752088, %v1971_v20  ;;  %v7546_v30 = vadd.f32 %v1891_v28, %v1796_v2  ;;  %v1929_v33 = vmul.f32 3.8918573e-05, %v7542_v26  ;;  %v7553_v34 = vmin.f32 %v2036_v27, 16.0  ;;  %v6425_v27 = vld [vmem:[%s8534_s16 + $0x48] sm:$0xff] }
 0xddc   :  { %v1918_v39 = vmul.f32 2.1237322e-06, %v7542_v26  ;;  %v1961_v46 = vadd.f32 0.0036580483, %v1960_v32  ;;  %2238 = vmatpush.bf16.msra.mxu2 %v6425_v27 }
 0xddd   :  { %v1973_v35 = vmul.f32 %v1972_v29, %v7516_v23  ;;  %v7557_v36 = vmul.f32 0.70710677, %v7546_v30  ;;  %v1930_v40 = vadd.f32 0.001143296, %v1929_v33  ;;  %v2038_v41 = vmul.f32 2.1237322e-06, %v7553_v34 }
 0xdde   :  { %v2049_v44 = vmul.f32 3.8918573e-05, %v7553_v34  ;;  %v1919_v49 = vadd.f32 0.00028619796, %v1918_v39  ;;  %v1962_v57 = vmul.f32 %v1961_v46, %v7516_v23  ;;  %2223 = vmatpush.bf16.msra.mxu1 %v6418_v38 }
 0xddf   :  { %v1974_v43 = vadd.f32 0.112945676, %v1973_v35  ;;  %v1996_v45 = vmul.f32 %v7557_v36, %v7557_v36  ;;  %v1931_v5 = vmul.f32 %v1930_v40, %v7542_v26  ;;  %v2039_v3 = vadd.f32 0.00028619796, %v2038_v41 }
 0xde0   :  { %v2050_v47 = vadd.f32 0.001143296, %v2049_v44  ;;  %v1920_v25 = vmul.f32 %v1919_v49, %v7542_v26  ;;  %v1963_v13 = vadd.f32 0.05243302, %v1962_v57  ;;  %v6416_v57 = vld [vmem:[%s8534_s16] sm:$0xff] }
 0xde1   :  { %v1975_v24 = vmul.f32 %v1974_v43, %v7516_v23  ;;  %v7572_v4 = vmin.f32 %v1996_v45, 16.0  ;;  %v1932_v50 = vadd.f32 0.014752088, %v1931_v5  ;;  %v2040_v59 = vmul.f32 %v2039_v3, %v7553_v34  ;;  %v6424_v45 = vld [vmem:[%s8534_s16 + $0x40] sm:$0xff]  ;;  %v6417_v3 = vld [vmem:[%s8534_s16 + $0x8] sm:$0xff] }
 0xde2   :  { %v2051_v52 = vmul.f32 %v2050_v47, %v7553_v34  ;;  %v1921_v18 = vadd.f32 0.0036580483, %v1920_v25  ;;  %v1964_v31 = vmul.f32 %v1963_v13, %v7516_v23  ;;  %2239 = vmatpush.bf16.msra.mxu2 %v6424_v45  ;;  %2224 = vmatpush.bf16.msra.mxu1 %v6417_v3 }
 0xde3   :  { %v1976_v51 = vadd.f32 0.4994258, %v1975_v24  ;;  %v1933_v53 = vmul.f32 %v1932_v50, %v7542_v26  ;;  %v1998_v54 = vmul.f32 2.1237322e-06, %v7572_v4  ;;  %v2009_v55 = vmul.f32 3.8918573e-05, %v7572_v4 }
 0xde4   :  { %v2052_v6 = vadd.f32 0.014752088, %v2051_v52  ;;  %v2041_v15 = vadd.f32 0.0036580483, %v2040_v59  ;;  %v1922_v39 = vmul.f32 %v1921_v18, %v7542_v26  ;;  %v1965_v42 = vadd.f32 0.18741608, %v1964_v31 }
 0xde5   :  { %v1977_v58 = vmul.f32 %v1976_v51, %v7516_v23  ;;  %v1934_v63 = vadd.f32 0.112945676, %v1933_v53  ;;  %v2010_v2 = vadd.f32 0.001143296, %v2009_v55  ;;  %v1999_v12 = vadd.f32 0.00028619796, %v1998_v54 }
 0xde6   :  { %v2053_v22 = vmul.f32 %v2052_v6, %v7553_v34  ;;  %v2042_v32 = vmul.f32 %v2041_v15, %v7553_v34  ;;  %v1923_v48 = vadd.f32 0.05243302, %v1922_v39  ;;  %v1966_v55 = vmul.f32 %v1965_v42, %v7516_v23  ;;  %2225 = vmatpush.bf16.msra.mxu1 %v6416_v57 }
 0xde7   :  { %v7591_v7 = vadd.f32 1.0, %v1977_v58  ;;  %v1935_v9 = vmul.f32 %v1934_v63, %v7542_v26  ;;  %v2011_v16 = vmul.f32 %v2010_v2, %v7572_v4  ;;  %v2000_v29 = vmul.f32 %v1999_v12, %v7572_v4 }
 0xde8   :  { %v2054_v21 = vadd.f32 0.112945676, %v2053_v22  ;;  %v2043_v24 = vadd.f32 0.05243302, %v2042_v32  ;;  %v1924_v6 = vmul.f32 %v1923_v48, %v7542_v26 }
 0xde9   :  { %6670 = vrcp.f32 %v7591_v7  ;;  %v1936_v20 = vadd.f32 0.4994258, %v1935_v9  ;;  %v2012_v35 = vadd.f32 0.014752088, %v2011_v16  ;;  %v2001_v5 = vadd.f32 0.0036580483, %v2000_v29 }
 0xdea   :  { %v2055_v33 = vmul.f32 %v2054_v21, %v7553_v34  ;;  %v2044_v56 = vmul.f32 %v2043_v24, %v7553_v34  ;;  %v1990_v62 = vand.u32 2147483648, %v7591_v7  ;;  %vm1984_vm1 = vweird.f32 %v7591_v7 }
 0xdeb   :  { %v1937_v28 = vmul.f32 %v1936_v20, %v7542_v26  ;;  %v2013_v44 = vmul.f32 %v2012_v35, %v7572_v4  ;;  %v2002_v53 = vmul.f32 %v2001_v5, %v7572_v4  ;;  %v1988_v23 = vand.u32 2147483647, %v7591_v7 }
 0xdec   :  { %v2056_v43 = vadd.f32 0.4994258, %v2055_v33  ;;  %v2045_v11 = vadd.f32 0.18741608, %v2044_v56  ;;  %v1967_v9 = vadd.f32 1.1283791, %v1966_v55 }
 0xded   :  { %v7615_v40 = vadd.f32 1.0, %v1937_v28  ;;  %v2014_v50 = vadd.f32 0.112945676, %v2013_v44  ;;  %v2003_v63 = vadd.f32 0.05243302, %v2002_v53  ;;  %v1991_v16 = vor.u32 1.1754944e-38, %v1990_v62 }
 0xdee   :  { %v2057_v49 = vmul.f32 %v2056_v43, %v7553_v34  ;;  %v1925_v13 = vadd.f32 0.18741608, %v1924_v6  ;;  %vm1989_vm3 = vcmp.eq.f32.partialorder %v1988_v23, 8.507059e+37  ;;  %v1968_v29 = vmul.f32 %v1967_v9, %v7512_v1 }
 0xdef   :  { %v6671_v41 = vpop.eup %6670  ;;  %6672 = vrcp.f32 %v7615_v40  ;;  %v2015_v54 = vmul.f32 %v2014_v50, %v7572_v4  ;;  %v2004_v20 = vmul.f32 %v2003_v63, %v7572_v4  ;;  %vm1944_vm4 = vweird.f32 %v7615_v40 }
 0xdf0   :  { %v1980_v46 = vmul.f32 %v6671_v41, %v7591_v7  ;;  %v7627_v52 = vadd.f32 1.0, %v2057_v49  ;;  %vm1985_vm0 = vweird.f32 %v6671_v41  ;;  %v2046_v7 = vmul.f32 %v2045_v11, %v7553_v34 }
 0xdf1   :  { %v2016_v2 = vadd.f32 0.4994258, %v2015_v54  ;;  %vm1986_vm2 = vmor %vm1984_vm1, %vm1985_vm0  ;;  %v1926_v31 = vmul.f32 %v1925_v13, %v7542_v26  ;;  %v1948_v33 = vand.u32 2147483647, %v7615_v40  ;;  %v1950_v39 = vand.u32 2147483648, %v7615_v40 }
 0xdf2   :  { %v1981_v47 = vsub.f32 1.0, %v1980_v46  ;;  %6674 = vrcp.f32 %v7627_v52  ;;  %v2005_v34 = vadd.f32 0.18741608, %v2004_v20  ;;  %v2047_v43 = vadd.f32 1.1283791, %v2046_v7 }
 0xdf3   :  { %v2017_v15 = vmul.f32 %v2016_v2, %v7572_v4  ;;  %v2068_v1 = vand.u32 2147483647, %v7627_v52  ;;  %v1927_v26 = vadd.f32 1.1283791, %v1926_v31  ;;  %vm1949_vm11 = vcmp.eq.f32.partialorder %v1948_v33, 8.507059e+37 }
 0xdf4   :  { %v1982_v51 = vmul.f32 %v6671_v41, %v1981_v47  ;;  %vm2064_vm12 = vweird.f32 %v7627_v52  ;;  %v1951_v3 = vor.u32 1.1754944e-38, %v1950_v39  ;;  %v2006_v48 = vmul.f32 %v2005_v34, %v7572_v4  ;;  %v6605_v7 = vld [vmem:[%s8535_s17] ss:$0 sm:$0xff]  ;;  %v6454_v34 = vld [vmem:[%s8564_s4 + $0x130] sm:$0xff] }
 0xdf5   :  { %v6673_v58 = vpop.eup %6672  ;;  %v2018_v21 = vadd.f32 1.0, %v2017_v15  ;;  %vm2069_vm14 = vcmp.eq.f32.partialorder %v2068_v1, 8.507059e+37  ;;  %v1928_v54 = vmul.f32 %v1927_v26, %v7528_v37  ;;  %v1909_v4 = vmul.f32 0.5, %v7509_v0 }
 0xdf6   :  { %v1983_v59 = vadd.f32 %v6671_v41, %v1982_v51  ;;  %v1940_v25 = vmul.f32 %v6673_v58, %v7615_v40  ;;  %vm1945_vm5 = vweird.f32 %v6673_v58  ;;  %v2048_v40 = vmul.f32 %v2047_v43, %v7536_v19 }
 0xdf7   :  { %6676 = vrcp.f32 %v2018_v21  ;;  %vm7655_vm10 = vmor %vm1944_vm4, %vm1945_vm5  ;;  %v1911_v19 = vmul.f32 0.5, %v7525_v14  ;;  %vm2024_vm0 = vweird.f32 %v2018_v21  ;;  %v1908_v0 = vmul.f32 0.5, %v7518_v10 }
 0xdf8   :  { %v1941_v22 = vsub.f32 1.0, %v1940_v25  ;;  %v1987_v12 = vsel %vm1986_vm2, %v6671_v41, %v1983_v59  ;;  %v6675_v18 = vpop.eup %6674  ;;  %v2070_v41 = vand.u32 2147483648, %v7627_v52  ;;  %v2030_v59 = vand.u32 2147483648, %v2018_v21 }
 0xdf9   :  { %v1992_v27 = vsel %vm1989_vm3, %v1991_v16, %v1987_v12  ;;  %v2060_v28 = vmul.f32 %v6675_v18, %v7627_v52  ;;  %vm2065_vm6 = vweird.f32 %v6675_v18  ;;  %v2007_v52 = vadd.f32 1.1283791, %v2006_v48  ;;  %v6438_v48 = vld [vmem:[%s8562_s0 + $0x130] sm:$0xff] }
 0xdfa   :  { %v1942_v17 = vmul.f32 %v6673_v58, %v1941_v22  ;;  %v1993_v38 = vmul.f32 %v1992_v27, %v1968_v29  ;;  %vm2066_vm13 = vmor %vm2064_vm12, %vm2065_vm6  ;;  %v2071_v47 = vor.u32 1.1754944e-38, %v2070_v41  ;;  %v2031_v22 = vor.u32 1.1754944e-38, %v2030_v59  ;;  %v6455_v41 = vld [vmem:[%s8564_s4 + $0x138] sm:$0xff]  ;;  %v6434_v59 = vld [vmem:[%s8562_s0 + $0x110] sm:$0xff] }
 0xdfb   :  { %v2061_v35 = vsub.f32 1.0, %v2060_v28  ;;  %v2008_v37 = vmul.f32 %v2007_v52, %v7557_v36  ;;  %v1910_v14 = vmul.f32 0.5, %v7546_v30  ;;  %2539 = vmatpush.bf16.msrb.mxu1 %v6455_v41  ;;  %v6443_v52 = vld [vmem:[%s8563_s3 + $0x118] sm:$0xff] }
 0xdfc   :  { %v1943_v32 = vadd.f32 %v6673_v58, %v1942_v17  ;;  %v5322_v24 = vclamps-f32 %v1993_v38, 1.0 }
 0xdfd   :  { %v2062_v44 = vmul.f32 %v6675_v18, %v2061_v35  ;;  %v6677_v42 = vpop.eup %6676 }
 0xdfe   :  { %v1947_v46 = vsel %vm7655_vm10, %v6673_v58, %v1943_v32  ;;  %v2020_v50 = vmul.f32 %v6677_v42, %v2018_v21  ;;  %v2077_v57 = vadd.f32 1.0, %v5322_v24  ;;  %v2028_v58 = vand.u32 2147483647, %v2018_v21  ;;  %v6439_v24 = vld [vmem:[%s8562_s0 + $0x138] sm:$0xff] }
 0xdff   :  { %v2063_v5 = vadd.f32 %v6675_v18, %v2062_v44  ;;  %v1952_v51 = vsel %vm1949_vm11, %v1951_v3, %v1947_v46  ;;  %vm2025_vm15 = vweird.f32 %v6677_v42  ;;  %2540 = vmatpush.bf16.msrb.mxu1 %v6454_v34  ;;  %v6447_v3 = vld [vmem:[%s8563_s3 + $0x138] sm:$0xff]  ;;  %2371 = vmatpush.bf16.msrb.mxu3 %v6439_v24 }
 0xe00   :  { %v2021_v56 = vsub.f32 1.0, %v2020_v50  ;;  %v1953_v6 = vmul.f32 %v1952_v51, %v1928_v54  ;;  %v2081_v2 = vmul.f32 %v2077_v57, %v1909_v4  ;;  %vm2026_vm1 = vmor %vm2024_vm0, %vm2025_vm15  ;;  %vm2029_vm2 = vcmp.eq.f32.partialorder %v2028_v58, 8.507059e+37  ;;  %2455 = vmatpush.bf16.msrb.mxu0 %v6447_v3  ;;  %v6437_v50 = vld [vmem:[%s8562_s0 + $0x128] sm:$0xff]  ;;  %v6436_v54 = vld [vmem:[%s8562_s0 + $0x120] sm:$0xff] }
 0xe01   :  { %v2067_v49 = vsel %vm2066_vm13, %v6675_v18, %v2063_v5  ;;  %v6453_v5 = vld [vmem:[%s8564_s4 + $0x128] sm:$0xff]  ;;  %v6435_v57 = vld [vmem:[%s8562_s0 + $0x118] sm:$0xff]  ;;  %v6610_v3 = vld [vmem:[%s8568_s6 + $0x4] ss:$0 sm:$0xff] }
 0xe02   :  { %v2072_v53 = vsel %vm2069_vm14, %v2071_v47, %v2067_v49  ;;  %v2022_v25 = vmul.f32 %v6677_v42, %v2021_v56  ;;  %v5321_v11 = vclamps-f32 %v1953_v6, 1.0  ;;  %v6451_v47 = vld [vmem:[%s8564_s4 + $0x118] sm:$0xff]  ;;  %v6450_v49 = vld [vmem:[%s8564_s4 + $0x110] sm:$0xff]  ;;  %v6445_v51 = vld [vmem:[%s8563_s3 + $0x128] sm:$0xff] }
 0xe03   :  { %v2073_v55 = vmul.f32 %v2072_v53, %v2048_v40  ;;  %2541 = vmatpush.bf16.msrb.mxu1 %v6453_v5  ;;  %v6446_v40 = vld [vmem:[%s8563_s3 + $0x130] sm:$0xff]  ;;  %2372 = vmatpush.bf16.msrb.mxu3 %v6438_v48  ;;  %v6449_v53 = vld [vmem:[%s8564_s4 + $0x108] sm:$0xff]  ;;  %v6448_v56 = vld [vmem:[%s8564_s4 + $0x100] sm:$0xff] }
 0xe04   :  { %v2023_v63 = vadd.f32 %v6677_v42, %v2022_v25  ;;  %v2076_v17 = vadd.f32 1.0, %v5321_v11  ;;  %2456 = vmatpush.bf16.msrb.mxu0 %v6446_v40  ;;  %v6465_v58 = vld [vmem:[%s8562_s0 + $0x178] sm:$0xff]  ;;  %v6442_v6 = vld [vmem:[%s8563_s3 + $0x110] sm:$0xff]  ;;  %v6433_v25 = vld [vmem:[%s8562_s0 + $0x108] sm:$0xff] }
 0xe05   :  { %v5324_v62 = vclamps-f32 %v2073_v55, 1.0  ;;  %v6444_v55 = vld [vmem:[%s8563_s3 + $0x120] sm:$0xff]  ;;  %v6441_v4 = vld [vmem:[%s8563_s3 + $0x108] sm:$0xff] }
 0xe06   :  { %v2027_v12 = vsel %vm2026_vm1, %v6677_v42, %v2023_v63  ;;  %v2080_v21 = vmul.f32 %v2076_v17, %v1908_v0  ;;  %v6452_v42 = vld [vmem:[%s8564_s4 + $0x120] sm:$0xff] }
 0xe07   :  { %v2079_v23 = vadd.f32 1.0, %v5324_v62  ;;  %v2032_v13 = vsel %vm2029_vm2, %v2031_v22, %v2027_v12  ;;  %2542 = vmatpush.bf16.msrb.mxu1 %v6452_v42  ;;  %2373 = vmatpush.bf16.msrb.mxu3 %v6437_v50  ;;  %v6464_v62 = vld [vmem:[%s8562_s0 + $0x170] sm:$0xff]  ;;  %v6440_v22 = vld [vmem:[%s8563_s3 + $0x100] sm:$0xff] }
 0xe08   :  { %v2033_v16 = vmul.f32 %v2032_v13, %v2008_v37  ;;  %2457 = vmatpush.bf16.msrb.mxu0 %v6445_v51  ;;  %v6432_v37 = vld [vmem:[%s8562_s0 + $0x100] sm:$0xff] }
 0xe09   :  { %v2083_v9 = vmul.f32 %v2079_v23, %v1911_v19  ;;  %v6463_v19 = vld [vmem:[%s8562_s0 + $0x168] sm:$0xff]  ;;  %v6462_v11 = vld [vmem:[%s8562_s0 + $0x160] sm:$0xff] }
 0xe0a   :  { %v5323_v18 = vclamps-f32 %v2033_v16, 1.0 }
 0xe0b   :  { %v2085_v15 = vpack.c.bf16 %v2083_v9, %v2081_v2  ;;  %2543 = vmatpush.bf16.msrb.mxu1 %v6451_v47  ;;  %2374 = vmatpush.bf16.msrb.mxu3 %v6436_v54  ;;  %v6461_v9 = vld [vmem:[%s8562_s0 + $0x158] sm:$0xff] }
 0xe0c   :  { %v2078_v20 = vadd.f32 1.0, %v5323_v18  ;;  %2458 = vmatpush.bf16.msrb.mxu0 %v6444_v55 }
 0xe0d   :  { %2240 = vmatmul.bf16.vlgmr.msra.gmra.mxu2 %v2085_v15  ;;  %v6460_v15 = vld [vmem:[%s8562_s0 + $0x150] sm:$0xff] }
 0xe0e   :  { %v2082_v27 = vmul.f32 %v2078_v20, %v1910_v14  ;;  %v6459_v14 = vld [vmem:[%s8562_s0 + $0x148] sm:$0xff] }
 0xe0f   :  { %2544 = vmatpush.bf16.msrb.mxu1 %v6450_v49  ;;  %2375 = vmatpush.bf16.msrb.mxu3 %v6435_v57 }
 0xe10   :  { %v2084_v36 = vpack.c.bf16 %v2082_v27, %v2080_v21  ;;  %2459 = vmatpush.bf16.msrb.mxu0 %v6443_v52  ;;  %v6458_v27 = vld [vmem:[%s8562_s0 + $0x140] sm:$0xff]  ;;  %v6481_v52 = vld [vmem:[%s8564_s4 + $0x178] sm:$0xff] }
 0xe12   :  { %2226 = vmatmul.bf16.vlgmr.msra.gmra.mxu1 %v2084_v36 }
 0xe13   :  { %2545 = vmatpush.bf16.msrb.mxu1 %v6449_v53  ;;  %2376 = vmatpush.bf16.msrb.mxu3 %v6434_v59 }
 0xe14   :  { %2460 = vmatpush.bf16.msrb.mxu0 %v6442_v6 }
 0xe17   :  { %2546 = vmatpush.bf16.msrb.mxu1 %v6448_v56  ;;  %2377 = vmatpush.bf16.msrb.mxu3 %v6433_v25 }
 0xe18   :  { %2461 = vmatpush.bf16.msrb.mxu0 %v6441_v4  ;;  %v6480_v4 = vld [vmem:[%s8564_s4 + $0x170] sm:$0xff] }
 0xe1b   :  { %2735 = vmatpush.bf16.msra.mxu1 %v6465_v58  ;;  %2378 = vmatpush.bf16.msrb.mxu3 %v6432_v37  ;;  %v6476_v37 = vld [vmem:[%s8564_s4 + $0x150] sm:$0xff] }
 0xe1c   :  { %2462 = vmatpush.bf16.msrb.mxu0 %v6440_v22  ;;  %v6475_v22 = vld [vmem:[%s8564_s4 + $0x148] sm:$0xff] }
 0xe1f   :  { %2736 = vmatpush.bf16.msra.mxu1 %v6464_v62 }
 0xe23   :  { %2737 = vmatpush.bf16.msra.mxu1 %v6463_v19 }
 0xe27   :  { %2738 = vmatpush.bf16.msra.mxu1 %v6462_v11  ;;  %v6474_v11 = vld [vmem:[%s8564_s4 + $0x140] sm:$0xff] }
 0xe2b   :  { %2739 = vmatpush.bf16.msra.mxu1 %v6461_v9 }
 0xe2f   :  { %2740 = vmatpush.bf16.msra.mxu1 %v6460_v15 }
 0xe33   :  { %2741 = vmatpush.bf16.msra.mxu1 %v6459_v14 }
 0xe37   :  { %2742 = vmatpush.bf16.msra.mxu1 %v6458_v27 }
 0xe8f   :  { %v2227_v28 = vpop.f32.mrf.mxu1 }
 0xe90   :  { %v2241_v29 = vpop.f32.mrf.mxu2  ;;  %v2228_v31 = vadd.f32 %v6605_v7, %v2227_v28 }
 0xe92   :  { %v2242_v32 = vadd.f32 %v2241_v29, %v2228_v31 }
 0xe94   :  { %v2246_v33 = vadd.f32 %v2242_v32, %v7500_v60 }
 0xe96   :  { %2250 = vadd.xlane.f32.xlu0 %v2246_v33 }
 0xe97   :  { %v2229_v35 = vpop.f32.mrf.mxu1 }
 0xe98   :  { %v2230_v10 = vadd.f32 %v6605_v7, %v2229_v35  ;;  %v2243_v38 = vpop.f32.mrf.mxu2  ;;  %v6606_v35 = vld [vmem:[%s8536_s18] ss:$0 sm:$0xff] }
 0xe9a   :  { %v2244_v30 = vadd.f32 %v2243_v38, %v2230_v10 }
 0xe9c   :  { %v2247_v39 = vadd.f32 %v2244_v30, %v7502_v61 }
 0xe9e   :  { %2252 = vadd.xlane.f32.xlu1 %v2247_v39 }
 0xf09   :  { %v2251_v43 = vpop.xlane.xlu0 %2250 }
 0xf0a   :  { %v2254_v60 = vmul.f32 %v2251_v43, %v6893_v8 }
 0xf0c   :  { %v7682_v44 = vsub.f32 %v2246_v33, %v2254_v60 }
 0xf0e   :  { %v2258_v1 = vmul.f32 %v7682_v44, %v7682_v44 }
 0xf10   :  { %2260 = vadd.xlane.f32.xlu2 %v2258_v1 }
 0xf11   :  { %v2253_v61 = vpop.xlane.xlu1 %2252 }
 0xf12   :  { %v2255_v26 = vmul.f32 %v2253_v61, %v6893_v8 }
 0xf14   :  { %v7687_v45 = vsub.f32 %v2247_v39, %v2255_v26  ;;  %v6607_v39 = vld [vmem:[%s8537_s19] ss:$0 sm:$0xff]  ;;  %v6609_v26 = vld [vmem:[%s8527_s9 + $0x4] ss:$0 sm:$0xff] }
 0xf16   :  { %v2259_v46 = vmul.f32 %v7687_v45, %v7687_v45 }
 0xf18   :  { %2262 = vadd.xlane.f32.xlu0 %v2259_v46 }
 0xf83   :  { %v2261_v23 = vpop.xlane.xlu2 %2260 }
 0xf84   :  { %v2264_v63 = vmul.f32 %v2261_v23, %v6893_v8  ;;  %v6479_v23 = vld [vmem:[%s8564_s4 + $0x168] sm:$0xff] }
 0xf86   :  { %v2266_v2 = vadd.f32 1e-12, %v2264_v63  ;;  %v6478_v63 = vld [vmem:[%s8564_s4 + $0x160] sm:$0xff] }
 0xf88   :  { %6678 = vrsqrt.f32 %v2266_v2  ;;  %vm2274_vm4 = vweird.f32 %v2266_v2 }
 0xf8b   :  { %v2263_v12 = vpop.xlane.xlu0 %2262 }
 0xf8c   :  { %v2265_v13 = vmul.f32 %v2263_v12, %v6893_v8  ;;  %v7846_v12 = vld [vmem:[%s8569_s2] ss:$0 sm:$0xff] }
 0xf8e   :  { %v6679_v16 = vpop.eup %6678  ;;  %v2267_v17 = vadd.f32 1e-12, %v2265_v13 }
 0xf8f   :  { %v2269_v18 = vmul.f32 %v6679_v16, %v2266_v2  ;;  %vm2275_vm3 = vweird.f32 %v6679_v16  ;;  %v6477_v2 = vld [vmem:[%s8564_s4 + $0x158] sm:$0xff] }
 0xf90   :  { %6680 = vrsqrt.f32 %v2267_v17  ;;  %vm2276_vm5 = vmor %vm2274_vm4, %vm2275_vm3  ;;  %vm2284_vm10 = vweird.f32 %v2267_v17 }
 0xf91   :  { %v2270_v0 = vmul.f32 %v6679_v16, %v2269_v18  ;;  %v7853_v18 = vld [vmem:[%s8569_s2 + $0x1] ss:$0 sm:$0xff] }
 0xf93   :  { %v2271_v20 = vmul.f32 0.5, %v2270_v0 }
 0xf95   :  { %v2272_v21 = vsub.f32 1.5, %v2271_v20 }
 0xf96   :  { %v6681_v36 = vpop.eup %6680 }
 0xf97   :  { %v2273_v7 = vmul.f32 %v6679_v16, %v2272_v21  ;;  %v2279_v28 = vmul.f32 %v6681_v36, %v2267_v17  ;;  %vm2285_vm6 = vweird.f32 %v6681_v36  ;;  %v6612_v21 = vld [vmem:[%s8527_s9 + $0x5] ss:$0 sm:$0xff] }
 0xf98   :  { %vm2286_vm11 = vmor %vm2284_vm10, %vm2285_vm6 }
 0xf99   :  { %v2280_v29 = vmul.f32 %v6681_v36, %v2279_v28  ;;  %v2277_v31 = vsel %vm2276_vm5, %v6679_v16, %v2273_v7  ;;  %v6473_v7 = vld [vmem:[%s8563_s3 + $0x178] sm:$0xff]  ;;  %v6472_v28 = vld [vmem:[%s8563_s3 + $0x170] sm:$0xff] }
 0xf9a   :  { %v2288_v10 = vmul.f32 %v2277_v31, %v7682_v44  ;;  %v6608_v44 = vld [vmem:[%s8567_s26 + $0x4] ss:$0 sm:$0xff] }
 0xf9b   :  { %v2281_v32 = vmul.f32 0.5, %v2280_v29  ;;  %v6471_v29 = vld [vmem:[%s8563_s3 + $0x168] sm:$0xff]  ;;  %v6470_v31 = vld [vmem:[%s8563_s3 + $0x160] sm:$0xff] }
 0xf9c   :  { %v2293_v41 = vmul.f32 %v6606_v35, %v2288_v10  ;;  %v6469_v10 = vld [vmem:[%s8563_s3 + $0x158] sm:$0xff] }
 0xf9d   :  { %v2282_v33 = vsub.f32 1.5, %v2281_v32 }
 0xf9e   :  { %v7791_v60 = vadd.f32 %v6607_v39, %v2293_v41 }
 0xf9f   :  { %v2283_v38 = vmul.f32 %v6681_v36, %v2282_v33 }
 0xfa1   :  { %v2287_v30 = vsel %vm2286_vm11, %v6681_v36, %v2283_v38 }
 0xfa2   :  { %v2289_v34 = vmul.f32 %v2287_v30, %v7687_v45 }
 0xfa4   :  { %v2294_v43 = vmul.f32 %v6606_v35, %v2289_v34 }
 0xfa6   :  { %v7793_v1 = vadd.f32 %v6607_v39, %v2294_v43 }
 0xfa8   :  { %v7797_v61 = vpack.c.bf16 %v7793_v1, %v7791_v60 }
 0xfaa   :  { %2379 = vmatmul.bf16.vlgmr.msrb.gmra.mxu3 %v7797_v61  ;;  %2463 = vmatmul.bf16.vlgmr.msrb.gmra.mxu0 %v7797_v61 }
 0xfab   :  { %2547 = vmatmul.bf16.vlgmr.msrb.gmra.mxu1 %v7797_v61 }
 0xfbb   :  { %2743 = vmatmul.bf16.vlgmr.msra.gmra.mxu1 %v7797_v61 }
0x1027   :  { %v2464_v45 = vpop.f32.mrf.mxu0 }
0x1028   :  { %v2465_v46 = vadd.f32 %v6608_v44, %v2464_v45  ;;  %v2548_v5 = vpop.f32.mrf.mxu1  ;;  %v6467_v45 = vld [vmem:[%s8563_s3 + $0x148] sm:$0xff] }
0x1029   :  { %v2549_v42 = vadd.f32 %v6609_v26, %v2548_v5 }
0x102a   :  { %v2555_v24 = vpack.c.bf16 %v2465_v46, %v2465_v46  ;;  %v6466_v46 = vld [vmem:[%s8563_s3 + $0x140] sm:$0xff] }
0x102b   :  { %v2557_v47 = vpack.c.bf16 %v2549_v42, %v2549_v42 }
0x102c   :  { %v2563_v48 = vsel %vm396_vm7, %v2555_v24, 0 }
0x102d   :  { %v2594_v40 = vsel %vm432_vm8, %v2557_v47, 0  ;;  %v2380_v49 = vpop.f32.mrf.mxu3  ;;  %2572 = vmatpush.bf16.xpose.msrb.mxu2 %v2563_v48 }
0x102e   :  { %v2381_v50 = vadd.f32 %v6610_v3, %v2380_v49 }
0x102f   :  { %v2466_v51 = vpop.f32.mrf.mxu0 }
0x1030   :  { %v2467_v53 = vadd.f32 %v6608_v44, %v2466_v51  ;;  %v2550_v54 = vpop.f32.mrf.mxu1  ;;  %v2553_v56 = vpack.c.bf16 %v2381_v50, %v2381_v50 }
0x1031   :  { %v2551_v55 = vadd.f32 %v6609_v26, %v2550_v54  ;;  %v6468_v26 = vld [vmem:[%s8563_s3 + $0x150] sm:$0xff] }
0x1032   :  { %v2556_v57 = vpack.c.bf16 %v2467_v53, %v2467_v53 }
0x1033   :  { %v2558_v58 = vpack.c.bf16 %v2551_v55, %v2551_v55 }
0x1034   :  { %v2613_v59 = vsel %vm396_vm7, %v2556_v57, 0  ;;  %5536 = vmatmul.msk.bf16.vlgmr.msrb.gmra.mxu2 %vm396_vm7, %v2553_v56 }
0x1035   :  { %2603 = vmatpush.bf16.msra.mxu2 %v2594_v40  ;;  %v2644_v6 = vsel %vm432_vm8, %v2558_v58, 0  ;;  %v2382_v62 = vpop.f32.mrf.mxu3  ;;  %2622 = vmatpush.bf16.xpose.msra.mxu3 %v2613_v59  ;;  %v6613_v59 = vld [vmem:[%s8567_s26 + $0x5] ss:$0 sm:$0xff] }
0x1036   :  { %v2383_v25 = vadd.f32 %v6610_v3, %v2382_v62  ;;  %2653 = vmatpush.bf16.msra.mxu0 %v2644_v6 }
0x1038   :  { %v2554_v19 = vpack.c.bf16 %v2383_v25, %v2383_v25  ;;  %v2744_v25 = vpop.f32.mrf.mxu1 }
0x1039   :  { %2819 = vmatpush.bf16.msrb.mxu2 %v6473_v7  ;;  %v6486_v7 = vld [vmem:[%s8562_s0 + $0x190] sm:$0xff] }
0x103c   :  { %5538 = vmatmul.msk.bf16.vlgmr.msra.gmra.mxu3 %vm396_vm7, %v2554_v19  ;;  %v6611_v19 = vld [vmem:[%s8568_s6 + $0x5] ss:$0 sm:$0xff] }
0x103d   :  { %2903 = vmatpush.bf16.msrb.mxu3 %v6481_v52  ;;  %2820 = vmatpush.bf16.msrb.mxu2 %v6472_v28  ;;  %v6485_v28 = vld [vmem:[%s8562_s0 + $0x188] sm:$0xff] }
0x1041   :  { %2904 = vmatpush.bf16.msrb.mxu3 %v6480_v4  ;;  %2821 = vmatpush.bf16.msrb.mxu2 %v6471_v29  ;;  %v6484_v29 = vld [vmem:[%s8562_s0 + $0x180] sm:$0xff] }
0x1045   :  { %2905 = vmatpush.bf16.msrb.mxu3 %v6479_v23  ;;  %2822 = vmatpush.bf16.msrb.mxu2 %v6470_v31 }
0x1049   :  { %2906 = vmatpush.bf16.msrb.mxu3 %v6478_v63  ;;  %2823 = vmatpush.bf16.msrb.mxu2 %v6469_v10 }
0x104d   :  { %2907 = vmatpush.bf16.msrb.mxu3 %v6477_v2  ;;  %2824 = vmatpush.bf16.msrb.mxu2 %v6468_v26 }
0x1051   :  { %2908 = vmatpush.bf16.msrb.mxu3 %v6476_v37  ;;  %2825 = vmatpush.bf16.msrb.mxu2 %v6467_v45  ;;  %v2745_v37 = vadd.f32 %v6611_v19, %v2744_v25 }
0x1055   :  { %2909 = vmatpush.bf16.msrb.mxu3 %v6475_v22  ;;  %2826 = vmatpush.bf16.msrb.mxu2 %v6466_v46 }
0x1059   :  { %2910 = vmatpush.bf16.msrb.mxu3 %v6474_v11 }
0x105c   :  { %2911 = vmatmul.bf16.vlgmr.msrb.gmra.mxu3 %v7797_v61 }
0x10b7   :  { %v2574_v9 = vpop.f32.mrf.mxu2 }
0x10b8   :  { %v2575_v13 = vadd.f32 %v7846_v12, %v2574_v9  ;;  %v2917_v9 = vpack.c.bf16 %v2745_v37, %v2745_v37  ;;  %v6507_v37 = vld [vmem:[%s8564_s4 + $0x1b8] sm:$0xff] }
0x10ba   :  { %v2578_v15 = vsel %vm416_vm9, %v2575_v13, -inf }
0x10bb   :  { %2579 = vmax.xlane.f32.xlu1 %v2578_v15  ;;  %v6491_v15 = vld [vmem:[%s8562_s0 + $0x1b8] sm:$0xff] }
0x10bf   :  { %v2576_v16 = vpop.f32.mrf.mxu2  ;;  %v2624_v17 = vpop.f32.mrf.mxu3 }
0x10c0   :  { %v2625_v0 = vadd.f32 %v7853_v18, %v2624_v17  ;;  %v2746_v16 = vpop.f32.mrf.mxu1 }
0x10c2   :  { %v2628_v14 = vsel %vm416_vm9, %v2625_v0, -inf }
0x10c3   :  { %2629 = vmax.xlane.f32.xlu0 %v2628_v14  ;;  %v6490_v14 = vld [vmem:[%s8562_s0 + $0x1b0] sm:$0xff] }
0x10c7   :  { %v2626_v20 = vpop.f32.mrf.mxu3 }
0x10df   :  { %v2912_v27 = vpop.f32.mrf.mxu3 }
0x10e0   :  { %v7860_v36 = vadd.f32 %v6612_v21, %v2912_v27  ;;  %v6488_v27 = vld [vmem:[%s8562_s0 + $0x1a0] sm:$0xff] }
0x10e2   :  { %v2921_v4 = vpack.c.bf16 %v7860_v36, %v7860_v36  ;;  %v6487_v36 = vld [vmem:[%s8562_s0 + $0x198] sm:$0xff] }
0x10e4   :  { %v2958_v2 = vsel %vm432_vm8, %v2921_v4, 0 }
0x10e7   :  { %v2914_v42 = vpop.f32.mrf.mxu3 }
0x10e8   :  { %v2915_v24 = vadd.f32 %v6612_v21, %v2914_v42  ;;  %v6489_v21 = vld [vmem:[%s8562_s0 + $0x1a8] sm:$0xff] }
0x10ea   :  { %v2922_v47 = vpack.c.bf16 %v2915_v24, %v2915_v24 }
0x10ec   :  { %v3008_v50 = vsel %vm432_vm8, %v2922_v47, 0  ;;  %v6498_v47 = vld [vmem:[%s8563_s3 + $0x1b0] sm:$0xff] }
0x112e   :  { %v2580_v32 = vpop.xlane.xlu1 %2579 }
0x112f   :  { %v2581_v33 = vsub.f32 %v2575_v13, %v2580_v32 }
0x1131   :  { %v2582_v35 = vmul.f32 1.442695, %v2581_v33 }
0x1133   :  { %6682 = vpow2.f32 %v2582_v35 }
0x1136   :  { %v2630_v38 = vpop.xlane.xlu0 %2629 }
0x1137   :  { %v2631_v30 = vsub.f32 %v2625_v0, %v2630_v38  ;;  %v2747_v0 = vadd.f32 %v6611_v19, %v2746_v16 }
0x1139   :  { %v6683_v39 = vpop.eup %6682  ;;  %v2632_v41 = vmul.f32 1.442695, %v2631_v30  ;;  %v2918_v20 = vpack.c.bf16 %v2747_v0, %v2747_v0 }
0x113a   :  { %v2584_v34 = vsel %vm416_vm9, %v6683_v39, 0.0 }
0x113b   :  { %6684 = vpow2.f32 %v2632_v41  ;;  %2585 = vadd.xlane.f32.xlu2 %v2584_v34 }
0x1141   :  { %v6685_v43 = vpop.eup %6684 }
0x1142   :  { %v2634_v44 = vsel %vm416_vm9, %v6685_v43, 0.0 }
0x1143   :  { %2635 = vadd.xlane.f32.xlu1 %v2634_v44 }
0x11ae   :  { %v2586_v5 = vpop.xlane.xlu2 %2585 }
0x11af   :  { %6686 = vrcp.f32 %v2586_v5 }
0x11b5   :  { %v6687_v3 = vpop.eup %6686 }
0x11b6   :  { %v2588_v48 = vmul.f32 %v6687_v3, %v6683_v39  ;;  %v2636_v40 = vpop.xlane.xlu1 %2635  ;;  %v6499_v3 = vld [vmem:[%s8563_s3 + $0x1b8] sm:$0xff] }
0x11b7   :  { %6688 = vrcp.f32 %v2636_v40  ;;  %v6496_v40 = vld [vmem:[%s8563_s3 + $0x1a0] sm:$0xff] }
0x11b8   :  { %v2589_v49 = vpack.c.bf16 %v2588_v48, %v2588_v48  ;;  %v6497_v48 = vld [vmem:[%s8563_s3 + $0x1a8] sm:$0xff] }
0x11ba   :  { %5537 = vmatmul.msk.bf16.vlgmr.msra.gmra.mxu2 %vm416_vm9, %v2589_v49  ;;  %v6457_v49 = vld [vmem:[%s8528_s10 + $0x48] sm:$0xff] }
0x11bb   :  { %3017 = vmatpush.bf16.msra.mxu2 %v3008_v50  ;;  %v6495_v50 = vld [vmem:[%s8563_s3 + $0x198] sm:$0xff] }
0x11bd   :  { %v6689_v51 = vpop.eup %6688 }
0x11be   :  { %v2638_v53 = vmul.f32 %v6689_v51, %v6685_v43  ;;  %v6456_v51 = vld [vmem:[%s8528_s10 + $0x40] sm:$0xff] }
0x11c0   :  { %v2639_v54 = vpack.c.bf16 %v2638_v53, %v2638_v53  ;;  %v6494_v53 = vld [vmem:[%s8563_s3 + $0x190] sm:$0xff] }
0x11c2   :  { %5539 = vmatmul.msk.bf16.vlgmr.msra.gmra.mxu0 %vm416_vm9, %v2639_v54  ;;  %v6493_v54 = vld [vmem:[%s8563_s3 + $0x188] sm:$0xff] }
0x11ca   :  { %2827 = vmatmul.bf16.vlgmr.msrb.gmra.mxu2 %v7797_v61 }
0x11cb   :  { %3241 = vmatpush.bf16.msrb.mxu2 %v6499_v3 }
0x11cf   :  { %3242 = vmatpush.bf16.msrb.mxu2 %v6498_v47 }
0x11d3   :  { %3243 = vmatpush.bf16.msrb.mxu2 %v6497_v48 }
0x11d7   :  { %3244 = vmatpush.bf16.msrb.mxu2 %v6496_v40 }
0x11db   :  { %3245 = vmatpush.bf16.msrb.mxu2 %v6495_v50 }
0x11df   :  { %3246 = vmatpush.bf16.msrb.mxu2 %v6494_v53 }
0x11e3   :  { %3247 = vmatpush.bf16.msrb.mxu2 %v6493_v54 }
0x123d   :  { %v7892_v55 = vpop.f32.mrf.mxu2 }
0x123f   :  { %v7894_v56 = vpop.f32.mrf.mxu0 }
0x1240   :  { %v2659_v57 = vpack.c.bf16 %v7894_v56, %v7892_v55  ;;  %v6505_v55 = vld [vmem:[%s8564_s4 + $0x1a8] sm:$0xff]  ;;  %v6504_v56 = vld [vmem:[%s8564_s4 + $0x1a0] sm:$0xff] }
0x1245   :  { %v2607_v52 = vpop.f32.mrf.mxu2 }
0x1246   :  { %v6492_v52 = vld [vmem:[%s8563_s3 + $0x180] sm:$0xff] }
0x1247   :  { %v2657_v58 = vpop.f32.mrf.mxu0  ;;  %3248 = vmatpush.bf16.msrb.mxu2 %v6492_v52 }
0x124d   :  { %v2828_v6 = vpop.f32.mrf.mxu2 }
0x124e   :  { %v2829_v62 = vadd.f32 %v6613_v59, %v2828_v6 }
0x1250   :  { %v2919_v23 = vpack.c.bf16 %v2829_v62, %v2829_v62 }
0x1252   :  { %v2927_v63 = vsel %vm396_vm7, %v2919_v23, 0 }
0x1253   :  { %2936 = vmatpush.bf16.xpose.msrb.mxu0 %v2927_v63 }
0x1255   :  { %v2830_v22 = vpop.f32.mrf.mxu2 }
0x1256   :  { %v2831_v11 = vadd.f32 %v6613_v59, %v2830_v22  ;;  %v6483_v59 = vld [vmem:[%s8528_s10 + $0x58] sm:$0xff]  ;;  %v6506_v22 = vld [vmem:[%s8564_s4 + $0x1b0] sm:$0xff] }
0x1257   :  { %3050 = vmatpush.bf16.msra.mxu3 %v6483_v59  ;;  %v6509_v59 = vld [vmem:[%s8528_s10 + $0x68] sm:$0xff] }
0x1258   :  { %v2920_v13 = vpack.c.bf16 %v2831_v11, %v2831_v11  ;;  %v6502_v11 = vld [vmem:[%s8564_s4 + $0x190] sm:$0xff] }
0x125a   :  { %v2977_v17 = vsel %vm396_vm7, %v2920_v13, 0  ;;  %5691 = vmatmul.msk.bf16.vlgmr.msrb.gmra.mxu0 %vm396_vm7, %v2917_v9  ;;  %v6501_v9 = vld [vmem:[%s8564_s4 + $0x188] sm:$0xff]  ;;  %v6500_v13 = vld [vmem:[%s8564_s4 + $0x180] sm:$0xff] }
0x125b   :  { %2967 = vmatpush.bf16.msra.mxu0 %v2958_v2  ;;  %2986 = vmatpush.bf16.xpose.msrb.mxu1 %v2977_v17  ;;  %v6482_v2 = vld [vmem:[%s8528_s10 + $0x50] sm:$0xff] }
0x125c   :  { %3051 = vmatpush.bf16.msra.mxu3 %v6482_v2 }
0x125f   :  { %3079 = vmatpush.bf16.msrb.mxu0 %v6457_v49  ;;  %v6616_v49 = vld [vmem:[%s8527_s9 + $0x6] ss:$0 sm:$0xff] }
0x1260   :  { %3325 = vmatpush.bf16.msrb.mxu3 %v6507_v37 }
0x1262   :  { %5693 = vmatmul.msk.bf16.vlgmr.msrb.gmra.mxu1 %vm396_vm7, %v2918_v20  ;;  %v6615_v20 = vld [vmem:[%s8567_s26 + $0x6] ss:$0 sm:$0xff] }
0x1263   :  { %3157 = vmatpush.bf16.msra.mxu1 %v6491_v15  ;;  %3080 = vmatpush.bf16.msrb.mxu0 %v6456_v51 }
0x1264   :  { %3326 = vmatpush.bf16.msrb.mxu3 %v6506_v22 }
0x1267   :  { %3158 = vmatpush.bf16.msra.mxu1 %v6490_v14 }
0x1268   :  { %3327 = vmatpush.bf16.msrb.mxu3 %v6505_v55 }
0x126b   :  { %3159 = vmatpush.bf16.msra.mxu1 %v6489_v21 }
0x126c   :  { %3328 = vmatpush.bf16.msrb.mxu3 %v6504_v56  ;;  %v6617_v56 = vld [vmem:[%s8567_s26 + $0x7] ss:$0 sm:$0xff] }
0x126f   :  { %3160 = vmatpush.bf16.msra.mxu1 %v6488_v27 }
0x1273   :  { %3161 = vmatpush.bf16.msra.mxu1 %v6487_v36 }
0x1277   :  { %3162 = vmatpush.bf16.msra.mxu1 %v6486_v7  ;;  %v6614_v7 = vld [vmem:[%s8568_s6 + $0x6] ss:$0 sm:$0xff] }
0x127b   :  { %3163 = vmatpush.bf16.msra.mxu1 %v6485_v28 }
0x127f   :  { %3164 = vmatpush.bf16.msra.mxu1 %v6484_v29 }
0x1282   :  { %3165 = vmatmul.bf16.vlgmr.msra.gmra.mxu1 %v7797_v61 }
0x12d7   :  { %v2938_v31 = vpop.f32.mrf.mxu0 }
0x12d8   :  { %v2939_v32 = vadd.f32 %v7846_v12, %v2938_v31 }
0x12da   :  { %v2942_v33 = vsel %vm416_vm9, %v2939_v32, -inf }
0x12db   :  { %2943 = vmax.xlane.f32.xlu1 %v2942_v33 }
0x12df   :  { %v2940_v35 = vpop.f32.mrf.mxu0  ;;  %v2988_v10 = vpop.f32.mrf.mxu1 }
0x12e0   :  { %v2989_v38 = vadd.f32 %v7853_v18, %v2988_v10 }
0x12e2   :  { %v2992_v30 = vsel %vm416_vm9, %v2989_v38, -inf }
0x12e3   :  { %2993 = vmax.xlane.f32.xlu2 %v2992_v30 }
0x12e7   :  { %v2990_v39 = vpop.f32.mrf.mxu1 }
0x12ff   :  { %v3166_v36 = vpop.f32.mrf.mxu1 }
0x1300   :  { %v3167_v31 = vadd.f32 %v6614_v7, %v3166_v36 }
0x1302   :  { %v3339_v35 = vpack.c.bf16 %v3167_v31, %v3167_v31 }
0x1307   :  { %v3168_v30 = vpop.f32.mrf.mxu1 }
0x134e   :  { %v2944_v41 = vpop.xlane.xlu1 %2943 }
0x134f   :  { %v2945_v34 = vsub.f32 %v2939_v32, %v2944_v41  ;;  %v3169_v41 = vadd.f32 %v6614_v7, %v3168_v30  ;;  %v6532_v30 = vld [vmem:[%s8564_s4 + $0x1f0] sm:$0xff] }
0x1351   :  { %v2946_v43 = vmul.f32 1.442695, %v2945_v34  ;;  %v6524_v34 = vld [vmem:[%s8563_s3 + $0x1f0] sm:$0xff] }
0x1353   :  { %6690 = vpow2.f32 %v2946_v43  ;;  %v3340_v43 = vpack.c.bf16 %v3169_v41, %v3169_v41  ;;  %v6531_v41 = vld [vmem:[%s8564_s4 + $0x1e8] sm:$0xff] }
0x1356   :  { %v2994_v44 = vpop.xlane.xlu2 %2993 }
0x1357   :  { %v2995_v26 = vsub.f32 %v2989_v38, %v2994_v44  ;;  %v6525_v38 = vld [vmem:[%s8563_s3 + $0x1f8] sm:$0xff]  ;;  %v6523_v44 = vld [vmem:[%s8563_s3 + $0x1e8] sm:$0xff] }
0x1359   :  { %v6691_v45 = vpop.eup %6690  ;;  %v2996_v46 = vmul.f32 1.442695, %v2995_v26  ;;  %v6522_v26 = vld [vmem:[%s8563_s3 + $0x1e0] sm:$0xff] }
0x135a   :  { %v2948_v5 = vsel %vm416_vm9, %v6691_v45, 0.0 }
0x135b   :  { %6692 = vpow2.f32 %v2996_v46  ;;  %2949 = vadd.xlane.f32.xlu2 %v2948_v5  ;;  %v6520_v46 = vld [vmem:[%s8563_s3 + $0x1d0] sm:$0xff]  ;;  %v6519_v5 = vld [vmem:[%s8563_s3 + $0x1c8] sm:$0xff] }
0x1361   :  { %v6693_v42 = vpop.eup %6692 }
0x1362   :  { %v2998_v24 = vsel %vm416_vm9, %v6693_v42, 0.0 }
0x1363   :  { %2999 = vadd.xlane.f32.xlu0 %v2998_v24 }
0x13ce   :  { %v2950_v58 = vpop.xlane.xlu2 %2949 }
0x13cf   :  { %6694 = vrcp.f32 %v2950_v58 }
0x13d5   :  { %v6695_v6 = vpop.eup %6694 }
0x13d6   :  { %v2952_v62 = vmul.f32 %v6695_v6, %v6691_v45  ;;  %v3000_v25 = vpop.xlane.xlu0 %2999  ;;  %v6521_v45 = vld [vmem:[%s8563_s3 + $0x1d8] sm:$0xff] }
0x13d7   :  { %6696 = vrcp.f32 %v3000_v25 }
0x13d8   :  { %v2953_v4 = vpack.c.bf16 %v2952_v62, %v2952_v62 }
0x13da   :  { %5692 = vmatmul.msk.bf16.vlgmr.msra.gmra.mxu0 %vm416_vm9, %v2953_v4  ;;  %v6508_v4 = vld [vmem:[%s8528_s10 + $0x60] sm:$0xff] }
0x13dd   :  { %v6697_v19 = vpop.eup %6696 }
0x13de   :  { %v3002_v23 = vmul.f32 %v6697_v19, %v6693_v42  ;;  %v6518_v42 = vld [vmem:[%s8563_s3 + $0x1c0] sm:$0xff] }
0x13e0   :  { %v3003_v63 = vpack.c.bf16 %v3002_v23, %v3002_v23 }
0x13e2   :  { %5694 = vmatmul.msk.bf16.vlgmr.msra.gmra.mxu2 %vm416_vm9, %v3003_v63 }
0x13ea   :  { %5716 = vmatmul.msk.bf16.vlgmr.msrb.gmra.mxu0 %vm396_vm7, %v2659_v57  ;;  %v6503_v57 = vld [vmem:[%s8564_s4 + $0x198] sm:$0xff] }
0x13eb   :  { %3329 = vmatpush.bf16.msrb.mxu3 %v6503_v57 }
0x13ef   :  { %3330 = vmatpush.bf16.msrb.mxu3 %v6502_v11 }
0x13f2   :  { %3249 = vmatmul.bf16.vlgmr.msrb.gmra.mxu2 %v7797_v61 }
0x13f3   :  { %3331 = vmatpush.bf16.msrb.mxu3 %v6501_v9 }
0x13f7   :  { %3332 = vmatpush.bf16.msrb.mxu3 %v6500_v13 }
0x1457   :  { %v2969_v15 = vpop.f32.mrf.mxu0 }
0x145f   :  { %v2971_v16 = vpop.f32.mrf.mxu0 }
0x1460   :  { %v6516_v16 = vld [vmem:[%s8562_s0 + $0x1f0] sm:$0xff] }
0x1465   :  { %v3019_v17 = vpop.f32.mrf.mxu2 }
0x1466   :  { %v3023_v0 = vpack.c.bf16 %v3019_v17, %v2969_v15  ;;  %v6517_v15 = vld [vmem:[%s8562_s0 + $0x1f8] sm:$0xff]  ;;  %v6515_v17 = vld [vmem:[%s8562_s0 + $0x1e8] sm:$0xff] }
0x1467   :  { %v8046_v24 = vpop.f32.mrf.mxu0 }
0x1468   :  { %5707 = vmatmul.msk.bf16.vlgmr.msra.gmra.mxu3 %vm396_vm7, %v3023_v0  ;;  %v6514_v0 = vld [vmem:[%s8562_s0 + $0x1e0] sm:$0xff] }
0x1469   :  { %3472 = vmatpush.bf16.msra.mxu3 %v6509_v59 }
0x146d   :  { %v3021_v14 = vpop.f32.mrf.mxu2  ;;  %3473 = vmatpush.bf16.msra.mxu3 %v6508_v4 }
0x146f   :  { %v3084_v47 = vpop.f32.mrf.mxu0 }
0x1475   :  { %v3250_v21 = vpop.f32.mrf.mxu2 }
0x1476   :  { %v3251_v27 = vadd.f32 %v6615_v20, %v3250_v21 }
0x1478   :  { %v3341_v28 = vpack.c.bf16 %v3251_v27, %v3251_v27  ;;  %3333 = vmatmul.bf16.vlgmr.msrb.gmra.mxu3 %v7797_v61  ;;  %v6513_v27 = vld [vmem:[%s8562_s0 + $0x1d8] sm:$0xff] }
0x147a   :  { %v3349_v29 = vsel %vm396_vm7, %v3341_v28, 0 }
0x147b   :  { %3358 = vmatpush.bf16.xpose.msra.mxu0 %v3349_v29 }
0x147d   :  { %v3252_v32 = vpop.f32.mrf.mxu2 }
0x147e   :  { %v3253_v33 = vadd.f32 %v6615_v20, %v3252_v32 }
0x1480   :  { %v3342_v10 = vpack.c.bf16 %v3253_v33, %v3253_v33 }
0x1482   :  { %v3399_v39 = vsel %vm396_vm7, %v3342_v10, 0  ;;  %5864 = vmatmul.msk.bf16.vlgmr.msra.gmra.mxu0 %vm396_vm7, %v3339_v35  ;;  %v6512_v35 = vld [vmem:[%s8562_s0 + $0x1d0] sm:$0xff]  ;;  %v6533_v10 = vld [vmem:[%s8564_s4 + $0x1f8] sm:$0xff] }
0x1483   :  { %3408 = vmatpush.bf16.xpose.msrb.mxu1 %v3399_v39  ;;  %v6510_v39 = vld [vmem:[%s8562_s0 + $0x1c0] sm:$0xff] }
0x148a   :  { %5866 = vmatmul.msk.bf16.vlgmr.msrb.gmra.mxu1 %vm396_vm7, %v3340_v43  ;;  %v6529_v43 = vld [vmem:[%s8564_s4 + $0x1d8] sm:$0xff] }
0x148b   :  { %3636 = vmatpush.bf16.msra.mxu1 %v6525_v38  ;;  %v6511_v38 = vld [vmem:[%s8562_s0 + $0x1c8] sm:$0xff]  ;;  %s4645_s0 = sshll.u32 %s6761_s28, 4  ;;  %s4646_s0 = int_to_ptr.vmem [resolvable:$true] %s4645_s0 }
0x148f   :  { %3637 = vmatpush.bf16.msra.mxu1 %v6524_v34  ;;  %v6530_v34 = vld [vmem:[%s8564_s4 + $0x1e0] sm:$0xff] }
0x1493   :  { %3638 = vmatpush.bf16.msra.mxu1 %v6523_v44  ;;  %v6528_v44 = vld [vmem:[%s8564_s4 + $0x1d0] sm:$0xff] }
0x1497   :  { %3639 = vmatpush.bf16.msra.mxu1 %v6522_v26  ;;  %v6527_v26 = vld [vmem:[%s8564_s4 + $0x1c8] sm:$0xff] }
0x149b   :  { %3640 = vmatpush.bf16.msra.mxu1 %v6521_v45  ;;  %v6526_v45 = vld [vmem:[%s8564_s4 + $0x1c0] sm:$0xff] }
0x149f   :  { %3641 = vmatpush.bf16.msra.mxu1 %v6520_v46 }
0x14a3   :  { %3642 = vmatpush.bf16.msra.mxu1 %v6519_v5 }
0x14a7   :  { %3643 = vmatpush.bf16.msra.mxu1 %v6518_v42 }
0x14aa   :  { %3644 = vmatmul.bf16.vlgmr.msra.gmra.mxu1 %v7797_v61 }
0x14eb   :  { %v8048_v3 = vpop.f32.mrf.mxu3 }
0x14f3   :  { %v3055_v48 = vpop.f32.mrf.mxu3 }
0x14f4   :  { %v8050_v40 = vadd.f32 %v3084_v47, %v3055_v48 }
0x14fb   :  { %v3334_v50 = vpop.f32.mrf.mxu3 }
0x14fc   :  { %v3335_v51 = vadd.f32 %v6616_v49, %v3334_v50 }
0x14fe   :  { %v3343_v53 = vpack.c.bf16 %v3335_v51, %v3335_v51 }
0x14ff   :  { %v3360_v54 = vpop.f32.mrf.mxu0 }
0x1500   :  { %v3380_v52 = vsel %vm432_vm8, %v3343_v53, 0  ;;  %v3361_v58 = vadd.f32 %v7846_v12, %v3360_v54 }
0x1501   :  { %3389 = vmatpush.bf16.msrb.mxu0 %v3380_v52 }
0x1502   :  { %v3364_v6 = vsel %vm416_vm9, %v3361_v58, -inf }
0x1503   :  { %v3336_v62 = vpop.f32.mrf.mxu3  ;;  %3365 = vmax.xlane.f32.xlu1 %v3364_v6 }
0x1504   :  { %v3337_v25 = vadd.f32 %v6616_v49, %v3336_v62 }
0x1505   :  { %3552 = vmatpush.bf16.msra.mxu0 %v6517_v15 }
0x1506   :  { %v3344_v19 = vpack.c.bf16 %v3337_v25, %v3337_v25 }
0x1507   :  { %v3362_v23 = vpop.f32.mrf.mxu0  ;;  %v3410_v63 = vpop.f32.mrf.mxu1 }
0x1508   :  { %v3430_v2 = vsel %vm432_vm8, %v3344_v19, 0  ;;  %v3411_v37 = vadd.f32 %v7853_v18, %v3410_v63  ;;  %v6618_v23 = vld [vmem:[%s8568_s6 + $0x7] ss:$0 sm:$0xff] }
0x1509   :  { %3439 = vmatpush.bf16.msra.mxu2 %v3430_v2  ;;  %3553 = vmatpush.bf16.msra.mxu0 %v6516_v16 }
0x150a   :  { %v3414_v22 = vsel %vm416_vm9, %v3411_v37, -inf }
0x150b   :  { %3415 = vmax.xlane.f32.xlu0 %v3414_v22 }
0x150d   :  { %3554 = vmatpush.bf16.msra.mxu0 %v6515_v17  ;;  %3720 = vmatpush.bf16.msrb.mxu2 %v6533_v10 }
0x150f   :  { %v3412_v55 = vpop.f32.mrf.mxu1 }
0x1511   :  { %3555 = vmatpush.bf16.msra.mxu0 %v6514_v0  ;;  %3721 = vmatpush.bf16.msrb.mxu2 %v6532_v30  ;;  %v3083_v0 = vadd.f32 %v8046_v24, %v8048_v3 }
0x1515   :  { %3556 = vmatpush.bf16.msra.mxu0 %v6513_v27  ;;  %3722 = vmatpush.bf16.msrb.mxu2 %v6531_v41 }
0x1519   :  { %3557 = vmatpush.bf16.msra.mxu0 %v6512_v35  ;;  %3723 = vmatpush.bf16.msrb.mxu2 %v6530_v34 }
0x151d   :  { %3558 = vmatpush.bf16.msra.mxu0 %v6511_v38  ;;  %3724 = vmatpush.bf16.msrb.mxu2 %v6529_v43 }
0x1521   :  { %3559 = vmatpush.bf16.msra.mxu0 %v6510_v39  ;;  %3725 = vmatpush.bf16.msrb.mxu2 %v6528_v44 }
0x1525   :  { %3726 = vmatpush.bf16.msrb.mxu2 %v6527_v26 }
0x1527   :  { %v3645_v57 = vpop.f32.mrf.mxu1 }
0x1528   :  { %v3646_v11 = vadd.f32 %v6617_v56, %v3645_v57 }
0x1529   :  { %3727 = vmatpush.bf16.msrb.mxu2 %v6526_v45 }
0x152a   :  { %v3736_v9 = vpack.c.bf16 %v3646_v11, %v3646_v11 }
0x152c   :  { %v3744_v13 = vsel %vm396_vm7, %v3736_v9, 0 }
0x152d   :  { %3753 = vmatpush.bf16.xpose.msrb.mxu3 %v3744_v13 }
0x152f   :  { %v3647_v5 = vpop.f32.mrf.mxu1 }
0x1530   :  { %v3648_v42 = vadd.f32 %v6617_v56, %v3647_v5 }
0x1532   :  { %v3737_v48 = vpack.c.bf16 %v3648_v42, %v3648_v42 }
0x1534   :  { %v3794_v53 = vsel %vm396_vm7, %v3737_v48, 0  ;;  %v6534_v48 = vld [vmem:[%s8528_s10 + $0x70] sm:$0xff] }
0x1576   :  { %v3366_v14 = vpop.xlane.xlu1 %3365 }
0x1577   :  { %v3367_v20 = vsub.f32 %v3361_v58, %v3366_v14 }
0x1579   :  { %v3368_v21 = vmul.f32 1.442695, %v3367_v20 }
0x157b   :  { %6698 = vpow2.f32 %v3368_v21 }
0x157e   :  { %v3416_v36 = vpop.xlane.xlu0 %3415 }
0x157f   :  { %v3417_v7 = vsub.f32 %v3411_v37, %v3416_v36 }
0x1581   :  { %v6699_v28 = vpop.eup %6698  ;;  %v3418_v29 = vmul.f32 1.442695, %v3417_v7 }
0x1582   :  { %v3370_v31 = vsel %vm416_vm9, %v6699_v28, 0.0 }
0x1583   :  { %6700 = vpow2.f32 %v3418_v29  ;;  %3371 = vadd.xlane.f32.xlu0 %v3370_v31 }
0x1589   :  { %v6701_v32 = vpop.eup %6700 }
0x158a   :  { %v3420_v33 = vsel %vm416_vm9, %v6701_v32, 0.0 }
0x158b   :  { %3421 = vadd.xlane.f32.xlu2 %v3420_v33 }
0x15f6   :  { %v3372_v46 = vpop.xlane.xlu0 %3371 }
0x15f7   :  { %6702 = vrcp.f32 %v3372_v46 }
0x15fd   :  { %v6703_v47 = vpop.eup %6702 }
0x15fe   :  { %v3374_v49 = vmul.f32 %v6703_v47, %v6699_v28  ;;  %v3422_v50 = vpop.xlane.xlu2 %3421  ;;  %v6535_v47 = vld [vmem:[%s8528_s10 + $0x78] sm:$0xff] }
0x15ff   :  { %6704 = vrcp.f32 %v3422_v50 }
0x1600   :  { %v3375_v51 = vpack.c.bf16 %v3374_v49, %v3374_v49 }
0x1602   :  { %5865 = vmatmul.msk.bf16.vlgmr.msrb.gmra.mxu0 %vm416_vm9, %v3375_v51 }
0x1603   :  { %3803 = vmatpush.bf16.xpose.msrb.mxu0 %v3794_v53 }
0x1605   :  { %v6705_v54 = vpop.eup %6704 }
0x1606   :  { %v3424_v52 = vmul.f32 %v6705_v54, %v6701_v32 }
0x1608   :  { %v3425_v58 = vpack.c.bf16 %v3424_v52, %v3424_v52  ;;  %v6620_v52 = vld [vmem:[%s8529_s11 + $0x1] ss:$0 sm:$0xff] }
0x160a   :  { %5867 = vmatmul.msk.bf16.vlgmr.msra.gmra.mxu2 %vm416_vm9, %v3425_v58 }
0x160b   :  { %3867 = vmatpush.bf16.msra.mxu2 %v6535_v47 }
0x160f   :  { %3868 = vmatpush.bf16.msra.mxu2 %v6534_v48  ;;  %v6077_v48 = vld [vmem:[%s8532_s14 + $0x98] sm:$0xf0] }
0x1612   :  { %3560 = vmatmul.bf16.vlgmr.msra.gmra.mxu0 %v7797_v61 }
0x161a   :  { %3728 = vmatmul.bf16.vlgmr.msrb.gmra.mxu2 %v7797_v61  ;;  %v6619_v61 = vld [vmem:[%s8527_s9 + $0x7] ss:$0 sm:$0xff] }
0x167f   :  { %v3391_v59 = vpop.f32.mrf.mxu0 }
0x1687   :  { %v3393_v6 = vpop.f32.mrf.mxu0 }
0x168d   :  { %v3441_v62 = vpop.f32.mrf.mxu2 }
0x168e   :  { %v3445_v25 = vpack.c.bf16 %v3441_v62, %v3391_v59 }
0x168f   :  { %v3561_v4 = vpop.f32.mrf.mxu0 }
0x1690   :  { %5880 = vmatmul.msk.bf16.vlgmr.msra.gmra.mxu3 %vm396_vm7, %v3445_v25  ;;  %v3562_v37 = vadd.f32 %v6618_v23, %v3561_v4 }
0x1692   :  { %v3734_v56 = vpack.c.bf16 %v3562_v37, %v3562_v37 }
0x1695   :  { %v3443_v19 = vpop.f32.mrf.mxu2 }
0x1697   :  { %v3563_v63 = vpop.f32.mrf.mxu0 }
0x1698   :  { %v3564_v2 = vadd.f32 %v6618_v23, %v3563_v63 }
0x169a   :  { %v3735_v22 = vpack.c.bf16 %v3564_v2, %v3564_v2 }
0x169c   :  { %6030 = vmatmul.msk.bf16.vlgmr.msrb.gmra.mxu0 %vm396_vm7, %v3735_v22 }
0x169d   :  { %v3729_v55 = vpop.f32.mrf.mxu2 }
0x169e   :  { %v3730_v57 = vadd.f32 %v6619_v61, %v3729_v55 }
0x16a0   :  { %v3738_v11 = vpack.c.bf16 %v3730_v57, %v3730_v57  ;;  %6028 = vmatmul.msk.bf16.vlgmr.msrb.gmra.mxu3 %vm396_vm7, %v3734_v56  ;;  %v6551_v57 = vld [vmem:[%s8532_s14 + $0xf4] sm:$0xf0] }
0x16a2   :  { %v3775_v9 = vsel %vm432_vm8, %v3738_v11, 0  ;;  %v6550_v11 = vld [vmem:[%s8532_s14 + $0xf4] sm:$0xf] }
0x16a3   :  { %3784 = vmatpush.bf16.msra.mxu3 %v3775_v9 }
0x16a5   :  { %v3731_v13 = vpop.f32.mrf.mxu2 }
0x16a6   :  { %v3732_v15 = vadd.f32 %v6619_v61, %v3731_v13  ;;  %v6125_v13 = vld [vmem:[%s8532_s14 + $0xf8] sm:$0xf0] }
0x16a8   :  { %v3739_v16 = vpack.c.bf16 %v3732_v15, %v3732_v15  ;;  %v6128_v15 = vor.u32 %v6550_v11, %v6125_v13 }
0x16aa   :  { %v3825_v17 = vsel %vm432_vm8, %v3739_v16, 0  ;;  %4059 = vmatpush.bf16.msra.mxu0 %v6128_v15  ;;  %v6115_v16 = vld [vmem:[%s8532_s14 + $0xe0] sm:$0xf] }
0x16ab   :  { %3834 = vmatpush.bf16.msrb.mxu1 %v3825_v17  ;;  %v6549_v17 = vld [vmem:[%s8532_s14 + $0xe4] sm:$0xf0]  ;;  %v6621_v15 = vld [vmem:[%s8530_s12 + $0x1] ss:$0 sm:$0xff] }
0x1713   :  { %v3475_v14 = vpop.f32.mrf.mxu3 }
0x1714   :  { %v3480_v20 = vadd.f32 %v3475_v14, %v3083_v0  ;;  %v6548_v0 = vld [vmem:[%s8532_s14 + $0xe4] sm:$0xf]  ;;  %v6116_v14 = vor.u32 %v6549_v17, %v6115_v16 }
0x1719   :  { %v3805_v21 = vpop.f32.mrf.mxu0 }
0x171a   :  { %v3806_v27 = vadd.f32 %v7853_v18, %v3805_v21 }
0x171b   :  { %v3477_v36 = vpop.f32.mrf.mxu3 }
0x171c   :  { %v3481_v7 = vadd.f32 %v3477_v36, %v8050_v40  ;;  %v3809_v28 = vsel %vm416_vm9, %v3806_v27, -inf  ;;  %v6547_v36 = vld [vmem:[%s8532_s14 + $0xd4] sm:$0xf0] }
0x171d   :  { %3810 = vmax.xlane.f32.xlu2 %v3809_v28 }
0x1721   :  { %v3807_v29 = vpop.f32.mrf.mxu0 }
0x1722   :  { %v6109_v29 = vld [vmem:[%s8532_s14 + $0xd8] sm:$0xf0] }
0x1723   :  { %v3755_v31 = vpop.f32.mrf.mxu3 }
0x1724   :  { %v3756_v32 = vadd.f32 %v7846_v12, %v3755_v31 }
0x1726   :  { %v3759_v33 = vsel %vm416_vm9, %v3756_v32, -inf }
0x1727   :  { %3760 = vmax.xlane.f32.xlu1 %v3759_v33  ;;  %v6545_v33 = vld [vmem:[%s8532_s14 + $0xc4] sm:$0xf0] }
0x172b   :  { %v3757_v35 = vpop.f32.mrf.mxu3 }
0x172c   :  { %v6544_v35 = vld [vmem:[%s8532_s14 + $0xc4] sm:$0xf] }
0x1790   :  { %v3811_v24 = vpop.xlane.xlu2 %3810 }
0x1791   :  { %v3812_v3 = vsub.f32 %v3806_v27, %v3811_v24  ;;  %v6107_v27 = vld [vmem:[%s8532_s14 + $0xd0] sm:$0xf] }
0x1792   :  { %v6108_v28 = vor.u32 %v6547_v36, %v6107_v27 }
0x1793   :  { %v3813_v10 = vmul.f32 1.442695, %v3812_v3  ;;  %v6101_v3 = vld [vmem:[%s8532_s14 + $0xc8] sm:$0xf0] }
0x1795   :  { %6706 = vpow2.f32 %v3813_v10  ;;  %v6104_v10 = vor.u32 %v6544_v35, %v6101_v3 }
0x179a   :  { %v3761_v38 = vpop.xlane.xlu1 %3760 }
0x179b   :  { %v6707_v18 = vpop.eup %6706  ;;  %v3762_v30 = vsub.f32 %v3756_v32, %v3761_v38  ;;  %v6099_v32 = vld [vmem:[%s8532_s14 + $0xc0] sm:$0xf]  ;;  %v6091_v38 = vld [vmem:[%s8532_s14 + $0xb0] sm:$0xf] }
0x179c   :  { %v3815_v40 = vsel %vm416_vm9, %v6707_v18, 0.0  ;;  %v6100_v24 = vor.u32 %v6545_v33, %v6099_v32 }
0x179d   :  { %v3763_v39 = vmul.f32 1.442695, %v3762_v30  ;;  %3816 = vadd.xlane.f32.xlu1 %v3815_v40  ;;  %v6542_v30 = vld [vmem:[%s8532_s14 + $0xb4] sm:$0xf] }
0x179f   :  { %6708 = vpow2.f32 %v3763_v39  ;;  %v6093_v39 = vld [vmem:[%s8532_s14 + $0xb8] sm:$0xf0] }
0x17a5   :  { %v6709_v41 = vpop.eup %6708 }
0x17a6   :  { %v3765_v34 = vsel %vm416_vm9, %v6709_v41, 0.0 }
0x17a7   :  { %3766 = vadd.xlane.f32.xlu0 %v3765_v34  ;;  %v6083_v34 = vld [vmem:[%s8532_s14 + $0xa0] sm:$0xf] }
0x1810   :  { %v3817_v12 = vpop.xlane.xlu1 %3816 }
0x1811   :  { %6710 = vrcp.f32 %v3817_v12  ;;  %v6541_v12 = vld [vmem:[%s8532_s14 + $0xa4] sm:$0xf0] }
0x1817   :  { %v6711_v43 = vpop.eup %6710 }
0x1818   :  { %v3819_v44 = vmul.f32 %v6711_v43, %v6707_v18  ;;  %v6543_v18 = vld [vmem:[%s8532_s14 + $0xb4] sm:$0xf0]  ;;  %v6540_v43 = vld [vmem:[%s8532_s14 + $0xa4] sm:$0xf] }
0x1819   :  { %v6092_v40 = vor.u32 %v6543_v18, %v6091_v38  ;;  %v6567_v38 = vld [vmem:[%s8534_s16 + $0xf8] sm:$0xff] }
0x181a   :  { %v3820_v26 = vpack.c.bf16 %v3819_v44, %v3819_v44  ;;  %v3767_v45 = vpop.xlane.xlu0 %3766  ;;  %v6084_v44 = vor.u32 %v6541_v12, %v6083_v34  ;;  %4399 = vmatpush.bf16.msrb.mxu2 %v6567_v38  ;;  %v6566_v12 = vld [vmem:[%s8534_s16 + $0xf0] sm:$0xff] }
0x181b   :  { %6712 = vrcp.f32 %v3767_v45  ;;  %v6562_v38 = vld [vmem:[%s8534_s16 + $0xd0] sm:$0xff] }
0x181c   :  { %6031 = vmatmul.msk.bf16.vlgmr.msrb.gmra.mxu1 %vm416_vm9, %v3820_v26  ;;  %v6085_v26 = vld [vmem:[%s8532_s14 + $0xa8] sm:$0xf0] }
0x181d   :  { %v6088_v45 = vor.u32 %v6540_v43, %v6085_v26 }
0x181e   :  { %4400 = vmatpush.bf16.msrb.mxu2 %v6566_v12 }
0x1821   :  { %v6713_v46 = vpop.eup %6712 }
0x1822   :  { %v3769_v5 = vmul.f32 %v6713_v46, %v6709_v41  ;;  %v6096_v41 = vor.u32 %v6542_v30, %v6093_v39  ;;  %v6075_v46 = vld [vmem:[%s8532_s14 + $0x90] sm:$0xf] }
0x1824   :  { %v3770_v42 = vpack.c.bf16 %v3769_v5, %v3769_v5  ;;  %v6539_v5 = vld [vmem:[%s8532_s14 + $0x94] sm:$0xf0] }
0x1825   :  { %v6076_v47 = vor.u32 %v6539_v5, %v6075_v46  ;;  %v6559_v46 = vld [vmem:[%s8534_s16 + $0xb8] sm:$0xff] }
0x1826   :  { %6029 = vmatmul.msk.bf16.vlgmr.msra.gmra.mxu3 %vm416_vm9, %v3770_v42  ;;  %v6538_v42 = vld [vmem:[%s8532_s14 + $0x94] sm:$0xf]  ;;  %4385 = vmatpush.bf16.msra.mxu1 %v6559_v46 }
0x1899   :  { %v3836_v49 = vpop.f32.mrf.mxu1 }
0x18a1   :  { %v3838_v50 = vpop.f32.mrf.mxu1 }
0x18a2   :  { %v6080_v50 = vor.u32 %v6538_v42, %v6077_v48 }
0x18a9   :  { %v3786_v51 = vpop.f32.mrf.mxu3 }
0x18aa   :  { %v3840_v53 = vpack.c.bf16 %v3836_v49, %v3786_v51 }
0x18ac   :  { %6044 = vmatmul.msk.bf16.vlgmr.msra.gmra.mxu2 %vm396_vm7, %v3840_v53  ;;  %v6067_v53 = vld [vmem:[%s8532_s14 + $0x80] sm:$0xf] }
0x18b1   :  { %v3788_v54 = vpop.f32.mrf.mxu3 }
0x18b2   :  { %v6537_v54 = vld [vmem:[%s8532_s14 + $0x84] sm:$0xf0] }
0x192f   :  { %v3870_v58 = vpop.f32.mrf.mxu2 }
0x1930   :  { %v3875_v59 = vadd.f32 %v3870_v58, %v3480_v20  ;;  %v6117_v20 = vld [vmem:[%s8532_s14 + $0xe8] sm:$0xf0] }
0x1931   :  { %v6120_v21 = vor.u32 %v6548_v0, %v6117_v20 }
0x1932   :  { %v3882_v6 = vadd.f32 %v6620_v52, %v3875_v59  ;;  %v6068_v59 = vor.u32 %v6537_v54, %v6067_v53 }
0x1933   :  { %4060 = vmatpush.bf16.msra.mxu0 %v6120_v21 }
0x1934   :  { %v3884_v62 = vadd.f32 %v3882_v6, %v7791_v60  ;;  %v6069_v6 = vld [vmem:[%s8532_s14 + $0x88] sm:$0xf0] }
0x1936   :  { %3890 = vadd.xlane.f32.xlu2 %v3884_v62 }
0x1937   :  { %v3872_v25 = vpop.f32.mrf.mxu2 }
0x1938   :  { %v3876_v4 = vadd.f32 %v3872_v25, %v3481_v7  ;;  %v6546_v7 = vld [vmem:[%s8532_s14 + $0xd4] sm:$0xf] }
0x1939   :  { %v6112_v31 = vor.u32 %v6546_v7, %v6109_v29 }
0x193a   :  { %v3883_v19 = vadd.f32 %v6620_v52, %v3876_v4  ;;  %v6536_v52 = vld [vmem:[%s8532_s14 + $0x84] sm:$0xf] }
0x193b   :  { %4061 = vmatpush.bf16.msra.mxu0 %v6112_v31 }
0x193c   :  { %v3885_v23 = vadd.f32 %v3883_v19, %v7793_v1  ;;  %v6123_v1 = vld [vmem:[%s8532_s14 + $0xf0] sm:$0xf] }
0x193d   :  { %v6124_v9 = vor.u32 %v6551_v57, %v6123_v1 }
0x193e   :  { %3892 = vadd.xlane.f32.xlu0 %v3885_v23 }
0x193f   :  { %4045 = vmatpush.bf16.msrb.mxu3 %v6124_v9  ;;  %4062 = vmatpush.bf16.msra.mxu0 %v6104_v10 }
0x1943   :  { %4046 = vmatpush.bf16.msrb.mxu3 %v6116_v14  ;;  %4063 = vmatpush.bf16.msra.mxu0 %v6096_v41  ;;  %v6622_v14 = vld [vmem:[%s8531_s13 + $0x1] ss:$0 sm:$0xff]  ;;  %s4647_s13 = sshll.u32 %s8575_s29, 4  ;;  %s4648_s13 = int_to_ptr.hbm [resolvable:$true] %s4647_s13 }
0x1947   :  { %4047 = vmatpush.bf16.msrb.mxu3 %v6108_v28  ;;  %4064 = vmatpush.bf16.msra.mxu0 %v6088_v45 }
0x194b   :  { %4048 = vmatpush.bf16.msrb.mxu3 %v6100_v24  ;;  %4065 = vmatpush.bf16.msra.mxu0 %v6080_v50  ;;  %v6565_v50 = vld [vmem:[%s8534_s16 + $0xe8] sm:$0xff] }
0x194c   :  { %4401 = vmatpush.bf16.msrb.mxu2 %v6565_v50 }
0x194f   :  { %4049 = vmatpush.bf16.msrb.mxu3 %v6092_v40 }
0x1953   :  { %4050 = vmatpush.bf16.msrb.mxu3 %v6084_v44 }
0x1957   :  { %4051 = vmatpush.bf16.msrb.mxu3 %v6076_v47 }
0x195b   :  { %4052 = vmatpush.bf16.msrb.mxu3 %v6068_v59  ;;  %v6558_v59 = vld [vmem:[%s8534_s16 + $0xb0] sm:$0xff] }
0x195c   :  { %4386 = vmatpush.bf16.msra.mxu1 %v6558_v59  ;;  %v6554_v59 = vld [vmem:[%s8534_s16 + $0x90] sm:$0xff] }
0x19a9   :  { %v3891_v63 = vpop.xlane.xlu2 %3890 }
0x19aa   :  { %v3894_v2 = vmul.f32 %v3891_v63, %v6893_v8 }
0x19ac   :  { %v8161_v37 = vsub.f32 %v3884_v62, %v3894_v2  ;;  %v6072_v62 = vor.u32 %v6536_v52, %v6069_v6 }
0x19ae   :  { %v3898_v22 = vmul.f32 %v8161_v37, %v8161_v37  ;;  %4066 = vmatpush.bf16.msra.mxu0 %v6072_v62 }
0x19b0   :  { %3900 = vadd.xlane.f32.xlu1 %v3898_v22 }
0x19b1   :  { %v3893_v61 = vpop.xlane.xlu0 %3892 }
0x19b2   :  { %v3895_v55 = vmul.f32 %v3893_v61, %v6893_v8 }
0x19b4   :  { %v8166_v60 = vsub.f32 %v3885_v23, %v3895_v55 }
0x19b6   :  { %v3899_v56 = vmul.f32 %v8166_v60, %v8166_v60 }
0x19b8   :  { %3902 = vadd.xlane.f32.xlu2 %v3899_v56 }
0x1a23   :  { %v3901_v49 = vpop.xlane.xlu1 %3900 }
0x1a24   :  { %v3904_v51 = vmul.f32 %v3901_v49, %v6893_v8 }
0x1a26   :  { %v3906_v58 = vadd.f32 1e-12, %v3904_v51 }
0x1a28   :  { %6714 = vrsqrt.f32 %v3906_v58  ;;  %vm3914_vm8 = vweird.f32 %v3906_v58 }
0x1a2b   :  { %v3903_v25 = vpop.xlane.xlu2 %3902 }
0x1a2c   :  { %v3905_v4 = vmul.f32 %v3903_v25, %v6893_v8 }
0x1a2e   :  { %v6715_v19 = vpop.eup %6714  ;;  %v3907_v23 = vadd.f32 1e-12, %v3905_v4 }
0x1a2f   :  { %v3909_v63 = vmul.f32 %v6715_v19, %v3906_v58  ;;  %vm3915_vm7 = vweird.f32 %v6715_v19 }
0x1a30   :  { %6716 = vrsqrt.f32 %v3907_v23  ;;  %vm3916_vm9 = vmor %vm3914_vm8, %vm3915_vm7  ;;  %vm3924_vm13 = vweird.f32 %v3907_v23 }
0x1a31   :  { %v3910_v2 = vmul.f32 %v6715_v19, %v3909_v63 }
0x1a33   :  { %v3911_v22 = vmul.f32 0.5, %v3910_v2 }
0x1a35   :  { %v3912_v61 = vsub.f32 1.5, %v3911_v22  ;;  %v6564_v22 = vld [vmem:[%s8534_s16 + $0xe0] sm:$0xff] }
0x1a36   :  { %v6717_v55 = vpop.eup %6716  ;;  %4402 = vmatpush.bf16.msrb.mxu2 %v6564_v22 }
0x1a37   :  { %v3913_v56 = vmul.f32 %v6715_v19, %v3912_v61  ;;  %v3919_v1 = vmul.f32 %v6717_v55, %v3907_v23  ;;  %vm3925_vm12 = vweird.f32 %v6717_v55 }
0x1a38   :  { %vm3926_vm14 = vmor %vm3924_vm13, %vm3925_vm12 }
0x1a39   :  { %v3920_v57 = vmul.f32 %v6717_v55, %v3919_v1  ;;  %v3917_v11 = vsel %vm3916_vm9, %v6715_v19, %v3913_v56 }
0x1a3a   :  { %v3928_v16 = vmul.f32 %v3917_v11, %v8161_v37  ;;  %v6064_v37 = vld [vmem:[%s8533_s15 + $0x2] sm:$0x3] }
0x1a3b   :  { %v3921_v9 = vmul.f32 0.5, %v3920_v57  ;;  %v3962_v29 = vperm.slane %v6064_v37, 1  ;;  %v3961_v33 = vperm.slane %v6064_v37, 0  ;;  %v6557_v57 = vld [vmem:[%s8534_s16 + $0xa8] sm:$0xff]  ;;  %v6556_v37 = vld [vmem:[%s8534_s16 + $0xa0] sm:$0xff] }
0x1a3c   :  { %v3933_v20 = vmul.f32 %v6621_v15, %v3928_v16  ;;  %4387 = vmatpush.bf16.msra.mxu1 %v6557_v57 }
0x1a3d   :  { %v3922_v13 = vsub.f32 1.5, %v3921_v9 }
0x1a3e   :  { %v8276_v36 = vadd.f32 %v6622_v14, %v3933_v20 }
0x1a3f   :  { %v3923_v17 = vmul.f32 %v6717_v55, %v3922_v13 }
0x1a40   :  { %4388 = vmatpush.bf16.msra.mxu1 %v6556_v37 }
0x1a41   :  { %v3927_v0 = vsel %vm3926_vm14, %v6717_v55, %v3923_v17 }
0x1a42   :  { %v3929_v21 = vmul.f32 %v3927_v0, %v8166_v60 }
0x1a44   :  { %v3934_v27 = vmul.f32 %v6621_v15, %v3929_v21 }
0x1a46   :  { %v8278_v7 = vadd.f32 %v6622_v14, %v3934_v27  ;;  %v6563_v14 = vld [vmem:[%s8534_s16 + $0xd8] sm:$0xff] }
0x1a47   :  { %4403 = vmatpush.bf16.msrb.mxu2 %v6563_v14 }
0x1a48   :  { %v3940_v28 = vpack.c.bf16 %v8278_v7, %v8276_v36 }
0x1a4a   :  { %4053 = vmatmul.bf16.vlgmr.msrb.gmra.mxu3 %v3940_v28  ;;  %4067 = vmatmul.bf16.vlgmr.msra.gmra.mxu0 %v3940_v28 }
0x1a4b   :  { %4404 = vmatpush.bf16.msrb.mxu2 %v6562_v38 }
0x1ac7   :  { %v4068_v31 = vpop.f32.mrf.mxu0 }
0x1ac8   :  { %v8285_v32 = vadd.f32 %v4068_v31, %v3962_v29 }
0x1aca   :  { %v8288_v60 = vmul.f32 0.70710677, %v8285_v32 }
0x1acc   :  { %v4121_v35 = vmul.f32 %v8288_v60, %v8288_v60 }
0x1acd   :  { %v4054_v24 = vpop.f32.mrf.mxu3 }
0x1ace   :  { %v8292_v3 = vmin.f32 %v4121_v35, 16.0  ;;  %v8294_v10 = vadd.f32 %v4054_v24, %v3961_v33 }
0x1acf   :  { %v4070_v18 = vpop.f32.mrf.mxu0 }
0x1ad0   :  { %v4123_v30 = vmul.f32 2.1237322e-06, %v8292_v3  ;;  %v4134_v40 = vmul.f32 3.8918573e-05, %v8292_v3  ;;  %v8301_v39 = vadd.f32 %v4070_v18, %v3962_v29  ;;  %v8304_v41 = vmul.f32 0.70710677, %v8294_v10 }
0x1ad2   :  { %v4135_v34 = vadd.f32 0.001143296, %v4134_v40  ;;  %v4124_v43 = vadd.f32 0.00028619796, %v4123_v30  ;;  %v4081_v44 = vmul.f32 %v8304_v41, %v8304_v41  ;;  %v8312_v26 = vmul.f32 0.70710677, %v8301_v39 }
0x1ad4   :  { %v4136_v45 = vmul.f32 %v4135_v34, %v8292_v3  ;;  %v8318_v5 = vmin.f32 %v4081_v44, 16.0  ;;  %v4201_v42 = vmul.f32 %v8312_v26, %v8312_v26  ;;  %v4125_v51 = vmul.f32 %v4124_v43, %v8292_v3  ;;  %v6555_v43 = vld [vmem:[%s8534_s16 + $0x98] sm:$0xff] }
0x1ad5   :  { %v4056_v47 = vpop.f32.mrf.mxu3  ;;  %4389 = vmatpush.bf16.msra.mxu1 %v6555_v43 }
0x1ad6   :  { %v4137_v48 = vadd.f32 0.014752088, %v4136_v45  ;;  %v8322_v49 = vadd.f32 %v4056_v47, %v3961_v33  ;;  %v4094_v53 = vmul.f32 3.8918573e-05, %v8318_v5  ;;  %v8329_v54 = vmin.f32 %v4201_v42, 16.0  ;;  %v6561_v42 = vld [vmem:[%s8534_s16 + $0xc8] sm:$0xff] }
0x1ad7   :  { %v4083_v6 = vmul.f32 2.1237322e-06, %v8318_v5  ;;  %v4126_v63 = vadd.f32 0.0036580483, %v4125_v51  ;;  %4405 = vmatpush.bf16.msrb.mxu2 %v6561_v42 }
0x1ad8   :  { %v4138_v52 = vmul.f32 %v4137_v48, %v8292_v3  ;;  %v8333_v58 = vmul.f32 0.70710677, %v8322_v49  ;;  %v4095_v62 = vadd.f32 0.001143296, %v4094_v53  ;;  %v4203_v25 = vmul.f32 2.1237322e-06, %v8329_v54 }
0x1ad9   :  { %v4214_v19 = vmul.f32 3.8918573e-05, %v8329_v54  ;;  %v4084_v11 = vadd.f32 0.00028619796, %v4083_v6  ;;  %v4127_v20 = vmul.f32 %v4126_v63, %v8292_v3  ;;  %4390 = vmatpush.bf16.msra.mxu1 %v6554_v59 }
0x1ada   :  { %v4139_v4 = vadd.f32 0.112945676, %v4138_v52  ;;  %v4161_v23 = vmul.f32 %v8333_v58, %v8333_v58  ;;  %v4096_v2 = vmul.f32 %v4095_v62, %v8318_v5  ;;  %v4204_v55 = vadd.f32 0.00028619796, %v4203_v25 }
0x1adb   :  { %v4215_v56 = vadd.f32 0.001143296, %v4214_v19  ;;  %v4085_v29 = vmul.f32 %v4084_v11, %v8318_v5  ;;  %v4128_v40 = vadd.f32 0.05243302, %v4127_v20  ;;  %v6552_v20 = vld [vmem:[%s8534_s16 + $0x80] sm:$0xff] }
0x1adc   :  { %v4140_v61 = vmul.f32 %v4139_v4, %v8292_v3  ;;  %v8348_v1 = vmin.f32 %v4161_v23, 16.0  ;;  %v4097_v9 = vadd.f32 0.014752088, %v4096_v2  ;;  %v4205_v27 = vmul.f32 %v4204_v55, %v8329_v54  ;;  %v6560_v23 = vld [vmem:[%s8534_s16 + $0xc0] sm:$0xff]  ;;  %v6553_v55 = vld [vmem:[%s8534_s16 + $0x88] sm:$0xff] }
0x1add   :  { %v4216_v15 = vmul.f32 %v4215_v56, %v8329_v54  ;;  %v4086_v44 = vadd.f32 0.0036580483, %v4085_v29  ;;  %v4129_v50 = vmul.f32 %v4128_v40, %v8292_v3  ;;  %4406 = vmatpush.bf16.msrb.mxu2 %v6560_v23  ;;  %4391 = vmatpush.bf16.msra.mxu1 %v6553_v55 }
0x1ade   :  { %v4141_v13 = vadd.f32 0.4994258, %v4140_v61  ;;  %v4098_v16 = vmul.f32 %v4097_v9, %v8318_v5  ;;  %v4163_v17 = vmul.f32 2.1237322e-06, %v8348_v1  ;;  %v4174_v0 = vmul.f32 3.8918573e-05, %v8348_v1 }
0x1adf   :  { %v4217_v28 = vadd.f32 0.014752088, %v4216_v15  ;;  %v4206_v34 = vadd.f32 0.0036580483, %v4205_v27  ;;  %v4087_v6 = vmul.f32 %v4086_v44, %v8318_v5  ;;  %v4130_v22 = vadd.f32 0.18741608, %v4129_v50 }
0x1ae0   :  { %v4142_v21 = vmul.f32 %v4141_v13, %v8292_v3  ;;  %v4099_v31 = vadd.f32 0.112945676, %v4098_v16  ;;  %v4175_v33 = vadd.f32 0.001143296, %v4174_v0  ;;  %v4164_v30 = vadd.f32 0.00028619796, %v4163_v17 }
0x1ae1   :  { %v4218_v24 = vmul.f32 %v4217_v28, %v8329_v54  ;;  %v4207_v51 = vmul.f32 %v4206_v34, %v8329_v54  ;;  %v4088_v57 = vadd.f32 0.05243302, %v4087_v6  ;;  %v4131_v0 = vmul.f32 %v4130_v22, %v8292_v3  ;;  %4392 = vmatpush.bf16.msra.mxu1 %v6552_v20 }
0x1ae2   :  { %v8367_v35 = vadd.f32 1.0, %v4142_v21  ;;  %v4100_v18 = vmul.f32 %v4099_v31, %v8318_v5  ;;  %v4176_v12 = vmul.f32 %v4175_v33, %v8348_v1  ;;  %v4165_v48 = vmul.f32 %v4164_v30, %v8348_v1 }
0x1ae3   :  { %v4219_v46 = vadd.f32 0.112945676, %v4218_v24  ;;  %v4208_v61 = vadd.f32 0.05243302, %v4207_v51  ;;  %v4089_v28 = vmul.f32 %v4088_v57, %v8318_v5 }
0x1ae4   :  { %6718 = vrcp.f32 %v8367_v35  ;;  %v4101_v45 = vadd.f32 0.4994258, %v4100_v18  ;;  %v4177_v52 = vadd.f32 0.014752088, %v4176_v12  ;;  %v4166_v2 = vadd.f32 0.0036580483, %v4165_v48 }
0x1ae5   :  { %v4220_v53 = vmul.f32 %v4219_v46, %v8329_v54  ;;  %v4209_v14 = vmul.f32 %v4208_v61, %v8329_v54  ;;  %v4155_v37 = vand.u32 2147483648, %v8367_v35  ;;  %vm4149_vm0 = vweird.f32 %v8367_v35 }
0x1ae6   :  { %v4102_v47 = vmul.f32 %v4101_v45, %v8318_v5  ;;  %v4178_v19 = vmul.f32 %v4177_v52, %v8348_v1  ;;  %v4167_v16 = vmul.f32 %v4166_v2, %v8348_v1  ;;  %v4153_v3 = vand.u32 2147483647, %v8367_v35 }
0x1ae7   :  { %v4221_v4 = vadd.f32 0.4994258, %v4220_v53  ;;  %v4210_v38 = vadd.f32 0.18741608, %v4209_v14  ;;  %v4132_v18 = vadd.f32 1.1283791, %v4131_v0 }
0x1ae8   :  { %v8391_v62 = vadd.f32 1.0, %v4102_v47  ;;  %v4179_v9 = vadd.f32 0.112945676, %v4178_v19  ;;  %v4168_v31 = vadd.f32 0.05243302, %v4167_v16  ;;  %v4156_v12 = vor.u32 1.1754944e-38, %v4155_v37 }
0x1ae9   :  { %v4222_v11 = vmul.f32 %v4221_v4, %v8329_v54  ;;  %v4090_v40 = vadd.f32 0.18741608, %v4089_v28  ;;  %vm4154_vm2 = vcmp.eq.f32.partialorder %v4153_v3, 8.507059e+37  ;;  %v4133_v48 = vmul.f32 %v4132_v18, %v8288_v60 }
0x1aea   :  { %v6719_v25 = vpop.eup %6718  ;;  %6720 = vrcp.f32 %v8391_v62  ;;  %v4180_v17 = vmul.f32 %v4179_v9, %v8348_v1  ;;  %v4169_v45 = vmul.f32 %v4168_v31, %v8348_v1  ;;  %vm4109_vm3 = vweird.f32 %v8391_v62 }
0x1aeb   :  { %v4145_v63 = vmul.f32 %v6719_v25, %v8367_v35  ;;  %v8403_v15 = vadd.f32 1.0, %v4222_v11  ;;  %vm4150_vm15 = vweird.f32 %v6719_v25  ;;  %v4211_v35 = vmul.f32 %v4210_v38, %v8329_v54 }
0x1aec   :  { %v4181_v33 = vadd.f32 0.4994258, %v4180_v17  ;;  %vm4151_vm1 = vmor %vm4149_vm0, %vm4150_vm15  ;;  %v4091_v50 = vmul.f32 %v4090_v40, %v8318_v5  ;;  %v4113_v53 = vand.u32 2147483647, %v8391_v62  ;;  %v4115_v6 = vand.u32 2147483648, %v8391_v62 }
0x1aed   :  { %v4146_v56 = vsub.f32 1.0, %v4145_v63  ;;  %6722 = vrcp.f32 %v8403_v15  ;;  %v4170_v54 = vadd.f32 0.18741608, %v4169_v45  ;;  %v4212_v4 = vadd.f32 1.1283791, %v4211_v35 }
0x1aee   :  { %v4182_v34 = vmul.f32 %v4181_v33, %v8348_v1  ;;  %v4233_v60 = vand.u32 2147483647, %v8403_v15  ;;  %v4092_v5 = vadd.f32 1.1283791, %v4091_v50  ;;  %vm4114_vm10 = vcmp.eq.f32.partialorder %v4113_v53, 8.507059e+37 }
0x1aef   :  { %v4147_v13 = vmul.f32 %v6719_v25, %v4146_v56  ;;  %vm4229_vm11 = vweird.f32 %v8403_v15  ;;  %v4116_v55 = vor.u32 1.1754944e-38, %v4115_v6  ;;  %v4171_v57 = vmul.f32 %v4170_v54, %v8348_v1  ;;  %v6623_v35 = vld [vmem:[%s8535_s17 + $0x1] ss:$0 sm:$0xff] }
0x1af0   :  { %v6721_v21 = vpop.eup %6720  ;;  %v4183_v46 = vadd.f32 1.0, %v4182_v34  ;;  %vm4234_vm8 = vcmp.eq.f32.partialorder %v4233_v60, 8.507059e+37  ;;  %v4093_v17 = vmul.f32 %v4092_v5, %v8304_v41  ;;  %v4074_v1 = vmul.f32 0.5, %v8285_v32 }
0x1af1   :  { %v4148_v27 = vadd.f32 %v6719_v25, %v4147_v13  ;;  %v4105_v29 = vmul.f32 %v6721_v21, %v8391_v62  ;;  %vm4110_vm4 = vweird.f32 %v6721_v21  ;;  %v4213_v62 = vmul.f32 %v4212_v4, %v8312_v26 }
0x1af2   :  { %6724 = vrcp.f32 %v4183_v46  ;;  %vm8431_vm6 = vmor %vm4109_vm3, %vm4110_vm4  ;;  %v4076_v26 = vmul.f32 0.5, %v8301_v39  ;;  %vm4189_vm12 = vweird.f32 %v4183_v46  ;;  %v4073_v32 = vmul.f32 0.5, %v8294_v10 }
0x1af3   :  { %v4106_v24 = vsub.f32 1.0, %v4105_v29  ;;  %v4152_v30 = vsel %vm4151_vm1, %v6719_v25, %v4148_v27  ;;  %v6723_v44 = vpop.eup %6722  ;;  %v4235_v25 = vand.u32 2147483648, %v8403_v15  ;;  %v4195_v27 = vand.u32 2147483648, %v4183_v46 }
0x1af4   :  { %v4157_v42 = vsel %vm4154_vm2, %v4156_v12, %v4152_v30  ;;  %v4225_v47 = vmul.f32 %v6723_v44, %v8403_v15  ;;  %vm4230_vm5 = vweird.f32 %v6723_v44  ;;  %v4172_v15 = vadd.f32 1.1283791, %v4171_v57 }
0x1af5   :  { %v4107_v43 = vmul.f32 %v6721_v21, %v4106_v24  ;;  %v4158_v59 = vmul.f32 %v4157_v42, %v4133_v48  ;;  %vm4231_vm7 = vmor %vm4229_vm11, %vm4230_vm5  ;;  %v4236_v56 = vor.u32 1.1754944e-38, %v4235_v25  ;;  %v4196_v24 = vor.u32 1.1754944e-38, %v4195_v27 }
0x1af6   :  { %v4226_v52 = vsub.f32 1.0, %v4225_v47  ;;  %v4173_v41 = vmul.f32 %v4172_v15, %v8333_v58  ;;  %v4075_v39 = vmul.f32 0.5, %v8322_v49  ;;  %v6582_v15 = vld [vmem:[%s8540_s22 + $0x30] sm:$0xff]  ;;  %vm4472_vm5 = vcmask 1040384  }
0x1af7   :  { %v4108_v51 = vadd.f32 %v6721_v21, %v4107_v43  ;;  %v6130_v61 = vclamps-f32 %v4158_v59, 1.0 }
0x1af8   :  { %v4227_v19 = vmul.f32 %v6723_v44, %v4226_v52  ;;  %v6725_v22 = vpop.eup %6724 }
0x1af9   :  { %v4112_v63 = vsel %vm8431_vm6, %v6721_v21, %v4108_v51  ;;  %v4185_v9 = vmul.f32 %v6725_v22, %v4183_v46  ;;  %v4242_v20 = vadd.f32 1.0, %v6130_v61  ;;  %v4193_v21 = vand.u32 2147483647, %v4183_v46  ;;  %v6571_v61 = vld [vmem:[%s8538_s20 + $0x18] sm:$0xff] }
0x1afa   :  { %v4228_v2 = vadd.f32 %v6723_v44, %v4227_v19  ;;  %v4117_v13 = vsel %vm4114_vm10, %v4116_v55, %v4112_v63  ;;  %vm4190_vm9 = vweird.f32 %v6725_v22  ;;  %v6570_v55 = vld [vmem:[%s8538_s20 + $0x10] sm:$0xff] }
0x1afb   :  { %v4186_v14 = vsub.f32 1.0, %v4185_v9  ;;  %v4118_v28 = vmul.f32 %v4117_v13, %v4093_v17  ;;  %v4246_v33 = vmul.f32 %v4242_v20, %v4074_v1  ;;  %vm4191_vm13 = vmor %vm4189_vm12, %vm4190_vm9  ;;  %vm4194_vm14 = vcmp.eq.f32.partialorder %v4193_v21, 8.507059e+37  ;;  %v6568_v9 = vld [vmem:[%s8538_s20] sm:$0xff]  ;;  %v6583_v17 = vld [vmem:[%s8540_s22 + $0x38] sm:$0xff] }
0x1afc   :  { %v4232_v11 = vsel %vm4231_vm7, %v6723_v44, %v4228_v2  ;;  %v6573_v2 = vld [vmem:[%s8538_s20 + $0x28] sm:$0xff]  ;;  %4626 = vmatpush.bf16.msrb.mxu0 %v6583_v17  ;;  %v6580_v1 = vld [vmem:[%s8540_s22 + $0x20] sm:$0xff] }
0x1afd   :  { %v4237_v16 = vsel %vm4234_vm8, %v4236_v56, %v4232_v11  ;;  %v4187_v29 = vmul.f32 %v6725_v22, %v4186_v14  ;;  %v6129_v38 = vclamps-f32 %v4118_v28, 1.0 }
0x1afe   :  { %v4238_v0 = vmul.f32 %v4237_v16, %v4213_v62  ;;  %v6569_v62 = vld [vmem:[%s8538_s20 + $0x8] sm:$0xff] }
0x1aff   :  { %v4188_v31 = vadd.f32 %v6725_v22, %v4187_v29  ;;  %v4241_v43 = vadd.f32 1.0, %v6129_v38 }
0x1b00   :  { %v6132_v37 = vclamps-f32 %v4238_v0, 1.0  ;;  %4627 = vmatpush.bf16.msrb.mxu0 %v6582_v15 }
0x1b01   :  { %v4192_v30 = vsel %vm4191_vm13, %v6725_v22, %v4188_v31  ;;  %v4245_v46 = vmul.f32 %v4241_v43, %v4073_v32  ;;  %v6572_v22 = vld [vmem:[%s8538_s20 + $0x20] sm:$0xff] }
0x1b02   :  { %v4244_v3 = vadd.f32 1.0, %v6132_v37  ;;  %v4197_v40 = vsel %vm4194_vm14, %v4196_v24, %v4192_v30 }
0x1b03   :  { %v4198_v12 = vmul.f32 %v4197_v40, %v4173_v41 }
0x1b04   :  { %v4248_v18 = vmul.f32 %v4244_v3, %v4076_v26 }
0x1b05   :  { %v6131_v44 = vclamps-f32 %v4198_v12, 1.0  ;;  %v6625_v12 = vld [vmem:[%s8537_s19 + $0x1] ss:$0 sm:$0xff] }
0x1b06   :  { %v4250_v34 = vpack.c.bf16 %v4248_v18, %v4246_v33  ;;  %v6579_v33 = vld [vmem:[%s8540_s22 + $0x18] sm:$0xff]  ;;  %v6624_v18 = vld [vmem:[%s8536_s18 + $0x1] ss:$0 sm:$0xff] }
0x1b07   :  { %v4243_v45 = vadd.f32 1.0, %v6131_v44 }
0x1b08   :  { %4407 = vmatmul.bf16.vlgmr.msrb.gmra.mxu2 %v4250_v34 }
0x1b09   :  { %v4247_v42 = vmul.f32 %v4243_v45, %v4075_v39 }
0x1b0b   :  { %v4249_v58 = vpack.c.bf16 %v4247_v42, %v4245_v46 }
0x1b0d   :  { %4393 = vmatmul.bf16.vlgmr.msra.gmra.mxu1 %v4249_v58  ;;  %v6578_v58 = vld [vmem:[%s8540_s22 + $0x10] sm:$0xff] }
0x1b8a   :  { %v4394_v47 = vpop.f32.mrf.mxu1 }
0x1b8b   :  { %v4408_v48 = vpop.f32.mrf.mxu2  ;;  %v4395_v50 = vadd.f32 %v6623_v35, %v4394_v47  ;;  %v6576_v47 = vld [vmem:[%s8540_s22] sm:$0xff] }
0x1b8d   :  { %v4409_v51 = vadd.f32 %v4408_v48, %v4395_v50  ;;  %v6626_v48 = vld [vmem:[%s8539_s21] ss:$0 sm:$0xff] }
0x1b8f   :  { %v4413_v53 = vadd.f32 %v4409_v51, %v8276_v36  ;;  %v6575_v36 = vld [vmem:[%s8538_s20 + $0x38] sm:$0xff] }
0x1b90   :  { %4543 = vmatpush.bf16.msra.mxu3 %v6575_v36 }
0x1b91   :  { %4419 = vadd.xlane.f32.xlu1 %v4413_v53 }
0x1b92   :  { %v4396_v52 = vpop.f32.mrf.mxu1 }
0x1b93   :  { %v4397_v10 = vadd.f32 %v6623_v35, %v4396_v52  ;;  %v4410_v59 = vpop.f32.mrf.mxu2  ;;  %v6577_v35 = vld [vmem:[%s8540_s22 + $0x8] sm:$0xff] }
0x1b95   :  { %v4411_v49 = vadd.f32 %v4410_v59, %v4397_v10  ;;  %v6627_v59 = vld [vmem:[%s8574_s24] ss:$0 sm:$0xff] }
0x1b97   :  { %v4414_v6 = vadd.f32 %v4411_v49, %v8278_v7  ;;  %v6574_v7 = vld [vmem:[%s8538_s20 + $0x30] sm:$0xff] }
0x1b98   :  { %4544 = vmatpush.bf16.msra.mxu3 %v6574_v7 }
0x1b99   :  { %4421 = vadd.xlane.f32.xlu0 %v4414_v6 }
0x1b9c   :  { %4545 = vmatpush.bf16.msra.mxu3 %v6573_v2 }
0x1ba0   :  { %4546 = vmatpush.bf16.msra.mxu3 %v6572_v22 }
0x1ba4   :  { %4547 = vmatpush.bf16.msra.mxu3 %v6571_v61 }
0x1ba8   :  { %4548 = vmatpush.bf16.msra.mxu3 %v6570_v55 }
0x1bac   :  { %4549 = vmatpush.bf16.msra.mxu3 %v6569_v62 }
0x1bb0   :  { %4550 = vmatpush.bf16.msra.mxu3 %v6568_v9 }
0x1c04   :  { %v4420_v25 = vpop.xlane.xlu1 %4419 }
0x1c05   :  { %v4423_v54 = vmul.f32 %v4420_v25, %v6893_v8 }
0x1c07   :  { %v4425_v4 = vsub.f32 %v4413_v53, %v4423_v54 }
0x1c09   :  { %v4427_v19 = vmul.f32 %v4425_v4, %v4425_v4 }
0x1c0b   :  { %4429 = vadd.xlane.f32.xlu0 %v4427_v19 }
0x1c0c   :  { %v4422_v60 = vpop.xlane.xlu0 %4421 }
0x1c0d   :  { %v4424_v5 = vmul.f32 %v4422_v60, %v6893_v8 }
0x1c0f   :  { %v4426_v23 = vsub.f32 %v4414_v6, %v4424_v5 }
0x1c11   :  { %v4428_v63 = vmul.f32 %v4426_v23, %v4426_v23 }
0x1c13   :  { %4431 = vadd.xlane.f32.xlu2 %v4428_v63 }
0x1c7e   :  { %v4430_v56 = vpop.xlane.xlu0 %4429 }
0x1c7f   :  { %v4433_v57 = vmul.f32 %v4430_v56, %v6893_v8 }
0x1c81   :  { %v4435_v11 = vadd.f32 1e-12, %v4433_v57 }
0x1c83   :  { %6726 = vrsqrt.f32 %v4435_v11  ;;  %vm4443_vm0 = vweird.f32 %v4435_v11 }
0x1c86   :  { %v4432_v13 = vpop.xlane.xlu2 %4431 }
0x1c87   :  { %v4434_v16 = vmul.f32 %v4432_v13, %v6893_v8  ;;  %v6581_v8 = vld [vmem:[%s8540_s22 + $0x28] sm:$0xff] }
0x1c88   :  { %4628 = vmatpush.bf16.msrb.mxu0 %v6581_v8 }
0x1c89   :  { %v6727_v0 = vpop.eup %6726  ;;  %v4436_v14 = vadd.f32 1e-12, %v4434_v16 }
0x1c8a   :  { %v4438_v20 = vmul.f32 %v6727_v0, %v4435_v11  ;;  %vm4444_vm15 = vweird.f32 %v6727_v0 }
0x1c8b   :  { %6728 = vrsqrt.f32 %v4436_v14  ;;  %vm4445_vm1 = vmor %vm4443_vm0, %vm4444_vm15  ;;  %vm4453_vm3 = vweird.f32 %v4436_v14 }
0x1c8c   :  { %v4439_v21 = vmul.f32 %v6727_v0, %v4438_v20  ;;  %4629 = vmatpush.bf16.msrb.mxu0 %v6580_v1 }
0x1c8e   :  { %v4440_v27 = vmul.f32 0.5, %v4439_v21 }
0x1c90   :  { %v4441_v28 = vsub.f32 1.5, %v4440_v27  ;;  %4630 = vmatpush.bf16.msrb.mxu0 %v6579_v33 }
0x1c91   :  { %v6729_v37 = vpop.eup %6728 }
0x1c92   :  { %v4448_v29 = vmul.f32 %v6729_v37, %v4436_v14  ;;  %v4442_v26 = vmul.f32 %v6727_v0, %v4441_v28  ;;  %vm4454_vm2 = vweird.f32 %v6729_v37 }
0x1c93   :  { %vm4455_vm4 = vmor %vm4453_vm3, %vm4454_vm2 }
0x1c94   :  { %v4449_v3 = vmul.f32 %v6729_v37, %v4448_v29  ;;  %v4446_v41 = vsel %vm4445_vm1, %v6727_v0, %v4442_v26  ;;  %4631 = vmatpush.bf16.msrb.mxu0 %v6578_v58 }
0x1c95   :  { %v4457_v30 = vmul.f32 %v4446_v41, %v4425_v4 }
0x1c96   :  { %v4450_v31 = vmul.f32 0.5, %v4449_v3 }
0x1c97   :  { %v4462_v43 = vmul.f32 %v6624_v18, %v4457_v30 }
0x1c98   :  { %v4451_v24 = vsub.f32 1.5, %v4450_v31  ;;  %4632 = vmatpush.bf16.msrb.mxu0 %v6577_v35 }
0x1c99   :  { %v4467_v39 = vadd.f32 %v6625_v12, %v4462_v43 }
0x1c9a   :  { %v4452_v38 = vmul.f32 %v6729_v37, %v4451_v24 }
0x1c9c   :  { %v4456_v40 = vsel %vm4455_vm4, %v6729_v37, %v4452_v38  ;;  %4633 = vmatpush.bf16.msrb.mxu0 %v6576_v47 }
0x1c9d   :  { %v4458_v34 = vmul.f32 %v4456_v40, %v4426_v23 }
0x1c9f   :  { %v4463_v44 = vmul.f32 %v6624_v18, %v4458_v34 }
0x1ca1   :  { %v4468_v32 = vadd.f32 %v6625_v12, %v4463_v44 }
0x1ca3   :  { %v4470_v45 = vrot.slane %v4468_v32, 7 }
0x1ca5   :  { %v4473_v46 = vsel %vm4472_vm5, %v4467_v39, %v4470_v45 }
0x1ca6   :  { %v4474_v42 = vpack.c.bf16 %v4473_v46, %v4473_v46 }
0x1ca8   :  { %4551 = vmatmul.bf16.vlgmr.msra.gmra.mxu3 %v4474_v42 }
0x1d2b   :  { %v4552_v50 = vpop.f32.mrf.mxu3 }
0x1d2c   :  { %v4553_v51 = vadd.f32 %v6626_v48, %v4552_v50 }
0x1d2e   :  { %6730 = vtanh.f32 %v4553_v51 }
0x1d33   :  { %v4554_v53 = vpop.f32.mrf.mxu3 }
0x1d34   :  { %v6731_v52 = vpop.eup %6730 }
0x1d35   :  { %v4557_v10 = vpack.c.bf16 %v6731_v52, %v6731_v52 }
0x1d37   :  { %4634 = vmatmul.bf16.vlgmr.msrb.gmra.mxu0 %v4557_v10 }
0x1db4   :  { %v4635_v49 = vpop.f32.mrf.mxu0 }
0x1db5   :  { %v4636_v6 = vadd.f32 %v6627_v59, %v4635_v49 }
0x1db7   :  { %4639 = vst [vmem:[#allocation2] sm:$0x3] %v4636_v6 }
0x1db8   :  { %4650 = dma.vmem_to_hbm [thread:$0]  %s4646_s0, 32, %s4648_s13, [#allocation3]  }
0x1dbc   :  { %v4637_v25 = vpop.f32.mrf.mxu0 }
0x1dbd   :  { %6758 = dma.done.wait [#allocation3], 32  }
0x1dbe   :  { %6759 = vsyncadd [#allocation3], 4294967264 }
0x1dbf   :  { %4655 = vsyncpa [#allocation3], 1 }

</bundles_post_ra>
